<compile_context>
chip_gen: v5e
topology: v5e:2x2
jax: 0.10.0
libtpu: 0.0.40
codegen_flags: <defaults>
</compile_context>

<pallas_src>
import functools

import jax
import jax.numpy as jnp
from jax.experimental import pallas as pl
from jax.experimental.pallas import tpu as pltpu


def _round_up(x: int, m: int) -> int:
    return ((x + m - 1) // m) * m


def _cdiv(a: int, b: int) -> int:
    return (a + b - 1) // b


def _tpu_generation() -> str:
    try:
        kind = jax.devices()[0].device_kind.lower()
    except Exception:
        return "unknown"
    if "v5 lite" in kind or "v5e" in kind or "v5litepod" in kind:
        return "v5e"
    if "v6" in kind:
        return "v6e"
    if "v7" in kind or "7x" in kind:
        return "v7x"
    if "v5" in kind:
        return "v5p"
    if "v4" in kind:
        return "v4"
    return "unknown"


def get_mlp_config(hidden_size: int, dtype=jnp.bfloat16) -> dict:
    """Per-generation (tm, ti, vmem_limit, cores, act precision) selection."""
    gen = _tpu_generation()
    bf16 = jnp.dtype(dtype) == jnp.dtype(jnp.bfloat16)
    if gen == "v6e":
        return dict(tm=512, ti=1024, vmem_limit_bytes=100 * 1024 * 1024,
                    num_tc=1, low_prec_act=bf16)
    if gen == "v5e":
        # No bf16 VPU/EUP on v5e -> keep SwiGLU elementwise in f32.
        return dict(tm=256, ti=1024, vmem_limit_bytes=96 * 1024 * 1024,
                    num_tc=1, low_prec_act=False)
    if gen == "v7x":
        # 64 MiB VMEM per TC: keep the (H, 2*ti) slab small for large H.
        ti = 256 if hidden_size >= 8192 else 512
        return dict(tm=512, ti=ti, vmem_limit_bytes=56 * 1024 * 1024,
                    num_tc=2, low_prec_act=bf16)
    if gen in ("v4", "v5p"):
        return dict(tm=512, ti=1024, vmem_limit_bytes=96 * 1024 * 1024,
                    num_tc=2, low_prec_act=False)
    # Unknown chip: most conservative (v7x-safe) budget.
    return dict(tm=256, ti=512, vmem_limit_bytes=48 * 1024 * 1024,
                num_tc=1, low_prec_act=False)


def _mlp_kernel(x_ref, gu_w_ref, down_w_ref, o_ref, *scratch,
                ti, n_i, low_prec_act):
    # x_ref:      (tm, H)        token tile (resident across the I grid axis)
    # gu_w_ref:   (H, 2*ti)      fused [gate | up] weight tile for I-tile k
    # down_w_ref: (ti, H)        down-proj weight tile for I-tile k
    # o_ref:      (tm, H)        output tile (written once, at the last k)
    # scratch:    ((tm, H) f32,) accumulator -- only present when n_i > 1
    x = x_ref[...]
    # Single fused matmul for the gate and up branches (native dtype operands,
    # f32 accumulation on the MXU).
    gu = jnp.dot(x, gu_w_ref[...], preferred_element_type=jnp.float32)
    gate = gu[:, :ti]
    up = gu[:, ti:]
    if low_prec_act:
        # bf16-native VPU/EUP (v6e/v7x): halve elementwise / vreg pressure.
        gate = gate.astype(x_ref.dtype)
        up = up.astype(x_ref.dtype)
    h = up * (gate * jax.nn.sigmoid(gate))  # SwiGLU

    partial = jnp.dot(h.astype(down_w_ref.dtype), down_w_ref[...],
                      preferred_element_type=jnp.float32)

    if n_i == 1:
        # Single I tile: no accumulator round-trip at all.
        o_ref[...] = partial.astype(o_ref.dtype)
    else:
        acc_ref = scratch[0]
        k = pl.program_id(1)

        @pl.when(k == 0)
        def _():
            acc_ref[...] = partial          # direct write: no zero-init pass

        @pl.when(k > 0)
        def _():
            acc_ref[...] += partial

        @pl.when(k == n_i - 1)
        def _():
            o_ref[...] = acc_ref[...].astype(o_ref.dtype)


def prepare_mlp_weights(gate_w, up_w, down_w, *, ti=512, dtype=None):
    """One-time weight preparation (outside the jitted forward):
      - optional cast (e.g. to bf16),
      - transpose PyTorch [out, in] -> [in, out],
      - pad the intermediate dim I up to a multiple of ti,
      - fuse gate|up per I-tile into a single (H, 2*I_pad) array.
    Returns (fused_gu_w [H, 2*I_pad], down_w_t [I_pad, H], ti_eff)."""
    I, H = gate_w.shape
    if dtype is not None:
        gate_w = gate_w.astype(dtype)
        up_w = up_w.astype(dtype)
        down_w = down_w.astype(dtype)

    ti_eff = min(ti, _round_up(I, 128))
    I_pad = _round_up(I, ti_eff)

    gate_wt = gate_w.T  # (H, I)
    up_wt = up_w.T      # (H, I)
    down_wt = down_w.T  # (I, H)
    if I_pad != I:
        pad = I_pad - I
        gate_wt = jnp.pad(gate_wt, ((0, 0), (0, pad)))
        up_wt = jnp.pad(up_wt, ((0, 0), (0, pad)))
        down_wt = jnp.pad(down_wt, ((0, pad), (0, 0)))

    n_i = I_pad // ti_eff
    # Per I-tile layout: [gate_tile_k | up_tile_k] -> one wide dot in-kernel.
    fused = jnp.concatenate(
        [gate_wt.reshape(H, n_i, ti_eff), up_wt.reshape(H, n_i, ti_eff)],
        axis=2).reshape(H, 2 * I_pad)
    return fused, down_wt, ti_eff


@functools.partial(jax.jit, static_argnames=("ti", "tm", "vmem_limit_bytes",
                                             "num_tc", "low_prec_act"))
def llama_mlp_forward(x, fused_gu_w, down_w_t, *, ti, tm=512,
                      vmem_limit_bytes=48 * 1024 * 1024, num_tc=1,
                      low_prec_act=False):
    """x: [B, S, H]; fused_gu_w: [H, 2*I_pad]; down_w_t: [I_pad, H]."""
    B, S, H = x.shape
    I_pad = down_w_t.shape[0]
    tokens = B * S
    x2d = x.reshape(tokens, H)

    # Token tile: >=128 rows (MXU height); pad tokens so no rows are dropped.
    tm_eff = min(tm, _round_up(tokens, 128))
    # On multi-TensorCore chips make sure the 'parallel' M axis has at least
    # num_tc tiles whenever tokens allow it (otherwise one core sits idle).
    if num_tc > 1 and tokens >= num_tc * 128:
        tm_eff = min(tm_eff, _round_up(_cdiv(tokens, num_tc), 128))
    tokens_p = _round_up(tokens, tm_eff)
    if tokens_p != tokens:
        x2d = jnp.pad(x2d, ((0, tokens_p - tokens), (0, 0)))

    n_m = tokens_p // tm_eff
    n_i = I_pad // ti

    itemsize = jnp.dtype(x.dtype).itemsize
    w_bytes = (fused_gu_w.size * jnp.dtype(fused_gu_w.dtype).itemsize
               + down_w_t.size * jnp.dtype(down_w_t.dtype).itemsize)
    cost = pl.CostEstimate(
        flops=6 * tokens_p * H * I_pad,          # gate + up + down matmuls
        transcendentals=tokens_p * I_pad,        # sigmoid
        bytes_accessed=(x2d.size * itemsize
                        + n_m * w_bytes          # weights re-streamed per M tile
                        + tokens_p * H * itemsize),
    )

    low_prec = bool(low_prec_act) and x.dtype == jnp.bfloat16
    scratch_shapes = [] if n_i == 1 else [pltpu.VMEM((tm_eff, H), jnp.float32)]

    out2d = pl.pallas_call(
        functools.partial(_mlp_kernel, ti=ti, n_i=n_i, low_prec_act=low_prec),
        out_shape=jax.ShapeDtypeStruct((tokens_p, H), x.dtype),
        grid_spec=pltpu.PrefetchScalarGridSpec(
            num_scalar_prefetch=0,
            grid=(n_m, n_i),
            in_specs=[
                pl.BlockSpec((tm_eff, H), lambda i, k: (i, 0)),   # x tile
                pl.BlockSpec((H, 2 * ti), lambda i, k: (0, k)),   # gate|up tile
                pl.BlockSpec((ti, H), lambda i, k: (k, 0)),       # down tile
            ],
            out_specs=pl.BlockSpec((tm_eff, H), lambda i, k: (i, 0)),
            scratch_shapes=scratch_shapes,
        ),
        compiler_params=pltpu.CompilerParams(
            dimension_semantics=("parallel", "arbitrary"),
            vmem_limit_bytes=vmem_limit_bytes,
        ),
        cost_estimate=cost,
    )(x2d, fused_gu_w, down_w_t)

    return out2d[:tokens].reshape(B, S, H)


def _reference(x, gate_w, up_w, down_w):
    xf = x.astype(jnp.float32)
    g = xf @ gate_w.astype(jnp.float32).T
    u = xf @ up_w.astype(jnp.float32).T
    h = u * (g * jax.nn.sigmoid(g))
    return h @ down_w.astype(jnp.float32).T


if __name__ == "__main__":
    # Small shapes consistent with a Llama MLP.
    batch, seq = 2, 8
    hidden_size = 256
    intermediate_size = 512

    key = jax.random.PRNGKey(0)
    kx, kg, ku, kd = jax.random.split(key, 4)

    # PyTorch Linear layout: [out_features, in_features]; run the kernel in
    # bf16 (native MXU dtype) with f32 accumulation.
    x = jax.random.normal(kx, (batch, seq, hidden_size),
                          dtype=jnp.float32).astype(jnp.bfloat16)
    gate_w = (jax.random.normal(kg, (intermediate_size, hidden_size),
                                dtype=jnp.float32) * 0.02).astype(jnp.bfloat16)
    up_w = (jax.random.normal(ku, (intermediate_size, hidden_size),
                              dtype=jnp.float32) * 0.02).astype(jnp.bfloat16)
    down_w = (jax.random.normal(kd, (hidden_size, intermediate_size),
                                dtype=jnp.float32) * 0.02).astype(jnp.bfloat16)

    ref = _reference(x, gate_w, up_w, down_w)
    cfg = get_mlp_config(hidden_size, dtype=x.dtype)

    # --- Test 1: generation-default config (tiny I -> single I tile path). ---
    fused_gu_w, down_w_t, ti1 = prepare_mlp_weights(gate_w, up_w, down_w,
                                                    ti=cfg["ti"])
    out1 = llama_mlp_forward(
        x, fused_gu_w, down_w_t, ti=ti1, tm=cfg["tm"],
        vmem_limit_bytes=cfg["vmem_limit_bytes"], num_tc=cfg["num_tc"],
        low_prec_act=cfg["low_prec_act"])
    out1 = jax.block_until_ready(out1)
    assert out1.shape == (batch, seq, hidden_size)
    assert jnp.allclose(out1.astype(jnp.float32), ref, atol=2e-2, rtol=5e-2), \
        "mismatch vs reference (single I-tile path)"

    # --- Test 2: force ti < I to exercise the I-grid accumulator path. ---
    fused_gu_w2, down_w_t2, ti2 = prepare_mlp_weights(gate_w, up_w, down_w,
                                                      ti=256)
    out2 = llama_mlp_forward(
        x, fused_gu_w2, down_w_t2, ti=ti2, tm=cfg["tm"],
        vmem_limit_bytes=cfg["vmem_limit_bytes"], num_tc=cfg["num_tc"],
        low_prec_act=cfg["low_prec_act"])
    out2 = jax.block_until_ready(out2)
    assert out2.shape == (batch, seq, hidden_size)
    assert jnp.allclose(out2.astype(jnp.float32), ref, atol=2e-2, rtol=5e-2), \
        "mismatch vs reference (accumulator path)"

    print("KERNEL_OK")
</pallas_src>

<mosaic_0001>
module attributes {stable_mosaic.version = 11 : i64} {
  func.func @_mlp_kernel(%arg0: i32, %arg1: i32, %arg2: memref<128x256xbf16, #tpu.memory_space<vmem>>, %arg3: memref<256x1024xbf16, #tpu.memory_space<vmem>>, %arg4: memref<512x256xbf16, #tpu.memory_space<vmem>>, %arg5: memref<128x256xbf16, #tpu.memory_space<vmem>>) attributes {dimension_semantics = [#tpu.dimension_semantics<parallel>, #tpu.dimension_semantics<arbitrary>], iteration_bounds = array<i64: 1, 1>, scalar_prefetch = 0 : i64, scratch_operands = 0 : i64, tpu.core_type = #tpu.core_type<tc>, window_params = [{transform_indices = @transform_0, window_bounds = array<i64: 128, 256>}, {transform_indices = @transform_1, window_bounds = array<i64: 256, 1024>}, {transform_indices = @transform_2, window_bounds = array<i64: 512, 256>}, {transform_indices = @transform_3, window_bounds = array<i64: 128, 256>}]} {
    %c0 = arith.constant 0 : index
    %c0_0 = arith.constant 0 : index
    %0 = vector.load %arg2[%c0, %c0_0] : memref<128x256xbf16, #tpu.memory_space<vmem>>, vector<128x256xbf16>
    %c0_1 = arith.constant 0 : index
    %c0_2 = arith.constant 0 : index
    %1 = vector.load %arg3[%c0_1, %c0_2] : memref<256x1024xbf16, #tpu.memory_space<vmem>>, vector<256x1024xbf16>
    %cst = arith.constant dense<0.000000e+00> : vector<128x1024xf32>
    %2 = tpu.matmul %0, %1, %cst {dimension_numbers = #tpu.dot_dimension_numbers<[1], [0], [0], [1], [0, 0, 1, 1], [], []>} : vector<128x256xbf16>, vector<256x1024xbf16>, vector<128x1024xf32> -> vector<128x1024xf32>
    %3 = vector.extract_strided_slice %2 {offsets = [0, 0], sizes = [128, 512], strides = [1, 1]} : vector<128x1024xf32> to vector<128x512xf32>
    %4 = vector.extract_strided_slice %2 {offsets = [0, 512], sizes = [128, 512], strides = [1, 1]} : vector<128x1024xf32> to vector<128x512xf32>
    %5 = arith.negf %3 : vector<128x512xf32>
    %6 = math.exp %5 : vector<128x512xf32>
    %cst_3 = arith.constant 1.000000e+00 : f32
    %7 = vector.broadcast %cst_3 : f32 to vector<128x512xf32>
    %8 = arith.addf %7, %6 : vector<128x512xf32>
    %9 = arith.divf %7, %8 : vector<128x512xf32>
    %10 = arith.mulf %3, %9 : vector<128x512xf32>
    %11 = arith.mulf %4, %10 : vector<128x512xf32>
    %12 = arith.truncf %11 : vector<128x512xf32> to vector<128x512xbf16>
    %c0_4 = arith.constant 0 : index
    %c0_5 = arith.constant 0 : index
    %13 = vector.load %arg4[%c0_4, %c0_5] : memref<512x256xbf16, #tpu.memory_space<vmem>>, vector<512x256xbf16>
    %cst_6 = arith.constant dense<0.000000e+00> : vector<128x256xf32>
    %14 = tpu.matmul %12, %13, %cst_6 {dimension_numbers = #tpu.dot_dimension_numbers<[1], [0], [0], [1], [0, 0, 1, 1], [], []>} : vector<128x512xbf16>, vector<512x256xbf16>, vector<128x256xf32> -> vector<128x256xf32>
    %15 = arith.truncf %14 : vector<128x256xf32> to vector<128x256xbf16>
    %c0_7 = arith.constant 0 : index
    %c0_8 = arith.constant 0 : index
    %16 = vector.load %arg5[%c0_7, %c0_8] : memref<128x256xbf16, #tpu.memory_space<vmem>>, vector<128x256xbf16>
    tpu.vector_store %arg5[%c0_7, %c0_8], %15 {strides = array<i32>} : memref<128x256xbf16, #tpu.memory_space<vmem>>, vector<128x256xbf16>,
    return
  }
  func.func @transform_0(%arg0: i32, %arg1: i32) -> (i32, i32) {
    %c0_i32 = arith.constant 0 : i32
    %c0_i32_0 = arith.constant 0 : i32
    return %arg0, %c0_i32 : i32, i32
  }
  func.func @transform_1(%arg0: i32, %arg1: i32) -> (i32, i32) {
    %c0_i32 = arith.constant 0 : i32
    %c0_i32_0 = arith.constant 0 : i32
    return %c0_i32, %arg1 : i32, i32
  }
  func.func @transform_2(%arg0: i32, %arg1: i32) -> (i32, i32) {
    %c0_i32 = arith.constant 0 : i32
    %c0_i32_0 = arith.constant 0 : i32
    return %arg1, %c0_i32 : i32, i32
  }
  func.func @transform_3(%arg0: i32, %arg1: i32) -> (i32, i32) {
    %c0_i32 = arith.constant 0 : i32
    %c0_i32_0 = arith.constant 0 : i32
    return %arg0, %c0_i32 : i32, i32
  }
}

</mosaic_0001>

<bundles_post_ra>
// kernel: llama_mlp_forward.1
= control target key start
LH: loop header
LB: loop body
LE: loop exit
PB: predicated region body
PF: predicated region fallthrough
CT: control target
= control target key end

     0   :  { %8 = vsyncpa [#allocation3], 0  ;;  %s8449_s0 = inlined_call_operand.vmem [shape: bf16[128,256], index: 0, kind: input, shape index: {}]   ;;  %s8450_s1 = inlined_call_operand.hbm [shape: bf16[256,1024], index: 1, kind: input, shape index: {}]   ;;  %s8451_s2 = inlined_call_operand.hbm [shape: bf16[512,256], index: 2, kind: input, shape index: {}]   ;;  %s8452_s3 = inlined_call_operand.vmem [shape: bf16[128,256], index: 3, kind: output, shape index: {}]  }
   0x1   :  { %s16_s14 = sshll.u32 %s8450_s1, 4  ;;  %s17_s14 = int_to_ptr.hbm [resolvable:$true] %s16_s14 }
   0x2   :  { %9 = vsyncpa [#allocation5], 0  ;;  %s5302_s15 = smov [#allocation2]   ;;  %s29_s19 = sshll.u32 %s8451_s2, 4  ;;  %s30_s19 = int_to_ptr.hbm [resolvable:$true] %s29_s19 }
   0x3   :  { %s18_s16 = sshll.u32 %s5302_s15, 4  ;;  %s5303_s20 = smov 512   ;;  %s19_s16 = int_to_ptr.vmem [resolvable:$true] %s18_s16 }
   0x4   :  { %s5304_s21 = smov 32   ;;  %s5305_s22 = smov [#allocation4]  }
   0x5   :  { %24 = dma.hbm_to_vmem [thread:$0]  %s17_s14, 16384, %s19_s16, [#allocation3], %s5303_s20, %s5303_s20, %s5304_s21  }
   0x6   :  { %s31_s23 = sshll.u32 %s5305_s22, 4  ;;  %s5306_s24 = smov 128   ;;  %s32_s23 = int_to_ptr.vmem [resolvable:$true] %s31_s23 }
   0x7   :  { %s5307_s25 = smov 8  }
   0x8   :  { %37 = dma.hbm_to_vmem [thread:$0]  %s30_s19, 8192, %s32_s23, [#allocation5], %s5306_s24, %s5306_s24, %s5307_s25  }
   0x9   :  { %5298 = dma.done.wait [#allocation3], 16384  }
   0xa   :  { %5299 = vsyncadd [#allocation3], 4294950912 }
   0xb   :  { %5300 = dma.done.wait [#allocation5], 8192  }
   0xc   :  { %5301 = vsyncadd [#allocation5], 4294959104  ;;  %v4174_v0 = vld [vmem:[#allocation2 + $0x1c0] sm:$0xf]  ;;  %v4852_v5 = vld [vmem:[#allocation2 + $0x1c4] sm:$0xf] }
   0xd   :  { %v4856_v1 = vld [vmem:[#allocation2 + $0x1dc] sm:$0xf0]  ;;  %v4176_v6 = vld [vmem:[#allocation2 + $0x1e0] sm:$0xf0] }
   0xe   :  { %v4430_v2 = vld [vmem:[#allocation2 + $0x3c0] sm:$0xf]  ;;  %v4175_v3 = vor.u32 %v4856_v1, %v4174_v0  ;;  %v4179_v8 = vor.u32 %v4852_v5, %v4176_v6  ;;  %v4916_v9 = vld [vmem:[#allocation2 + $0x3c4] sm:$0xf] }
   0xf   :  { %v4920_v4 = vld [vmem:[#allocation2 + $0x3dc] sm:$0xf0]  ;;  %v4432_v10 = vld [vmem:[#allocation2 + $0x3e0] sm:$0xf0] }
  0x10   :  { %v4431_v7 = vor.u32 %v4920_v4, %v4430_v2  ;;  %v4142_v11 = vld [vmem:[#allocation2 + $0x180] sm:$0xf]  ;;  %910 = vmatpush.bf16.msra.mxu0 %v4175_v3  ;;  %v4435_v12 = vor.u32 %v4916_v9, %v4432_v10  ;;  %1008 = vmatpush.bf16.msra.mxu2 %v4179_v8  ;;  %v4844_v18 = vld [vmem:[#allocation2 + $0x184] sm:$0xf] }
  0x11   :  { %v4848_v13 = vld [vmem:[#allocation2 + $0x19c] sm:$0xf0]  ;;  %v4144_v19 = vld [vmem:[#allocation2 + $0x1a0] sm:$0xf0] }
  0x12   :  { %v4398_v14 = vld [vmem:[#allocation2 + $0x380] sm:$0xf]  ;;  %959 = vmatpush.bf16.msra.mxu1 %v4431_v7  ;;  %v4143_v16 = vor.u32 %v4848_v13, %v4142_v11  ;;  %v4908_v20 = vld [vmem:[#allocation2 + $0x384] sm:$0xf]  ;;  %1057 = vmatpush.bf16.msra.mxu3 %v4435_v12  ;;  %v4147_v21 = vor.u32 %v4844_v18, %v4144_v19 }
  0x13   :  { %v4912_v15 = vld [vmem:[#allocation2 + $0x39c] sm:$0xf0]  ;;  %v4400_v22 = vld [vmem:[#allocation2 + $0x3a0] sm:$0xf0] }
  0x14   :  { %v4399_v17 = vor.u32 %v4912_v15, %v4398_v14  ;;  %v4110_v23 = vld [vmem:[#allocation2 + $0x140] sm:$0xf]  ;;  %v4403_v25 = vor.u32 %v4908_v20, %v4400_v22  ;;  %v4836_v28 = vld [vmem:[#allocation2 + $0x144] sm:$0xf]  ;;  %911 = vmatpush.bf16.msra.mxu0 %v4143_v16  ;;  %1009 = vmatpush.bf16.msra.mxu2 %v4147_v21 }
  0x15   :  { %v4840_v24 = vld [vmem:[#allocation2 + $0x15c] sm:$0xf0]  ;;  %v4112_v30 = vld [vmem:[#allocation2 + $0x160] sm:$0xf0] }
  0x16   :  { %v4366_v26 = vld [vmem:[#allocation2 + $0x340] sm:$0xf]  ;;  %v4111_v29 = vor.u32 %v4840_v24, %v4110_v23  ;;  %v4900_v31 = vld [vmem:[#allocation2 + $0x344] sm:$0xf]  ;;  %960 = vmatpush.bf16.msra.mxu1 %v4399_v17  ;;  %v4115_v34 = vor.u32 %v4836_v28, %v4112_v30  ;;  %1058 = vmatpush.bf16.msra.mxu3 %v4403_v25  ;;  %v4184_v30 = vld [vmem:[#allocation2 + $0x1e8] sm:$0xf0] }
  0x17   :  { %v4904_v27 = vld [vmem:[#allocation2 + $0x35c] sm:$0xf0]  ;;  %v4368_v32 = vld [vmem:[#allocation2 + $0x360] sm:$0xf0] }
  0x18   :  { %v4367_v33 = vor.u32 %v4904_v27, %v4366_v26  ;;  %v4078_v35 = vld [vmem:[#allocation2 + $0x100] sm:$0xf]  ;;  %v4371_v38 = vor.u32 %v4900_v31, %v4368_v32  ;;  %v4828_v40 = vld [vmem:[#allocation2 + $0x104] sm:$0xf]  ;;  %912 = vmatpush.bf16.msra.mxu0 %v4111_v29  ;;  %1010 = vmatpush.bf16.msra.mxu2 %v4115_v34  ;;  %v4853_v29 = vld [vmem:[#allocation2 + $0x1cc] sm:$0xf] }
  0x19   :  { %v4832_v36 = vld [vmem:[#allocation2 + $0x11c] sm:$0xf0]  ;;  %v4080_v41 = vld [vmem:[#allocation2 + $0x120] sm:$0xf0]  ;;  %v4781_v32 = vld [vmem:[%s8449_s0 + $0x4] sm:$0xf0] }
  0x1a   :  { %v4334_v37 = vld [vmem:[#allocation2 + $0x300] sm:$0xf]  ;;  %v4892_v42 = vld [vmem:[#allocation2 + $0x304] sm:$0xf]  ;;  %v4079_v44 = vor.u32 %v4832_v36, %v4078_v35  ;;  %961 = vmatpush.bf16.msra.mxu1 %v4367_v33  ;;  %v4083_v46 = vor.u32 %v4828_v40, %v4080_v41  ;;  %1059 = vmatpush.bf16.msra.mxu3 %v4371_v38  ;;  %v4917_v33 = vld [vmem:[#allocation2 + $0x3cc] sm:$0xf]  ;;  %v4187_v40 = vor.u32 %v4853_v29, %v4184_v30 }
  0x1b   :  { %v4896_v39 = vld [vmem:[#allocation2 + $0x31c] sm:$0xf0]  ;;  %v4336_v43 = vld [vmem:[#allocation2 + $0x320] sm:$0xf0]  ;;  %v4440_v34 = vld [vmem:[#allocation2 + $0x3e8] sm:$0xf0] }
  0x1c   :  { %v4335_v45 = vor.u32 %v4896_v39, %v4334_v37  ;;  %v4046_v47 = vld [vmem:[#allocation2 + $0xc0] sm:$0xf]  ;;  %v4339_v50 = vor.u32 %v4892_v42, %v4336_v43  ;;  %v4820_v52 = vld [vmem:[#allocation2 + $0xc4] sm:$0xf]  ;;  %913 = vmatpush.bf16.msra.mxu0 %v4079_v44  ;;  %1011 = vmatpush.bf16.msra.mxu2 %v4083_v46  ;;  %v3888_v38 = vld [vmem:[%s8449_s0 + $0x8] sm:$0xf0] }
  0x1d   :  { %v4824_v48 = vld [vmem:[#allocation2 + $0xdc] sm:$0xf0]  ;;  %v4048_v53 = vld [vmem:[#allocation2 + $0xe0] sm:$0xf0]  ;;  %v4182_v41 = vld [vmem:[#allocation2 + $0x1c8] sm:$0xf] }
  0x1e   :  { %v4302_v49 = vld [vmem:[#allocation2 + $0x2c0] sm:$0xf]  ;;  %v4884_v54 = vld [vmem:[#allocation2 + $0x2c4] sm:$0xf]  ;;  %v4047_v56 = vor.u32 %v4824_v48, %v4046_v47  ;;  %962 = vmatpush.bf16.msra.mxu1 %v4335_v45  ;;  %v4051_v58 = vor.u32 %v4820_v52, %v4048_v53  ;;  %1060 = vmatpush.bf16.msra.mxu3 %v4339_v50  ;;  %v4857_v42 = vld [vmem:[#allocation2 + $0x1e4] sm:$0xf0]  ;;  %v4443_v45 = vor.u32 %v4917_v33, %v4440_v34 }
  0x1f   :  { %v4888_v51 = vld [vmem:[#allocation2 + $0x2dc] sm:$0xf0]  ;;  %v4304_v55 = vld [vmem:[#allocation2 + $0x2e0] sm:$0xf0]  ;;  %v4438_v43 = vld [vmem:[#allocation2 + $0x3c8] sm:$0xf]  ;;  %v4183_v52 = vor.u32 %v4857_v42, %v4182_v41 }
  0x20   :  { %v4303_v57 = vor.u32 %v4888_v51, %v4302_v49  ;;  %v4014_v59 = vld [vmem:[#allocation2 + $0x80] sm:$0xf]  ;;  %v4307_v62 = vor.u32 %v4884_v54, %v4304_v55  ;;  %v4812_v0 = vld [vmem:[#allocation2 + $0x84] sm:$0xf]  ;;  %914 = vmatpush.bf16.msra.mxu0 %v4047_v56  ;;  %1012 = vmatpush.bf16.msra.mxu2 %v4051_v58  ;;  %v4921_v46 = vld [vmem:[#allocation2 + $0x3e4] sm:$0xf0] }
  0x21   :  { %v4816_v60 = vld [vmem:[#allocation2 + $0x9c] sm:$0xf0]  ;;  %v4016_v1 = vld [vmem:[#allocation2 + $0xa0] sm:$0xf0]  ;;  %v4845_v47 = vld [vmem:[#allocation2 + $0x18c] sm:$0xf]  ;;  %v4439_v53 = vor.u32 %v4921_v46, %v4438_v43 }
  0x22   :  { %v4270_v61 = vld [vmem:[#allocation2 + $0x280] sm:$0xf]  ;;  %v4876_v2 = vld [vmem:[#allocation2 + $0x284] sm:$0xf]  ;;  %v4015_v4 = vor.u32 %v4816_v60, %v4014_v59  ;;  %963 = vmatpush.bf16.msra.mxu1 %v4303_v57  ;;  %v4019_v6 = vor.u32 %v4812_v0, %v4016_v1  ;;  %1061 = vmatpush.bf16.msra.mxu3 %v4307_v62  ;;  %v4152_v48 = vld [vmem:[#allocation2 + $0x1a8] sm:$0xf0] }
  0x23   :  { %v4880_v63 = vld [vmem:[#allocation2 + $0x29c] sm:$0xf0]  ;;  %v4272_v3 = vld [vmem:[#allocation2 + $0x2a0] sm:$0xf0]  ;;  %v4909_v50 = vld [vmem:[#allocation2 + $0x38c] sm:$0xf]  ;;  %v4155_v54 = vor.u32 %v4845_v47, %v4152_v48 }
  0x24   :  { %v4271_v5 = vor.u32 %v4880_v63, %v4270_v61  ;;  %v3982_v7 = vld [vmem:[#allocation2 + $0x40] sm:$0xf]  ;;  %v4275_v10 = vor.u32 %v4876_v2, %v4272_v3  ;;  %v4804_v12 = vld [vmem:[#allocation2 + $0x44] sm:$0xf]  ;;  %915 = vmatpush.bf16.msra.mxu0 %v4015_v4  ;;  %1013 = vmatpush.bf16.msra.mxu2 %v4019_v6  ;;  %v4408_v51 = vld [vmem:[#allocation2 + $0x3a8] sm:$0xf0] }
  0x25   :  { %v4808_v8 = vld [vmem:[#allocation2 + $0x5c] sm:$0xf0]  ;;  %v3984_v13 = vld [vmem:[#allocation2 + $0x60] sm:$0xf0]  ;;  %v4150_v55 = vld [vmem:[#allocation2 + $0x188] sm:$0xf]  ;;  %v4411_v57 = vor.u32 %v4909_v50, %v4408_v51 }
  0x26   :  { %v4238_v9 = vld [vmem:[#allocation2 + $0x240] sm:$0xf]  ;;  %v4868_v14 = vld [vmem:[#allocation2 + $0x244] sm:$0xf]  ;;  %v3983_v16 = vor.u32 %v4808_v8, %v3982_v7  ;;  %964 = vmatpush.bf16.msra.mxu1 %v4271_v5  ;;  %v3987_v20 = vor.u32 %v4804_v12, %v3984_v13  ;;  %1062 = vmatpush.bf16.msra.mxu3 %v4275_v10  ;;  %v4849_v56 = vld [vmem:[#allocation2 + $0x1a4] sm:$0xf0] }
  0x27   :  { %v4872_v11 = vld [vmem:[#allocation2 + $0x25c] sm:$0xf0]  ;;  %v4240_v15 = vld [vmem:[#allocation2 + $0x260] sm:$0xf0]  ;;  %v4406_v58 = vld [vmem:[#allocation2 + $0x388] sm:$0xf]  ;;  %v4151_v60 = vor.u32 %v4849_v56, %v4150_v55 }
  0x28   :  { %v3950_v17 = vld [vmem:[#allocation2] sm:$0xf]  ;;  %v4239_v19 = vor.u32 %v4872_v11, %v4238_v9  ;;  %v4796_v23 = vld [vmem:[#allocation2 + $0x4] sm:$0xf]  ;;  %v4243_v24 = vor.u32 %v4868_v14, %v4240_v15  ;;  %916 = vmatpush.bf16.msra.mxu0 %v3983_v16  ;;  %1014 = vmatpush.bf16.msra.mxu2 %v3987_v20  ;;  %v4913_v59 = vld [vmem:[#allocation2 + $0x3a4] sm:$0xf0] }
  0x29   :  { %v4800_v18 = vld [vmem:[#allocation2 + $0x1c] sm:$0xf0]  ;;  %v3952_v25 = vld [vmem:[#allocation2 + $0x20] sm:$0xf0]  ;;  %v4837_v61 = vld [vmem:[#allocation2 + $0x14c] sm:$0xf]  ;;  %v4407_v0 = vor.u32 %v4913_v59, %v4406_v58 }
  0x2a   :  { %v4206_v21 = vld [vmem:[#allocation2 + $0x200] sm:$0xf]  ;;  %v4860_v26 = vld [vmem:[#allocation2 + $0x204] sm:$0xf]  ;;  %v3951_v31 = vor.u32 %v4800_v18, %v3950_v17  ;;  %965 = vmatpush.bf16.msra.mxu1 %v4239_v19  ;;  %v3955_v36 = vor.u32 %v4796_v23, %v3952_v25  ;;  %1063 = vmatpush.bf16.msra.mxu3 %v4243_v24  ;;  %v4120_v62 = vld [vmem:[#allocation2 + $0x168] sm:$0xf0] }
  0x2b   :  { %v4864_v22 = vld [vmem:[#allocation2 + $0x21c] sm:$0xf0]  ;;  %v4208_v27 = vld [vmem:[#allocation2 + $0x220] sm:$0xf0]  ;;  %v4901_v63 = vld [vmem:[#allocation2 + $0x34c] sm:$0xf]  ;;  %v4123_v1 = vor.u32 %v4837_v61, %v4120_v62 }
  0x2c   :  { %v3886_v28 = vld [vmem:[%s8449_s0] sm:$0xf]  ;;  %v4207_v35 = vor.u32 %v4864_v22, %v4206_v21  ;;  %v4780_v37 = vld [vmem:[%s8449_s0 + $0x4] sm:$0xf]  ;;  %v4211_v39 = vor.u32 %v4860_v26, %v4208_v27  ;;  %917 = vmatpush.bf16.msra.mxu0 %v3951_v31  ;;  %1015 = vmatpush.bf16.msra.mxu2 %v3955_v36  ;;  %v4376_v2 = vld [vmem:[#allocation2 + $0x368] sm:$0xf0] }
  0x2d   :  { %v5346_v44 = vor.u32 %v4781_v32, %v3886_v28  ;;  %v5348_v49 = vor.u32 %v4780_v37, %v3888_v38  ;;  %v4118_v3 = vld [vmem:[#allocation2 + $0x148] sm:$0xf]  ;;  %v4379_v5 = vor.u32 %v4901_v63, %v4376_v2  ;;  %v3894_v10 = vld [vmem:[%s8449_s0 + $0x10] sm:$0xf]  ;;  %v4783_v11 = vld [vmem:[%s8449_s0 + $0x14] sm:$0xf0] }
  0x2e   :  { %966 = vmatpush.bf16.msra.mxu1 %v4207_v35  ;;  %1064 = vmatpush.bf16.msra.mxu3 %v4211_v39  ;;  %v4841_v4 = vld [vmem:[#allocation2 + $0x164] sm:$0xf0]  ;;  %v4782_v12 = vld [vmem:[%s8449_s0 + $0x14] sm:$0xf]  ;;  %v3896_v13 = vld [vmem:[%s8449_s0 + $0x18] sm:$0xf0]  ;;  %v5366_v14 = vor.u32 %v4783_v11, %v3894_v10 }
  0x2f   :  { %918 = vmatmul.bf16.vlgmr.msra.gmra.mxu0 %v5346_v44  ;;  %1016 = vmatmul.bf16.vlgmr.msra.gmra.mxu2 %v5346_v44  ;;  %v4374_v6 = vld [vmem:[#allocation2 + $0x348] sm:$0xf]  ;;  %v4119_v8 = vor.u32 %v4841_v4, %v4118_v3  ;;  %v5368_v15 = vor.u32 %v4782_v12, %v3896_v13  ;;  %v4829_v16 = vld [vmem:[#allocation2 + $0x10c] sm:$0xf]  ;;  %v3902_v28 = vld [vmem:[%s8449_s0 + $0x20] sm:$0xf] }
  0x30   :  { %1204 = vmatpush.bf16.msrb.mxu2 %v4187_v40  ;;  %1106 = vmatpush.bf16.msrb.mxu0 %v4183_v52  ;;  %v4905_v7 = vld [vmem:[#allocation2 + $0x364] sm:$0xf0]  ;;  %8542 = vst [vmem:[#allocation8_spill] sm:$0xff] %v5366_v14  ;;  %v4088_v17 = vld [vmem:[#allocation2 + $0x128] sm:$0xf0] }
  0x31   :  { %967 = vmatmul.bf16.vlgmr.msra.gmra.mxu1 %v5348_v49  ;;  %1065 = vmatmul.bf16.vlgmr.msra.gmra.mxu3 %v5348_v49  ;;  %v4375_v9 = vor.u32 %v4905_v7, %v4374_v6  ;;  %8543 = vst [vmem:[#allocation9_spill] sm:$0xff] %v5368_v15  ;;  %v4893_v18 = vld [vmem:[#allocation2 + $0x30c] sm:$0xf]  ;;  %v4091_v19 = vor.u32 %v4829_v16, %v4088_v17  ;;  %v4086_v21 = vld [vmem:[#allocation2 + $0x108] sm:$0xf] }
  0x32   :  { %1253 = vmatpush.bf16.msrb.mxu3 %v4443_v45  ;;  %1155 = vmatpush.bf16.msrb.mxu1 %v4439_v53  ;;  %v4344_v20 = vld [vmem:[#allocation2 + $0x328] sm:$0xf0]  ;;  %v4833_v22 = vld [vmem:[#allocation2 + $0x124] sm:$0xf0]  ;;  %v4784_v30 = vld [vmem:[%s8449_s0 + $0x24] sm:$0xf] }
  0x33   :  { %v4347_v23 = vor.u32 %v4893_v18, %v4344_v20  ;;  %v4087_v24 = vor.u32 %v4833_v22, %v4086_v21  ;;  %v4342_v25 = vld [vmem:[#allocation2 + $0x308] sm:$0xf]  ;;  %v3904_v31 = vld [vmem:[%s8449_s0 + $0x28] sm:$0xf0]  ;;  %v3910_v47 = vld [vmem:[%s8449_s0 + $0x30] sm:$0xf] }
  0x34   :  { %1205 = vmatpush.bf16.msrb.mxu2 %v4155_v54  ;;  %1107 = vmatpush.bf16.msrb.mxu0 %v4151_v60  ;;  %v4897_v26 = vld [vmem:[#allocation2 + $0x324] sm:$0xf0]  ;;  %v5388_v33 = vor.u32 %v4784_v30, %v3904_v31  ;;  %v4821_v34 = vld [vmem:[#allocation2 + $0xcc] sm:$0xf]  ;;  %v4787_v48 = vld [vmem:[%s8449_s0 + $0x34] sm:$0xf0] }
  0x35   :  { %v4343_v27 = vor.u32 %v4897_v26, %v4342_v25  ;;  %v4785_v29 = vld [vmem:[%s8449_s0 + $0x24] sm:$0xf0]  ;;  %v4056_v35 = vld [vmem:[#allocation2 + $0xe8] sm:$0xf0]  ;;  %v4786_v50 = vld [vmem:[%s8449_s0 + $0x34] sm:$0xf]  ;;  %v5406_v52 = vor.u32 %v4787_v48, %v3910_v47 }
  0x36   :  { %1254 = vmatpush.bf16.msrb.mxu3 %v4411_v57  ;;  %1156 = vmatpush.bf16.msrb.mxu1 %v4407_v0  ;;  %v5386_v32 = vor.u32 %v4785_v29, %v3902_v28  ;;  %8545 = vst [vmem:[#allocation11_spill] sm:$0xff] %v5388_v33  ;;  %v4885_v36 = vld [vmem:[#allocation2 + $0x2cc] sm:$0xf]  ;;  %v4059_v37 = vor.u32 %v4821_v34, %v4056_v35  ;;  %v4054_v39 = vld [vmem:[#allocation2 + $0xc8] sm:$0xf] }
  0x37   :  { %v4312_v38 = vld [vmem:[#allocation2 + $0x2e8] sm:$0xf0]  ;;  %v4825_v40 = vld [vmem:[#allocation2 + $0xe4] sm:$0xf0]  ;;  %v3912_v51 = vld [vmem:[%s8449_s0 + $0x38] sm:$0xf0] }
  0x38   :  { %1206 = vmatpush.bf16.msrb.mxu2 %v4123_v1  ;;  %1108 = vmatpush.bf16.msrb.mxu0 %v4119_v8  ;;  %8544 = vst [vmem:[#allocation10_spill] sm:$0xff] %v5386_v32  ;;  %v4315_v41 = vor.u32 %v4885_v36, %v4312_v38  ;;  %v4055_v42 = vor.u32 %v4825_v40, %v4054_v39  ;;  %v4310_v43 = vld [vmem:[#allocation2 + $0x2c8] sm:$0xf]  ;;  %v4813_v54 = vld [vmem:[#allocation2 + $0x8c] sm:$0xf] }
  0x39   :  { %v4889_v45 = vld [vmem:[#allocation2 + $0x2e4] sm:$0xf0]  ;;  %8546 = vst [vmem:[#allocation12_spill] sm:$0xff] %v5406_v52  ;;  %v5408_v53 = vor.u32 %v4786_v50, %v3912_v51  ;;  %v4024_v55 = vld [vmem:[#allocation2 + $0xa8] sm:$0xf0] }
  0x3a   :  { %1255 = vmatpush.bf16.msrb.mxu3 %v4379_v5  ;;  %1157 = vmatpush.bf16.msrb.mxu1 %v4375_v9  ;;  %v4311_v46 = vor.u32 %v4889_v45, %v4310_v43  ;;  %v4877_v56 = vld [vmem:[#allocation2 + $0x28c] sm:$0xf]  ;;  %v4027_v57 = vor.u32 %v4813_v54, %v4024_v55  ;;  %v4022_v59 = vld [vmem:[#allocation2 + $0x88] sm:$0xf]  ;;  %v3918_v2 = vld [vmem:[%s8449_s0 + $0x40] sm:$0xf] }
  0x3b   :  { %8547 = vst [vmem:[#allocation13_spill] sm:$0xff] %v5408_v53  ;;  %v4280_v58 = vld [vmem:[#allocation2 + $0x2a8] sm:$0xf0]  ;;  %v4817_v60 = vld [vmem:[#allocation2 + $0xa4] sm:$0xf0] }
  0x3c   :  { %1207 = vmatpush.bf16.msrb.mxu2 %v4091_v19  ;;  %1109 = vmatpush.bf16.msrb.mxu0 %v4087_v24  ;;  %v4283_v61 = vor.u32 %v4877_v56, %v4280_v58  ;;  %v4023_v62 = vor.u32 %v4817_v60, %v4022_v59  ;;  %v4278_v63 = vld [vmem:[#allocation2 + $0x288] sm:$0xf]  ;;  %v4788_v4 = vld [vmem:[%s8449_s0 + $0x44] sm:$0xf]  ;;  %v3920_v5 = vld [vmem:[%s8449_s0 + $0x48] sm:$0xf0] }
  0x3d   :  { %v4881_v0 = vld [vmem:[#allocation2 + $0x2a4] sm:$0xf0]  ;;  %v5428_v7 = vor.u32 %v4788_v4, %v3920_v5  ;;  %v4805_v8 = vld [vmem:[#allocation2 + $0x4c] sm:$0xf]  ;;  %v3926_v22 = vld [vmem:[%s8449_s0 + $0x50] sm:$0xf] }
  0x3e   :  { %1256 = vmatpush.bf16.msrb.mxu3 %v4347_v23  ;;  %1158 = vmatpush.bf16.msrb.mxu1 %v4343_v27  ;;  %v4279_v1 = vor.u32 %v4881_v0, %v4278_v63  ;;  %v4789_v3 = vld [vmem:[%s8449_s0 + $0x44] sm:$0xf0]  ;;  %v3992_v9 = vld [vmem:[#allocation2 + $0x68] sm:$0xf0]  ;;  %v4791_v23 = vld [vmem:[%s8449_s0 + $0x54] sm:$0xf0] }
  0x3f   :  { %923 = vmatmul.bf16.gmra.mxu0 %v5366_v14  ;;  %1021 = vmatmul.bf16.gmra.mxu2 %v5366_v14  ;;  %v5426_v6 = vor.u32 %v4789_v3, %v3918_v2  ;;  %8549 = vst [vmem:[#allocation15_spill] sm:$0xff] %v5428_v7  ;;  %v4869_v10 = vld [vmem:[#allocation2 + $0x24c] sm:$0xf]  ;;  %v3995_v11 = vor.u32 %v4805_v8, %v3992_v9  ;;  %v3990_v13 = vld [vmem:[#allocation2 + $0x48] sm:$0xf] }
  0x40   :  { %1208 = vmatpush.bf16.msrb.mxu2 %v4059_v37  ;;  %1110 = vmatpush.bf16.msrb.mxu0 %v4055_v42  ;;  %v4248_v12 = vld [vmem:[#allocation2 + $0x268] sm:$0xf0]  ;;  %v4809_v16 = vld [vmem:[#allocation2 + $0x64] sm:$0xf0]  ;;  %v4790_v24 = vld [vmem:[%s8449_s0 + $0x54] sm:$0xf]  ;;  %v5446_v26 = vor.u32 %v4791_v23, %v3926_v22 }
  0x41   :  { %972 = vmatmul.bf16.gmra.mxu1 %v5368_v15  ;;  %1070 = vmatmul.bf16.gmra.mxu3 %v5368_v15  ;;  %8548 = vst [vmem:[#allocation14_spill] sm:$0xff] %v5426_v6  ;;  %v4251_v17 = vor.u32 %v4869_v10, %v4248_v12  ;;  %v3991_v18 = vor.u32 %v4809_v16, %v3990_v13  ;;  %v4246_v19 = vld [vmem:[#allocation2 + $0x248] sm:$0xf]  ;;  %v3928_v25 = vld [vmem:[%s8449_s0 + $0x58] sm:$0xf0] }
  0x42   :  { %1257 = vmatpush.bf16.msrb.mxu3 %v4315_v41  ;;  %1159 = vmatpush.bf16.msrb.mxu1 %v4311_v46  ;;  %v4873_v20 = vld [vmem:[#allocation2 + $0x264] sm:$0xf0]  ;;  %8550 = vst [vmem:[#allocation16_spill] sm:$0xff] %v5446_v26  ;;  %v5448_v27 = vor.u32 %v4790_v24, %v3928_v25  ;;  %v4797_v28 = vld [vmem:[#allocation2 + $0xc] sm:$0xf] }
  0x43   :  { %v4247_v21 = vor.u32 %v4873_v20, %v4246_v19  ;;  %v3960_v29 = vld [vmem:[#allocation2 + $0x28] sm:$0xf0]  ;;  %v3958_v35 = vld [vmem:[#allocation2 + $0x8] sm:$0xf]  ;;  %v3934_v42 = vld [vmem:[%s8449_s0 + $0x60] sm:$0xf] }
  0x44   :  { %1209 = vmatpush.bf16.msrb.mxu2 %v4027_v57  ;;  %1111 = vmatpush.bf16.msrb.mxu0 %v4023_v62  ;;  %8551 = vst [vmem:[#allocation17_spill] sm:$0xff] %v5448_v27  ;;  %v4861_v30 = vld [vmem:[#allocation2 + $0x20c] sm:$0xf]  ;;  %v3963_v31 = vor.u32 %v4797_v28, %v3960_v29  ;;  %v4801_v36 = vld [vmem:[#allocation2 + $0x24] sm:$0xf0] }
  0x45   :  { %v4216_v34 = vld [vmem:[#allocation2 + $0x228] sm:$0xf0]  ;;  %v3959_v38 = vor.u32 %v4801_v36, %v3958_v35  ;;  %v4214_v39 = vld [vmem:[#allocation2 + $0x208] sm:$0xf]  ;;  %v4792_v45 = vld [vmem:[%s8449_s0 + $0x64] sm:$0xf] }
  0x46   :  { %1258 = vmatpush.bf16.msrb.mxu3 %v4283_v61  ;;  %1160 = vmatpush.bf16.msrb.mxu1 %v4279_v1  ;;  %v4219_v37 = vor.u32 %v4861_v30, %v4216_v34  ;;  %v4865_v40 = vld [vmem:[#allocation2 + $0x224] sm:$0xf0]  ;;  %v3936_v46 = vld [vmem:[%s8449_s0 + $0x68] sm:$0xf0]  ;;  %v3942_v50 = vld [vmem:[%s8449_s0 + $0x70] sm:$0xf] }
  0x47   :  { %v4215_v41 = vor.u32 %v4865_v40, %v4214_v39  ;;  %v4793_v43 = vld [vmem:[%s8449_s0 + $0x64] sm:$0xf0]  ;;  %v5468_v48 = vor.u32 %v4792_v45, %v3936_v46  ;;  %v4795_v51 = vld [vmem:[%s8449_s0 + $0x74] sm:$0xf0]  ;;  %v4794_v54 = vld [vmem:[%s8449_s0 + $0x74] sm:$0xf] }
  0x48   :  { %1210 = vmatpush.bf16.msrb.mxu2 %v3995_v11  ;;  %1112 = vmatpush.bf16.msrb.mxu0 %v3991_v18  ;;  %v5466_v47 = vor.u32 %v4793_v43, %v3934_v42  ;;  %v3944_v55 = vld [vmem:[%s8449_s0 + $0x78] sm:$0xf0]  ;;  %v5486_v56 = vor.u32 %v4795_v51, %v3942_v50  ;;  %v4854_v59 = vld [vmem:[#allocation2 + $0x1d4] sm:$0xf]  ;;  %v4190_v4 = vld [vmem:[#allocation2 + $0x1d0] sm:$0xf] }
  0x49   :  { %8553 = vst [vmem:[#allocation19_spill] sm:$0xff] %v5468_v48  ;;  %v5488_v57 = vor.u32 %v4794_v54, %v3944_v55  ;;  %v4192_v60 = vld [vmem:[#allocation2 + $0x1f0] sm:$0xf0]  ;;  %v4858_v5 = vld [vmem:[#allocation2 + $0x1ec] sm:$0xf0] }
  0x4a   :  { %1259 = vmatpush.bf16.msrb.mxu3 %v4251_v17  ;;  %1161 = vmatpush.bf16.msrb.mxu1 %v4247_v21  ;;  %8552 = vst [vmem:[#allocation18_spill] sm:$0xff] %v5466_v47  ;;  %v4918_v61 = vld [vmem:[#allocation2 + $0x3d4] sm:$0xf]  ;;  %v4195_v63 = vor.u32 %v4854_v59, %v4192_v60  ;;  %v4446_v8 = vld [vmem:[#allocation2 + $0x3d0] sm:$0xf]  ;;  %v4191_v10 = vor.u32 %v4858_v5, %v4190_v4 }
  0x4b   :  { %8554 = vst [vmem:[#allocation20_spill] sm:$0xff] %v5486_v56  ;;  %v4448_v0 = vld [vmem:[#allocation2 + $0x3f0] sm:$0xf0]  ;;  %v4922_v11 = vld [vmem:[#allocation2 + $0x3ec] sm:$0xf0] }
  0x4c   :  { %1211 = vmatpush.bf16.msrb.mxu2 %v3963_v31  ;;  %1113 = vmatpush.bf16.msrb.mxu0 %v3959_v38  ;;  %8555 = vst [vmem:[#allocation21_spill] sm:$0xff] %v5488_v57  ;;  %v4451_v2 = vor.u32 %v4918_v61, %v4448_v0  ;;  %v4447_v16 = vor.u32 %v4922_v11, %v4446_v8  ;;  %v4846_v25 = vld [vmem:[#allocation2 + $0x194] sm:$0xf]  ;;  %v4158_v35 = vld [vmem:[#allocation2 + $0x190] sm:$0xf] }
  0x4d   :  { %v4160_v28 = vld [vmem:[#allocation2 + $0x1b0] sm:$0xf0]  ;;  %v4914_v42 = vld [vmem:[#allocation2 + $0x3ac] sm:$0xf0] }
  0x4e   :  { %1260 = vmatpush.bf16.msrb.mxu3 %v4219_v37  ;;  %1162 = vmatpush.bf16.msrb.mxu1 %v4215_v41  ;;  %v4163_v29 = vor.u32 %v4846_v25, %v4160_v28  ;;  %v4910_v30 = vld [vmem:[#allocation2 + $0x394] sm:$0xf]  ;;  %v4850_v37 = vld [vmem:[#allocation2 + $0x1ac] sm:$0xf0] }
  0x4f   :  { %928 = vmatmul.bf16.gmra.mxu0 %v5386_v32  ;;  %1026 = vmatmul.bf16.gmra.mxu2 %v5386_v32  ;;  %v4416_v31 = vld [vmem:[#allocation2 + $0x3b0] sm:$0xf0]  ;;  %v4414_v41 = vld [vmem:[#allocation2 + $0x390] sm:$0xf]  ;;  %v4159_v45 = vor.u32 %v4850_v37, %v4158_v35 }
  0x50   :  { %1400 = vmatpush.bf16.msra.mxu2 %v4195_v63  ;;  %1302 = vmatpush.bf16.msra.mxu0 %v4191_v10  ;;  %v4419_v39 = vor.u32 %v4910_v30, %v4416_v31  ;;  %v4415_v46 = vor.u32 %v4914_v42, %v4414_v41  ;;  %v4384_v4 = vld [vmem:[#allocation2 + $0x370] sm:$0xf0]  ;;  %v4126_v11 = vld [vmem:[#allocation2 + $0x150] sm:$0xf] }
  0x51   :  { %977 = vmatmul.bf16.gmra.mxu1 %v5388_v33  ;;  %1075 = vmatmul.bf16.gmra.mxu3 %v5388_v33  ;;  %v4906_v25 = vld [vmem:[#allocation2 + $0x36c] sm:$0xf0]  ;;  %v4096_v35 = vld [vmem:[#allocation2 + $0x130] sm:$0xf0] }
  0x52   :  { %1449 = vmatpush.bf16.msra.mxu3 %v4451_v2  ;;  %1351 = vmatpush.bf16.msra.mxu1 %v4447_v16  ;;  %v4128_v2 = vld [vmem:[#allocation2 + $0x170] sm:$0xf0] }
  0x53   :  { %v4894_v41 = vld [vmem:[#allocation2 + $0x314] sm:$0xf] }
  0x54   :  { %1401 = vmatpush.bf16.msra.mxu2 %v4163_v29  ;;  %1303 = vmatpush.bf16.msra.mxu0 %v4159_v45  ;;  %v4352_v42 = vld [vmem:[#allocation2 + $0x330] sm:$0xf0] }
  0x55   :  { %v4355_v45 = vor.u32 %v4894_v41, %v4352_v42 }
  0x56   :  { %1450 = vmatpush.bf16.msra.mxu3 %v4419_v39  ;;  %1352 = vmatpush.bf16.msra.mxu1 %v4415_v46 }
  0x5f   :  { %933 = vmatmul.bf16.gmra.mxu0 %v5406_v52  ;;  %1031 = vmatmul.bf16.gmra.mxu2 %v5406_v52 }
  0x61   :  { %982 = vmatmul.bf16.gmra.mxu1 %v5408_v53  ;;  %1080 = vmatmul.bf16.gmra.mxu3 %v5408_v53 }
  0x6f   :  { %938 = vmatmul.bf16.gmra.mxu0 %v5426_v6  ;;  %1036 = vmatmul.bf16.gmra.mxu2 %v5426_v6 }
  0x71   :  { %987 = vmatmul.bf16.gmra.mxu1 %v5428_v7  ;;  %1085 = vmatmul.bf16.gmra.mxu3 %v5428_v7 }
  0x7f   :  { %943 = vmatmul.bf16.gmra.mxu0 %v5446_v26  ;;  %1041 = vmatmul.bf16.gmra.mxu2 %v5446_v26 }
  0x81   :  { %992 = vmatmul.bf16.gmra.mxu1 %v5448_v27  ;;  %1090 = vmatmul.bf16.gmra.mxu3 %v5448_v27 }
  0x8f   :  { %948 = vmatmul.bf16.gmra.mxu0 %v5466_v47  ;;  %1046 = vmatmul.bf16.gmra.mxu2 %v5466_v47 }
  0x91   :  { %997 = vmatmul.bf16.gmra.mxu1 %v5468_v48  ;;  %1095 = vmatmul.bf16.gmra.mxu3 %v5468_v48 }
  0x9f   :  { %953 = vmatmul.bf16.gmra.mxu0 %v5486_v56  ;;  %1051 = vmatmul.bf16.gmra.mxu2 %v5486_v56 }
  0xa1   :  { %1002 = vmatmul.bf16.gmra.mxu1 %v5488_v57  ;;  %1100 = vmatmul.bf16.gmra.mxu3 %v5488_v57 }
  0xac   :  { %v919_v58 = vpop.f32.mrf.mxu0 }
  0xae   :  { %v968_v62 = vpop.f32.mrf.mxu1 }
  0xaf   :  { %v5494_v1 = vadd.f32 %v968_v62, %v919_v58  ;;  %1114 = vmatmul.bf16.vlgmr.msrb.gmra.mxu0 %v5346_v44  ;;  %1212 = vmatmul.bf16.vlgmr.msrb.gmra.mxu2 %v5346_v44  ;;  %v4838_v62 = vld [vmem:[#allocation2 + $0x154] sm:$0xf] }
  0xb0   :  { %v4131_v8 = vor.u32 %v4838_v62, %v4128_v2  ;;  %v4350_v2 = vld [vmem:[#allocation2 + $0x310] sm:$0xf] }
  0xb1   :  { %1163 = vmatmul.bf16.vlgmr.msrb.gmra.mxu1 %v5348_v49  ;;  %1261 = vmatmul.bf16.vlgmr.msrb.gmra.mxu3 %v5348_v49 }
  0xb2   :  { %v1017_v3 = vpop.f32.mrf.mxu2  ;;  %1402 = vmatpush.bf16.msra.mxu2 %v4131_v8 }
  0xb4   :  { %v1066_v9 = vpop.f32.mrf.mxu3  ;;  %v921_v12 = vpop.f32.mrf.mxu0 }
  0xb5   :  { %v5500_v13 = vadd.f32 %v1066_v9, %v1017_v3  ;;  %v4902_v3 = vld [vmem:[#allocation2 + $0x354] sm:$0xf] }
  0xb6   :  { %v970_v17 = vpop.f32.mrf.mxu1  ;;  %v4387_v9 = vor.u32 %v4902_v3, %v4384_v4  ;;  %v4898_v3 = vld [vmem:[#allocation2 + $0x32c] sm:$0xf0] }
  0xb7   :  { %v5502_v18 = vadd.f32 %v970_v17, %v921_v12  ;;  %v4842_v12 = vld [vmem:[#allocation2 + $0x16c] sm:$0xf0] }
  0xb8   :  { %1451 = vmatpush.bf16.msra.mxu3 %v4387_v9  ;;  %v4127_v17 = vor.u32 %v4842_v12, %v4126_v11  ;;  %v4351_v9 = vor.u32 %v4898_v3, %v4350_v2  ;;  %v4822_v12 = vld [vmem:[#allocation2 + $0xd4] sm:$0xf] }
  0xb9   :  { %v4814_v2 = vld [vmem:[#allocation2 + $0x94] sm:$0xf] }
  0xba   :  { %v1019_v19 = vpop.f32.mrf.mxu2  ;;  %1304 = vmatpush.bf16.msra.mxu0 %v4127_v17 }
  0xbc   :  { %v1068_v20 = vpop.f32.mrf.mxu3  ;;  %v924_v21 = vpop.f32.mrf.mxu0  ;;  %1452 = vmatpush.bf16.msra.mxu3 %v4355_v45 }
  0xbd   :  { %v5504_v22 = vadd.f32 %v1068_v20, %v1019_v19 }
  0xbe   :  { %v973_v23 = vpop.f32.mrf.mxu1 }
  0xbf   :  { %v5506_v24 = vadd.f32 %v973_v23, %v924_v21  ;;  %1119 = vmatmul.bf16.gmra.mxu0 %v5366_v14  ;;  %1217 = vmatmul.bf16.gmra.mxu2 %v5366_v14  ;;  %v4382_v23 = vld [vmem:[#allocation2 + $0x350] sm:$0xf] }
  0xc0   :  { %v4383_v29 = vor.u32 %v4906_v25, %v4382_v23  ;;  %v4320_v23 = vld [vmem:[#allocation2 + $0x2f0] sm:$0xf0] }
  0xc1   :  { %1168 = vmatmul.bf16.gmra.mxu1 %v5368_v15  ;;  %1266 = vmatmul.bf16.gmra.mxu3 %v5368_v15 }
  0xc2   :  { %v1022_v34 = vpop.f32.mrf.mxu2  ;;  %1353 = vmatpush.bf16.msra.mxu1 %v4383_v29 }
  0xc4   :  { %v1071_v36 = vpop.f32.mrf.mxu3  ;;  %v926_v38 = vpop.f32.mrf.mxu0 }
  0xc5   :  { %v5512_v40 = vadd.f32 %v1071_v36, %v1022_v34  ;;  %v4830_v34 = vld [vmem:[#allocation2 + $0x114] sm:$0xf] }
  0xc6   :  { %v975_v43 = vpop.f32.mrf.mxu1  ;;  %v4099_v37 = vor.u32 %v4830_v34, %v4096_v35  ;;  %1354 = vmatpush.bf16.msra.mxu1 %v4351_v9 }
  0xc7   :  { %v5514_v50 = vadd.f32 %v975_v43, %v926_v38 }
  0xc8   :  { %1403 = vmatpush.bf16.msra.mxu2 %v4099_v37  ;;  %v4062_v37 = vld [vmem:[#allocation2 + $0xd0] sm:$0xf] }
  0xca   :  { %v1024_v51 = vpop.f32.mrf.mxu2 }
  0xcc   :  { %v1073_v54 = vpop.f32.mrf.mxu3  ;;  %v929_v55 = vpop.f32.mrf.mxu0 }
  0xcd   :  { %v5516_v58 = vadd.f32 %v1073_v54, %v1024_v51  ;;  %v4094_v51 = vld [vmem:[#allocation2 + $0x110] sm:$0xf] }
  0xce   :  { %v978_v59 = vpop.f32.mrf.mxu1  ;;  %v4834_v54 = vld [vmem:[#allocation2 + $0x12c] sm:$0xf0] }
  0xcf   :  { %1124 = vmatmul.bf16.gmra.mxu0 %v5386_v32  ;;  %v5519_v60 = vadd.f32 %v978_v59, %v929_v55  ;;  %1222 = vmatmul.bf16.gmra.mxu2 %v5386_v32  ;;  %v4095_v59 = vor.u32 %v4834_v54, %v4094_v51 }
  0xd1   :  { %1173 = vmatmul.bf16.gmra.mxu1 %v5388_v33  ;;  %1271 = vmatmul.bf16.gmra.mxu3 %v5388_v33 }
  0xd2   :  { %v1027_v61 = vpop.f32.mrf.mxu2  ;;  %1305 = vmatpush.bf16.msra.mxu0 %v4095_v59 }
  0xd4   :  { %v1076_v63 = vpop.f32.mrf.mxu3  ;;  %v931_v0 = vpop.f32.mrf.mxu0 }
  0xd5   :  { %v5524_v10 = vadd.f32 %v1076_v63, %v1027_v61 }
  0xd6   :  { %v980_v5 = vpop.f32.mrf.mxu1 }
  0xd7   :  { %v5526_v19 = vadd.f32 %v980_v5, %v931_v0 }
  0xda   :  { %v1029_v16 = vpop.f32.mrf.mxu2 }
  0xdc   :  { %v1078_v20 = vpop.f32.mrf.mxu3  ;;  %v934_v21 = vpop.f32.mrf.mxu0 }
  0xdd   :  { %v5532_v30 = vadd.f32 %v1078_v20, %v1029_v16  ;;  %v4064_v16 = vld [vmem:[#allocation2 + $0xf0] sm:$0xf0] }
  0xde   :  { %v983_v28 = vpop.f32.mrf.mxu1 }
  0xdf   :  { %1129 = vmatmul.bf16.gmra.mxu0 %v5406_v52  ;;  %1227 = vmatmul.bf16.gmra.mxu2 %v5406_v52  ;;  %8556 = vst [vmem:[#allocation22_spill] sm:$0xff] %v5532_v30  ;;  %v5534_v31 = vadd.f32 %v983_v28, %v934_v21  ;;  %v4886_v21 = vld [vmem:[#allocation2 + $0x2d4] sm:$0xf]  ;;  %v4067_v28 = vor.u32 %v4822_v12, %v4064_v16 }
  0xe0   :  { %v4323_v35 = vor.u32 %v4886_v21, %v4320_v23  ;;  %v4878_v21 = vld [vmem:[#allocation2 + $0x294] sm:$0xf] }
  0xe1   :  { %1178 = vmatmul.bf16.gmra.mxu1 %v5408_v53  ;;  %1276 = vmatmul.bf16.gmra.mxu3 %v5408_v53  ;;  %v4288_v23 = vld [vmem:[#allocation2 + $0x2b0] sm:$0xf0] }
  0xe2   :  { %v1032_v36 = vpop.f32.mrf.mxu2  ;;  %1404 = vmatpush.bf16.msra.mxu2 %v4067_v28  ;;  %1453 = vmatpush.bf16.msra.mxu3 %v4323_v35  ;;  %v4291_v35 = vor.u32 %v4878_v21, %v4288_v23  ;;  %v4256_v21 = vld [vmem:[#allocation2 + $0x270] sm:$0xf0] }
  0xe4   :  { %v1081_v38 = vpop.f32.mrf.mxu3  ;;  %v936_v39 = vpop.f32.mrf.mxu0 }
  0xe5   :  { %v5536_v46 = vadd.f32 %v1081_v38, %v1032_v36  ;;  %v4826_v38 = vld [vmem:[#allocation2 + $0xec] sm:$0xf0] }
  0xe6   :  { %v985_v43 = vpop.f32.mrf.mxu1  ;;  %v4063_v42 = vor.u32 %v4826_v38, %v4062_v37  ;;  %1454 = vmatpush.bf16.msra.mxu3 %v4291_v35  ;;  %v4818_v37 = vld [vmem:[#allocation2 + $0xac] sm:$0xf0] }
  0xe7   :  { %8557 = vst [vmem:[#allocation23_spill] sm:$0xff] %v5536_v46  ;;  %v5538_v55 = vadd.f32 %v985_v43, %v936_v39  ;;  %v4318_v39 = vld [vmem:[#allocation2 + $0x2d0] sm:$0xf] }
  0xe8   :  { %v4890_v43 = vld [vmem:[#allocation2 + $0x2ec] sm:$0xf0]  ;;  %1306 = vmatpush.bf16.msra.mxu0 %v4063_v42 }
  0xe9   :  { %8558 = vst [vmem:[#allocation24_spill] sm:$0xff] %v5538_v55  ;;  %v4319_v45 = vor.u32 %v4890_v43, %v4318_v39  ;;  %v4286_v38 = vld [vmem:[#allocation2 + $0x290] sm:$0xf] }
  0xea   :  { %v1034_v61 = vpop.f32.mrf.mxu2  ;;  %v4882_v39 = vld [vmem:[#allocation2 + $0x2ac] sm:$0xf0] }
  0xeb   :  { %1355 = vmatpush.bf16.msra.mxu1 %v4319_v45 }
  0xec   :  { %v1083_v62 = vpop.f32.mrf.mxu3  ;;  %v939_v63 = vpop.f32.mrf.mxu0 }
  0xed   :  { %v5548_v17 = vadd.f32 %v1083_v62, %v1034_v61 }
  0xee   :  { %v988_v0 = vpop.f32.mrf.mxu1 }
  0xef   :  { %1134 = vmatmul.bf16.gmra.mxu0 %v5426_v6  ;;  %1232 = vmatmul.bf16.gmra.mxu2 %v5426_v6  ;;  %8559 = vst [vmem:[#allocation25_spill] sm:$0xff] %v5548_v17  ;;  %v5550_v20 = vadd.f32 %v988_v0, %v939_v63 }
  0xf1   :  { %1183 = vmatmul.bf16.gmra.mxu1 %v5428_v7  ;;  %1281 = vmatmul.bf16.gmra.mxu3 %v5428_v7 }
  0xf2   :  { %v1037_v4 = vpop.f32.mrf.mxu2 }
  0xf4   :  { %v1086_v5 = vpop.f32.mrf.mxu3  ;;  %v5544_v8 = vpop.f32.mrf.mxu0 }
  0xf5   :  { %v5552_v41 = vadd.f32 %v1086_v5, %v1037_v4  ;;  %v4032_v4 = vld [vmem:[#allocation2 + $0xb0] sm:$0xf0] }
  0xf6   :  { %v5546_v11 = vpop.f32.mrf.mxu1  ;;  %v4035_v16 = vor.u32 %v4814_v2, %v4032_v4  ;;  %v4000_v2 = vld [vmem:[#allocation2 + $0x70] sm:$0xf0] }
  0xf7   :  { %8560 = vst [vmem:[#allocation26_spill] sm:$0xff] %v5552_v41 }
  0xf8   :  { %1405 = vmatpush.bf16.msra.mxu2 %v4035_v16  ;;  %v4287_v16 = vor.u32 %v4882_v39, %v4286_v38 }
  0xfa   :  { %v1039_v25 = vpop.f32.mrf.mxu2  ;;  %1356 = vmatpush.bf16.msra.mxu1 %v4287_v16  ;;  %v3968_v16 = vld [vmem:[#allocation2 + $0x30] sm:$0xf0] }
  0xfc   :  { %v1088_v29 = vpop.f32.mrf.mxu3  ;;  %v944_v34 = vpop.f32.mrf.mxu0 }
  0xfd   :  { %v5558_v51 = vadd.f32 %v1088_v29, %v1039_v25 }
  0xfe   :  { %v993_v36 = vpop.f32.mrf.mxu1 }
  0xff   :  { %1139 = vmatmul.bf16.gmra.mxu0 %v5446_v26  ;;  %1237 = vmatmul.bf16.gmra.mxu2 %v5446_v26  ;;  %8561 = vst [vmem:[#allocation27_spill] sm:$0xff] %v5558_v51  ;;  %v5562_v62 = vadd.f32 %v993_v36, %v944_v34  ;;  %v4030_v36 = vld [vmem:[#allocation2 + $0x90] sm:$0xf] }
 0x100   :  { %v4031_v43 = vor.u32 %v4818_v37, %v4030_v36  ;;  %v4810_v36 = vld [vmem:[#allocation2 + $0x6c] sm:$0xf0] }
 0x101   :  { %1188 = vmatmul.bf16.gmra.mxu1 %v5448_v27  ;;  %1286 = vmatmul.bf16.gmra.mxu3 %v5448_v27  ;;  %8563 = vst [vmem:[#allocation29_spill] sm:$0xff] %v5562_v62  ;;  %v4254_v37 = vld [vmem:[#allocation2 + $0x250] sm:$0xf] }
 0x102   :  { %v1042_v54 = vpop.f32.mrf.mxu2  ;;  %1307 = vmatpush.bf16.msra.mxu0 %v4031_v43 }
 0x104   :  { %v1091_v59 = vpop.f32.mrf.mxu3  ;;  %v5560_v61 = vpop.f32.mrf.mxu0 }
 0x105   :  { %8562 = vst [vmem:[#allocation28_spill] sm:$0xff] %v5560_v61  ;;  %v5564_v63 = vadd.f32 %v1091_v59, %v1042_v54  ;;  %v4806_v59 = vld [vmem:[#allocation2 + $0x54] sm:$0xf]  ;;  %v4874_v61 = vld [vmem:[#allocation2 + $0x26c] sm:$0xf0] }
 0x106   :  { %v5566_v0 = vpop.f32.mrf.mxu1  ;;  %v4003_v23 = vor.u32 %v4806_v59, %v4000_v2  ;;  %v4798_v2 = vld [vmem:[#allocation2 + $0x14] sm:$0xf] }
 0x107   :  { %8564 = vst [vmem:[#allocation30_spill] sm:$0xff] %v5564_v63  ;;  %v4870_v63 = vld [vmem:[#allocation2 + $0x254] sm:$0xf] }
 0x108   :  { %8565 = vst [vmem:[#allocation31_spill] sm:$0xff] %v5566_v0  ;;  %v4259_v35 = vor.u32 %v4870_v63, %v4256_v21  ;;  %1406 = vmatpush.bf16.msra.mxu2 %v4003_v23 }
 0x10a   :  { %v1044_v3 = vpop.f32.mrf.mxu2  ;;  %1455 = vmatpush.bf16.msra.mxu3 %v4259_v35 }
 0x10c   :  { %v1093_v5 = vpop.f32.mrf.mxu3  ;;  %v949_v9 = vpop.f32.mrf.mxu0 }
 0x10d   :  { %v5576_v0 = vadd.f32 %v1093_v5, %v1044_v3 }
 0x10e   :  { %v998_v12 = vpop.f32.mrf.mxu1 }
 0x10f   :  { %1144 = vmatmul.bf16.gmra.mxu0 %v5466_v47  ;;  %1242 = vmatmul.bf16.gmra.mxu2 %v5466_v47  ;;  %8568 = vst [vmem:[#allocation34_spill] sm:$0xff] %v5576_v0 }
 0x111   :  { %1193 = vmatmul.bf16.gmra.mxu1 %v5468_v48  ;;  %1291 = vmatmul.bf16.gmra.mxu3 %v5468_v48 }
 0x112   :  { %v1047_v25 = vpop.f32.mrf.mxu2 }
 0x114   :  { %v1096_v28 = vpop.f32.mrf.mxu3  ;;  %v5572_v29 = vpop.f32.mrf.mxu0 }
 0x115   :  { %8566 = vst [vmem:[#allocation32_spill] sm:$0xff] %v5572_v29  ;;  %v5578_v29 = vadd.f32 %v998_v12, %v949_v9  ;;  %v5583_v3 = vadd.f32 %v1096_v28, %v1047_v25  ;;  %v4255_v12 = vor.u32 %v4874_v61, %v4254_v37  ;;  %v3971_v25 = vor.u32 %v4798_v2, %v3968_v16  ;;  %v4862_v28 = vld [vmem:[#allocation2 + $0x214] sm:$0xf] }
 0x116   :  { %v5574_v34 = vpop.f32.mrf.mxu1 }
 0x117   :  { %8567 = vst [vmem:[#allocation33_spill] sm:$0xff] %v5574_v34  ;;  %v3998_v34 = vld [vmem:[#allocation2 + $0x50] sm:$0xf]  ;;  %1357 = vmatpush.bf16.msra.mxu1 %v4255_v12  ;;  %1407 = vmatpush.bf16.msra.mxu2 %v3971_v25 }
 0x118   :  { %8569 = vst [vmem:[#allocation35_spill] sm:$0xff] %v5578_v29  ;;  %v3999_v5 = vor.u32 %v4810_v36, %v3998_v34  ;;  %v4224_v34 = vld [vmem:[#allocation2 + $0x230] sm:$0xf0]  ;;  %v3966_v25 = vld [vmem:[#allocation2 + $0x10] sm:$0xf] }
 0x119   :  { %8570 = vst [vmem:[#allocation36_spill] sm:$0xff] %v5583_v3  ;;  %v4227_v36 = vor.u32 %v4862_v28, %v4224_v34  ;;  %v4222_v28 = vld [vmem:[#allocation2 + $0x210] sm:$0xf]  ;;  %v4200_v3 = vld [vmem:[#allocation2 + $0x1f8] sm:$0xf0] }
 0x11a   :  { %v1049_v42 = vpop.f32.mrf.mxu2  ;;  %1308 = vmatpush.bf16.msra.mxu0 %v3999_v5 }
 0x11b   :  { %1456 = vmatpush.bf16.msra.mxu3 %v4227_v36 }
 0x11c   :  { %v1098_v45 = vpop.f32.mrf.mxu3  ;;  %v954_v54 = vpop.f32.mrf.mxu0 }
 0x11d   :  { %v5590_v43 = vadd.f32 %v1098_v45, %v1049_v42 }
 0x11e   :  { %v1003_v4 = vpop.f32.mrf.mxu1 }
 0x11f   :  { %1149 = vmatmul.bf16.gmra.mxu0 %v5486_v56  ;;  %1247 = vmatmul.bf16.gmra.mxu2 %v5486_v56  ;;  %8573 = vst [vmem:[#allocation39_spill] sm:$0xff] %v5590_v43  ;;  %v5592_v59 = vadd.f32 %v1003_v4, %v954_v54  ;;  %v4855_v43 = vld [vmem:[#allocation2 + $0x1dc] sm:$0xf] }
 0x121   :  { %1198 = vmatmul.bf16.gmra.mxu1 %v5488_v57  ;;  %1296 = vmatmul.bf16.gmra.mxu3 %v5488_v57  ;;  %8574 = vst [vmem:[#allocation40_spill] sm:$0xff] %v5592_v59 }
 0x122   :  { %v1052_v9 = vpop.f32.mrf.mxu2 }
 0x124   :  { %v1101_v38 = vpop.f32.mrf.mxu3  ;;  %v5586_v39 = vpop.f32.mrf.mxu0 }
 0x125   :  { %8571 = vst [vmem:[#allocation37_spill] sm:$0xff] %v5586_v39  ;;  %v5594_v37 = vadd.f32 %v1101_v38, %v1052_v9  ;;  %v4866_v9 = vld [vmem:[#allocation2 + $0x22c] sm:$0xf0] }
 0x126   :  { %v5588_v63 = vpop.f32.mrf.mxu1  ;;  %v4223_v34 = vor.u32 %v4866_v9, %v4222_v28 }
 0x127   :  { %8572 = vst [vmem:[#allocation38_spill] sm:$0xff] %v5588_v63  ;;  %v4802_v63 = vld [vmem:[#allocation2 + $0x2c] sm:$0xf0] }
 0x128   :  { %8575 = vst [vmem:[#allocation41_spill] sm:$0xff] %v5594_v37  ;;  %v3967_v38 = vor.u32 %v4802_v63, %v3966_v25  ;;  %1358 = vmatpush.bf16.msra.mxu1 %v4223_v34 }
 0x12a   :  { %v1054_v21 = vpop.f32.mrf.mxu2  ;;  %1309 = vmatpush.bf16.msra.mxu0 %v3967_v38 }
 0x12c   :  { %v1103_v23 = vpop.f32.mrf.mxu3  ;;  %v1115_v35 = vpop.f32.mrf.mxu0 }
 0x12d   :  { %v5604_v36 = vadd.f32 %v1103_v23, %v1054_v21  ;;  %v4203_v23 = vor.u32 %v4855_v43, %v4200_v3 }
 0x12e   :  { %v1164_v61 = vpop.f32.mrf.mxu1 }
 0x12f   :  { %1408 = vmatmul.bf16.vlgmr.msra.gmra.mxu2 %v5346_v44  ;;  %8578 = vst [vmem:[#allocation44_spill] sm:$0xff] %v5604_v36  ;;  %v5606_v39 = vadd.f32 %v1164_v61, %v1115_v35  ;;  %1310 = vmatmul.bf16.vlgmr.msra.gmra.mxu0 %v5346_v44  ;;  %v4919_v35 = vld [vmem:[#allocation2 + $0x3dc] sm:$0xf] }
 0x130   :  { %v4456_v61 = vld [vmem:[#allocation2 + $0x3f8] sm:$0xf0]  ;;  %1596 = vmatpush.bf16.msrb.mxu2 %v4203_v23 }
 0x131   :  { %1457 = vmatmul.bf16.vlgmr.msra.gmra.mxu3 %v5348_v49  ;;  %8579 = vst [vmem:[#allocation45_spill] sm:$0xff] %v5606_v39  ;;  %1359 = vmatmul.bf16.vlgmr.msra.gmra.mxu1 %v5348_v49 }
 0x132   :  { %v1213_v42 = vpop.f32.mrf.mxu2 }
 0x134   :  { %v1262_v45 = vpop.f32.mrf.mxu3  ;;  %v5598_v54 = vpop.f32.mrf.mxu0 }
 0x135   :  { %8576 = vst [vmem:[#allocation42_spill] sm:$0xff] %v5598_v54  ;;  %v5608_v54 = vadd.f32 %v1262_v45, %v1213_v42  ;;  %v4198_v42 = vld [vmem:[#allocation2 + $0x1d8] sm:$0xf] }
 0x136   :  { %v5600_v4 = vpop.f32.mrf.mxu1  ;;  %v4859_v45 = vld [vmem:[#allocation2 + $0x1f4] sm:$0xf0] }
 0x137   :  { %8577 = vst [vmem:[#allocation43_spill] sm:$0xff] %v5600_v4 }
 0x138   :  { %8580 = vst [vmem:[#allocation46_spill] sm:$0xff] %v5608_v54  ;;  %v4392_v54 = vld [vmem:[#allocation2 + $0x378] sm:$0xf0] }
 0x13a   :  { %v1215_v5 = vpop.f32.mrf.mxu2 }
 0x13c   :  { %v1264_v12 = vpop.f32.mrf.mxu3  ;;  %v1120_v2 = vpop.f32.mrf.mxu0 }
 0x13d   :  { %v5610_v59 = vadd.f32 %v1264_v12, %v1215_v5  ;;  %v4459_v5 = vor.u32 %v4919_v35, %v4456_v61  ;;  %v4199_v12 = vor.u32 %v4859_v45, %v4198_v42 }
 0x13e   :  { %v1169_v16 = vpop.f32.mrf.mxu1 }
 0x13f   :  { %1413 = vmatmul.bf16.gmra.mxu2 %v5366_v14  ;;  %8581 = vst [vmem:[#allocation47_spill] sm:$0xff] %v5610_v59  ;;  %v5612_v29 = vadd.f32 %v1169_v16, %v1120_v2  ;;  %v4454_v2 = vld [vmem:[#allocation2 + $0x3d8] sm:$0xf]  ;;  %1645 = vmatpush.bf16.msrb.mxu3 %v4459_v5  ;;  %v4903_v59 = vld [vmem:[#allocation2 + $0x35c] sm:$0xf] }
 0x140   :  { %v4923_v16 = vld [vmem:[#allocation2 + $0x3f4] sm:$0xf0]  ;;  %1498 = vmatpush.bf16.msrb.mxu0 %v4199_v12  ;;  %v4847_v12 = vld [vmem:[#allocation2 + $0x19c] sm:$0xf] }
 0x141   :  { %1462 = vmatmul.bf16.gmra.mxu3 %v5368_v15  ;;  %8582 = vst [vmem:[#allocation48_spill] sm:$0xff] %v5612_v29  ;;  %1315 = vmatmul.bf16.gmra.mxu0 %v5366_v14 }
 0x142   :  { %v1218_v4 = vpop.f32.mrf.mxu2  ;;  %1364 = vmatmul.bf16.gmra.mxu1 %v5368_v15 }
 0x144   :  { %v1267_v37 = vpop.f32.mrf.mxu3  ;;  %v5616_v63 = vpop.f32.mrf.mxu0 }
 0x145   :  { %v5614_v0 = vadd.f32 %v1267_v37, %v1218_v4  ;;  %8584 = vst [vmem:[#allocation50_spill] sm:$0xff] %v5616_v63  ;;  %v4455_v37 = vor.u32 %v4923_v16, %v4454_v2  ;;  %v4168_v2 = vld [vmem:[#allocation2 + $0x1b8] sm:$0xf0] }
 0x146   :  { %v5618_v21 = vpop.f32.mrf.mxu1  ;;  %v4911_v16 = vld [vmem:[#allocation2 + $0x39c] sm:$0xf] }
 0x147   :  { %8583 = vst [vmem:[#allocation49_spill] sm:$0xff] %v5614_v0  ;;  %1547 = vmatpush.bf16.msrb.mxu1 %v4455_v37  ;;  %v4424_v37 = vld [vmem:[#allocation2 + $0x3b8] sm:$0xf0] }
 0x148   :  { %8585 = vst [vmem:[#allocation51_spill] sm:$0xff] %v5618_v21  ;;  %v4839_v21 = vld [vmem:[#allocation2 + $0x15c] sm:$0xf] }
 0x149   :  { %v4136_v63 = vld [vmem:[#allocation2 + $0x178] sm:$0xf0] }
 0x14a   :  { %v1220_v4 = vpop.f32.mrf.mxu2 }
 0x14c   :  { %v1269_v25 = vpop.f32.mrf.mxu3  ;;  %v1125_v3 = vpop.f32.mrf.mxu0 }
 0x14d   :  { %v5622_v28 = vadd.f32 %v1269_v25, %v1220_v4  ;;  %v4166_v4 = vld [vmem:[#allocation2 + $0x198] sm:$0xf] }
 0x14e   :  { %v1174_v43 = vpop.f32.mrf.mxu1  ;;  %v4851_v25 = vld [vmem:[#allocation2 + $0x1b4] sm:$0xf0] }
 0x14f   :  { %8586 = vst [vmem:[#allocation52_spill] sm:$0xff] %v5622_v28  ;;  %1418 = vmatmul.bf16.gmra.mxu2 %v5386_v32  ;;  %v5626_v9 = vadd.f32 %v1174_v43, %v1125_v3  ;;  %v4422_v3 = vld [vmem:[#allocation2 + $0x398] sm:$0xf] }
 0x150   :  { %v4915_v43 = vld [vmem:[#allocation2 + $0x3b4] sm:$0xf0] }
 0x151   :  { %1467 = vmatmul.bf16.gmra.mxu3 %v5388_v33  ;;  %8587 = vst [vmem:[#allocation53_spill] sm:$0xff] %v5626_v9  ;;  %1320 = vmatmul.bf16.gmra.mxu0 %v5386_v32  ;;  %v4167_v9 = vor.u32 %v4851_v25, %v4166_v4  ;;  %v4423_v28 = vor.u32 %v4915_v43, %v4422_v3  ;;  %v4464_v25 = vmul.f32 -1.442695, %v5502_v18 }
 0x152   :  { %v1223_v38 = vpop.f32.mrf.mxu2  ;;  %1369 = vmatmul.bf16.gmra.mxu1 %v5388_v33  ;;  %v4139_v32 = vor.u32 %v4839_v21, %v4136_v63  ;;  %v4134_v33 = vld [vmem:[#allocation2 + $0x158] sm:$0xf] }
 0x153   :  { %1499 = vmatpush.bf16.msrb.mxu0 %v4167_v9  ;;  %1548 = vmatpush.bf16.msrb.mxu1 %v4423_v28 }
 0x154   :  { %v1272_v34 = vpop.f32.mrf.mxu3  ;;  %v5630_v23 = vpop.f32.mrf.mxu0 }
 0x155   :  { %8588 = vst [vmem:[#allocation54_spill] sm:$0xff] %v5630_v23  ;;  %v4427_v23 = vor.u32 %v4911_v16, %v4424_v37  ;;  %v5642_v16 = vadd.f32 %v1272_v34, %v1223_v38  ;;  %v4461_v38 = vmul.f32 -1.442695, %v5500_v13  ;;  %v4831_v34 = vld [vmem:[#allocation2 + $0x11c] sm:$0xf] }
 0x156   :  { %v5632_v35 = vpop.f32.mrf.mxu1 }
 0x157   :  { %8589 = vst [vmem:[#allocation55_spill] sm:$0xff] %v5632_v35  ;;  %v4171_v35 = vor.u32 %v4847_v12, %v4168_v2  ;;  %1646 = vmatpush.bf16.msrb.mxu3 %v4427_v23  ;;  %v4843_v12 = vld [vmem:[#allocation2 + $0x174] sm:$0xf0]  ;;  %v4395_v2 = vor.u32 %v4903_v59, %v4392_v54  ;;  %v4460_v59 = vmul.f32 -1.442695, %v5494_v1 }
 0x158   :  { %8592 = vst [vmem:[#allocation58_spill] sm:$0xff] %v5642_v16  ;;  %v4907_v23 = vld [vmem:[#allocation2 + $0x374] sm:$0xf0]  ;;  %v4135_v28 = vor.u32 %v4843_v12, %v4134_v33  ;;  %v4465_v12 = vmul.f32 -1.442695, %v5504_v22 }
 0x159   :  { %1597 = vmatpush.bf16.msrb.mxu2 %v4171_v35  ;;  %v4390_v35 = vld [vmem:[#allocation2 + $0x358] sm:$0xf]  ;;  %4994 = vpow2.f32 %v4460_v59 }
 0x15a   :  { %v1225_v61 = vpop.f32.mrf.mxu2  ;;  %v4391_v9 = vor.u32 %v4907_v23, %v4390_v35  ;;  %1500 = vmatpush.bf16.msrb.mxu0 %v4135_v28  ;;  %4996 = vpow2.f32 %v4461_v38  ;;  %v4468_v35 = vmul.f32 -1.442695, %v5506_v24 }
 0x15b   :  { %1647 = vmatpush.bf16.msrb.mxu3 %v4395_v2  ;;  %4998 = vpow2.f32 %v4464_v25  ;;  %v4360_v25 = vld [vmem:[#allocation2 + $0x338] sm:$0xf0] }
 0x15c   :  { %v1274_v42 = vpop.f32.mrf.mxu3  ;;  %v1130_v45 = vpop.f32.mrf.mxu0  ;;  %1549 = vmatpush.bf16.msrb.mxu1 %v4391_v9 }
 0x15d   :  { %1598 = vmatpush.bf16.msrb.mxu2 %v4139_v32  ;;  %v5645_v37 = vadd.f32 %v1274_v42, %v1225_v61  ;;  %v4104_v61 = vld [vmem:[#allocation2 + $0x138] sm:$0xf0] }
 0x15e   :  { %v1179_v5 = vpop.f32.mrf.mxu1 }
 0x15f   :  { %1423 = vmatmul.bf16.gmra.mxu2 %v5406_v52  ;;  %8593 = vst [vmem:[#allocation59_spill] sm:$0xff] %v5645_v37  ;;  %v5647_v4 = vadd.f32 %v1179_v5, %v1130_v45  ;;  %v4995_v5 = vpop.eup %4994 }
 0x160   :  { %v5668_v43 = vadd.f32 1.0, %v4995_v5  ;;  %v4997_v2 = vpop.eup %4996  ;;  %v4895_v5 = vld [vmem:[#allocation2 + $0x31c] sm:$0xf] }
 0x161   :  { %1472 = vmatmul.bf16.gmra.mxu3 %v5408_v53  ;;  %8594 = vst [vmem:[#allocation60_spill] sm:$0xff] %v5647_v4  ;;  %1325 = vmatmul.bf16.gmra.mxu0 %v5406_v52  ;;  %v5674_v9 = vadd.f32 1.0, %v4997_v2  ;;  %v4472_v2 = vmul.f32 -1.442695, %v5514_v50  ;;  %v4363_v4 = vor.u32 %v4895_v5, %v4360_v25 }
 0x162   :  { %v1228_v0 = vpop.f32.mrf.mxu2  ;;  %1374 = vmatmul.bf16.gmra.mxu1 %v5408_v53  ;;  %5000 = vrcp.f32 %v5668_v43  ;;  %vm1955_vm0 = vweird.f32 %v5668_v43 }
 0x163   :  { %5002 = vpow2.f32 %v4465_v12  ;;  %1648 = vmatpush.bf16.msrb.mxu3 %v4363_v4  ;;  %vm1970_vm3 = vweird.f32 %v5674_v9 }
 0x164   :  { %v1277_v29 = vpop.f32.mrf.mxu3  ;;  %v5638_v39 = vpop.f32.mrf.mxu0  ;;  %5004 = vpow2.f32 %v4468_v35 }
 0x165   :  { %8590 = vst [vmem:[#allocation56_spill] sm:$0xff] %v5638_v39  ;;  %v5655_v21 = vadd.f32 %v1277_v29, %v1228_v0  ;;  %v4107_v0 = vor.u32 %v4831_v34, %v4104_v61  ;;  %v4999_v34 = vpop.eup %4998  ;;  %v4469_v61 = vmul.f32 -1.442695, %v5512_v40  ;;  %5006 = vrcp.f32 %v5674_v9  ;;  %v4899_v39 = vld [vmem:[#allocation2 + $0x334] sm:$0xf0] }
 0x166   :  { %v5640_v36 = vpop.f32.mrf.mxu1  ;;  %v5683_v12 = vadd.f32 1.0, %v4999_v34 }
 0x167   :  { %8591 = vst [vmem:[#allocation57_spill] sm:$0xff] %v5640_v36  ;;  %1599 = vmatpush.bf16.msrb.mxu2 %v4107_v0  ;;  %v4102_v0 = vld [vmem:[#allocation2 + $0x118] sm:$0xf]  ;;  %5008 = vpow2.f32 %v4469_v61 }
 0x168   :  { %8595 = vst [vmem:[#allocation61_spill] sm:$0xff] %v5655_v21  ;;  %v4358_v36 = vld [vmem:[#allocation2 + $0x318] sm:$0xf]  ;;  %5010 = vpow2.f32 %v4472_v2  ;;  %vm2015_vm5 = vweird.f32 %v5683_v12 }
 0x169   :  { %5012 = vrcp.f32 %v5683_v12  ;;  %v4070_v2 = vld [vmem:[#allocation2 + $0xd8] sm:$0xf] }
 0x16a   :  { %v5651_v54 = vpop.f32.mrf.mxu2 }
 0x16c   :  { %v5653_v63 = vpop.f32.mrf.mxu3  ;;  %v5659_v32 = vpop.f32.mrf.mxu0 }
 0x16d   :  { %v5696_v61 = vadd.f32 %v5653_v63, %v5651_v54  ;;  %v4823_v54 = vld [vmem:[#allocation2 + $0xdc] sm:$0xf] }
 0x16e   :  { %v1184_v33 = vpop.f32.mrf.mxu1  ;;  %v4072_v63 = vld [vmem:[#allocation2 + $0xf8] sm:$0xf0] }
 0x16f   :  { %1428 = vmatmul.bf16.gmra.mxu2 %v5426_v6  ;;  %8598 = vst [vmem:[#allocation64_spill] sm:$0xff] %v5696_v61  ;;  %v1974_v61 = vand.u32 2147483647, %v5674_v9 }
 0x171   :  { %1477 = vmatmul.bf16.gmra.mxu3 %v5428_v7  ;;  %1330 = vmatmul.bf16.gmra.mxu0 %v5426_v6  ;;  %vm5781_vm7 = vcmp.eq.f32.partialorder %v1974_v61, 8.507059e+37 }
 0x172   :  { %v1233_v42 = vpop.f32.mrf.mxu2  ;;  %1379 = vmatmul.bf16.gmra.mxu1 %v5428_v7  ;;  %v4359_v7 = vor.u32 %v4899_v39, %v4358_v36 }
 0x174   :  { %v1282_v45 = vpop.f32.mrf.mxu3  ;;  %v5663_v29 = vpop.f32.mrf.mxu0  ;;  %1550 = vmatpush.bf16.msrb.mxu1 %v4359_v7 }
 0x175   :  { %8596 = vst [vmem:[#allocation62_spill] sm:$0xff] %v5663_v29  ;;  %v5681_v29 = vpop.eup %5000  ;;  %v5703_v36 = vadd.f32 %v1282_v45, %v1233_v42  ;;  %v4075_v42 = vor.u32 %v4823_v54, %v4072_v63  ;;  %v4328_v45 = vld [vmem:[#allocation2 + $0x2f8] sm:$0xf0]  ;;  %v4891_v54 = vld [vmem:[#allocation2 + $0x2f4] sm:$0xf0] }
 0x176   :  { %v5665_v3 = vpop.f32.mrf.mxu1  ;;  %v5003_v21 = vpop.eup %5002  ;;  %v1951_v16 = vmul.f32 %v5681_v29, %v5668_v43  ;;  %vm1956_vm2 = vweird.f32 %v5681_v29 }
 0x177   :  { %8597 = vst [vmem:[#allocation63_spill] sm:$0xff] %v5665_v3  ;;  %v4835_v3 = vld [vmem:[#allocation2 + $0x134] sm:$0xf0]  ;;  %v5005_v35 = vpop.eup %5004  ;;  %v5688_v6 = vadd.f32 1.0, %v5003_v21  ;;  %1600 = vmatpush.bf16.msrb.mxu2 %v4075_v42  ;;  %vm5762_vm4 = vmor %vm1955_vm0, %vm1956_vm2 }
 0x178   :  { %v4103_v37 = vor.u32 %v4835_v3, %v4102_v0  ;;  %v5691_v52 = vpop.eup %5006  ;;  %v4473_v3 = vmul.f32 -1.442695, %v5516_v58  ;;  %v5701_v39 = vadd.f32 1.0, %v5005_v35  ;;  %8600 = vst [vmem:[#allocation66_spill] sm:$0xff] %v5703_v36  ;;  %v1952_v5 = vsub.f32 1.0, %v1951_v16 }
 0x179   :  { %v5009_v25 = vpop.eup %5008  ;;  %v1966_v7 = vmul.f32 %v5691_v52, %v5674_v9  ;;  %5014 = vrcp.f32 %v5688_v6  ;;  %v4887_v0 = vld [vmem:[#allocation2 + $0x2dc] sm:$0xf]  ;;  %v4827_v36 = vld [vmem:[#allocation2 + $0xf4] sm:$0xf0]  ;;  %vm1971_vm6 = vweird.f32 %v5691_v52  ;;  %vm2030_vm11 = vweird.f32 %v5688_v6 }
 0x17a   :  { %v1235_v23 = vpop.f32.mrf.mxu2  ;;  %1501 = vmatpush.bf16.msrb.mxu0 %v4103_v37  ;;  %v5699_v37 = vadd.f32 %v1184_v33, %v5659_v32  ;;  %v5011_v33 = vpop.eup %5010  ;;  %5016 = vpow2.f32 %v4473_v3  ;;  %v4071_v3 = vor.u32 %v4827_v36, %v4070_v2  ;;  %v1953_v63 = vmul.f32 %v5681_v29, %v1952_v5  ;;  %vm5796_vm9 = vmor %vm1970_vm3, %vm1971_vm6 }
 0x17b   :  { %v5717_v16 = vpop.eup %5012  ;;  %5018 = vrcp.f32 %v5701_v39  ;;  %v4476_v5 = vmul.f32 -1.442695, %v5519_v60  ;;  %vm2075_vm13 = vweird.f32 %v5701_v39 }
 0x17c   :  { %v1284_v28 = vpop.f32.mrf.mxu3  ;;  %v1140_v59 = vpop.f32.mrf.mxu0  ;;  %8599 = vst [vmem:[#allocation65_spill] sm:$0xff] %v5699_v37  ;;  %v4326_v37 = vld [vmem:[#allocation2 + $0x2d8] sm:$0xf]  ;;  %vm2016_vm8 = vweird.f32 %v5717_v16 }
 0x17d   :  { %v5712_v32 = vadd.f32 %v1284_v28, %v1235_v23  ;;  %v1961_v23 = vand.u32 2147483648, %v5668_v43  ;;  %v5722_v28 = vadd.f32 1.0, %v5009_v25  ;;  %vm5841_vm12 = vmor %vm2015_vm5, %vm2016_vm8 }
 0x17e   :  { %v1189_v38 = vpop.f32.mrf.mxu1  ;;  %1502 = vmatpush.bf16.msrb.mxu0 %v4071_v3 }
 0x17f   :  { %1433 = vmatmul.bf16.gmra.mxu2 %v5446_v26  ;;  %8603 = vst [vmem:[#allocation69_spill] sm:$0xff] %v5712_v32  ;;  %v5715_v35 = vadd.f32 %v1189_v38, %v1140_v59  ;;  %v1967_v59 = vsub.f32 1.0, %v1966_v7  ;;  %v5725_v38 = vadd.f32 1.0, %v5011_v33  ;;  %v5731_v25 = vpop.eup %5014  ;;  %v1962_v42 = vor.u32 1.1754944e-38, %v1961_v23 }
 0x180   :  { %v5017_v33 = vpop.eup %5016  ;;  %5020 = vrcp.f32 %v5722_v28  ;;  %v1976_v23 = vand.u32 2147483648, %v5674_v9  ;;  %v2036_v9 = vand.u32 2147483648, %v5688_v6  ;;  %vm2031_vm14 = vweird.f32 %v5731_v25 }
 0x181   :  { %1482 = vmatmul.bf16.gmra.mxu3 %v5448_v27  ;;  %8604 = vst [vmem:[#allocation70_spill] sm:$0xff] %v5715_v35  ;;  %1335 = vmatmul.bf16.gmra.mxu0 %v5446_v26  ;;  %v5743_v2 = vpop.eup %5018  ;;  %v1968_v3 = vmul.f32 %v5691_v52, %v1967_v59  ;;  %5022 = vrcp.f32 %v5725_v38  ;;  %v4477_v59 = vmul.f32 -1.442695, %v5524_v10  ;;  %vm5882_vm2 = vmor %vm2030_vm11, %vm2031_vm14  ;;  %vm2135_vm6 = vweird.f32 %v5725_v38  ;;  %v4871_v26 = vld [vmem:[#allocation2 + $0x25c] sm:$0xf] }
 0x182   :  { %v1238_v34 = vpop.f32.mrf.mxu2  ;;  %1384 = vmatmul.bf16.gmra.mxu1 %v5448_v27  ;;  %5024 = vpow2.f32 %v4476_v5  ;;  %v2019_v5 = vand.u32 2147483647, %v5683_v12 }
 0x184   :  { %v1287_v53 = vpop.f32.mrf.mxu3  ;;  %v5705_v4 = vpop.f32.mrf.mxu0  ;;  %vm5803_vm10 = vcmp.eq.f32.partialorder %v2019_v5, 8.507059e+37  ;;  %v2081_v5 = vand.u32 2147483648, %v5701_v39 }
 0x185   :  { %8601 = vst [vmem:[#allocation67_spill] sm:$0xff] %v5705_v4  ;;  %v4331_v4 = vor.u32 %v4887_v0, %v4328_v45  ;;  %v2011_v0 = vmul.f32 %v5717_v16, %v5683_v12  ;;  %v4327_v45 = vor.u32 %v4891_v54, %v4326_v37  ;;  %v5741_v37 = vadd.f32 %v1287_v53, %v1238_v34 }
 0x186   :  { %v5707_v21 = vpop.f32.mrf.mxu1  ;;  %v2021_v53 = vand.u32 2147483648, %v5683_v12  ;;  %v5756_v34 = vadd.f32 1.0, %v5017_v33  ;;  %v1977_v33 = vor.u32 1.1754944e-38, %v1976_v23 }
 0x187   :  { %8602 = vst [vmem:[#allocation68_spill] sm:$0xff] %v5707_v21  ;;  %v1959_v21 = vand.u32 2147483647, %v5668_v43  ;;  %1649 = vmatpush.bf16.msrb.mxu3 %v4331_v4  ;;  %1551 = vmatpush.bf16.msrb.mxu1 %v4327_v45  ;;  %v2012_v27 = vsub.f32 1.0, %v2011_v0  ;;  %v1969_v43 = vadd.f32 %v5691_v52, %v1968_v3  ;;  %v4481_v3 = vmul.f32 -1.442695, %v5532_v30 }
 0x188   :  { %8607 = vst [vmem:[#allocation71_spill] sm:$0xff] %v5741_v37  ;;  %5026 = vrcp.f32 %v5756_v34  ;;  %v2156_v12 = vand.u32 2147483648, %v5756_v34 }
 0x189   :  { %vm5734_vm1 = vcmp.eq.f32.partialorder %v1959_v21, 8.507059e+37  ;;  %v1954_v21 = vadd.f32 %v5681_v29, %v1953_v63  ;;  %v4480_v63 = vmul.f32 -1.442695, %v5526_v19  ;;  %5028 = vpow2.f32 %v4477_v59 }
 0x18a   :  { %v1240_v4 = vpop.f32.mrf.mxu2 }
 0x18b   :  { %v1958_v0 = vsel %vm5762_vm4, %v5681_v29, %v1954_v21  ;;  %v2022_v21 = vor.u32 1.1754944e-38, %v2021_v53  ;;  %v1973_v53 = vsel %vm5796_vm9, %v5691_v52, %v1969_v43  ;;  %v2034_v52 = vand.u32 2147483647, %v5688_v6 }
 0x18c   :  { %v1289_v7 = vpop.f32.mrf.mxu3  ;;  %v1145_v35 = vpop.f32.mrf.mxu0  ;;  %v1963_v61 = vsel %vm5734_vm1, %v1962_v42, %v1958_v0  ;;  %5030 = vpow2.f32 %v4480_v63  ;;  %v2079_v43 = vand.u32 2147483647, %v5701_v39  ;;  %v1978_v23 = vsel %vm5781_vm7, %v1977_v33, %v1973_v53 }
 0x18d   :  { %v5748_v54 = vadd.f32 %v1289_v7, %v1240_v4  ;;  %v5779_v4 = vpop.eup %5020  ;;  %v5821_v0 = vmul.f32 %v1963_v61, %v5494_v1  ;;  %5032 = vpow2.f32 %v4481_v3  ;;  %v2037_v7 = vor.u32 1.1754944e-38, %v2036_v9 }
 0x18e   :  { %v1194_v32 = vpop.f32.mrf.mxu1  ;;  %v5787_v29 = vpop.eup %5022  ;;  %v2086_v36 = vmul.f32 %v5779_v4, %v5722_v28  ;;  %vm5852_vm15 = vcmp.eq.f32.partialorder %v2034_v52, 8.507059e+37  ;;  %v4485_v53 = vmul.f32 -1.442695, %v5536_v46  ;;  %v5859_v9 = vmul.f32 %v1978_v23, %v5500_v13 }
 0x18f   :  { %1438 = vmatmul.bf16.gmra.mxu2 %v5466_v47  ;;  %8608 = vst [vmem:[#allocation72_spill] sm:$0xff] %v5748_v54  ;;  %v5752_v45 = vadd.f32 %v1194_v32, %v1145_v35  ;;  %v2026_v32 = vmul.f32 %v5731_v25, %v5688_v6  ;;  %v2071_v35 = vmul.f32 %v5743_v2, %v5701_v39  ;;  %v5025_v37 = vpop.eup %5024  ;;  %vm5861_vm0 = vcmp.eq.f32.partialorder %v2079_v43, 8.507059e+37 }
 0x190   :  { %v2131_v59 = vmul.f32 %v5787_v29, %v5725_v38  ;;  %8618 = vst [vmem:[#allocation74_spill] sm:$0xff] %v5821_v0  ;;  %v5829_v14 = vadd.f32 1.0, %v5025_v37  ;;  %v5835_v1 = vpop.eup %5026  ;;  %v4484_v37 = vmul.f32 -1.442695, %v5534_v31  ;;  %v2082_v3 = vor.u32 1.1754944e-38, %v2081_v5 }
 0x191   :  { %1487 = vmatmul.bf16.gmra.mxu3 %v5468_v48  ;;  %8609 = vst [vmem:[#allocation73_spill] sm:$0xff] %v5752_v45  ;;  %v2013_v45 = vmul.f32 %v5717_v16, %v2012_v27  ;;  %v2027_v27 = vsub.f32 1.0, %v2026_v32  ;;  %v2072_v54 = vsub.f32 1.0, %v2071_v35  ;;  %1340 = vmatmul.bf16.gmra.mxu0 %v5466_v47  ;;  %v5029_v33 = vpop.eup %5028  ;;  %vm2076_vm1 = vweird.f32 %v5743_v2 }
 0x192   :  { %v5811_v42 = vpop.f32.mrf.mxu2  ;;  %1389 = vmatmul.bf16.gmra.mxu1 %v5468_v48  ;;  %8625 = vst [vmem:[#allocation77_spill] sm:$0xff] %v5859_v9  ;;  %v5031_v52 = vpop.eup %5030  ;;  %5034 = vrcp.f32 %v5829_v14  ;;  %v2146_v23 = vmul.f32 %v5835_v1, %v5756_v34  ;;  %v5874_v5 = vadd.f32 1.0, %v5029_v33  ;;  %vm5890_vm3 = vmor %vm2075_vm13, %vm2076_vm1  ;;  %vm2090_vm4 = vweird.f32 %v5722_v28  ;;  %v4815_v33 = vld [vmem:[#allocation2 + $0x9c] sm:$0xf] }
 0x193   :  { %v2014_v35 = vadd.f32 %v5717_v16, %v2013_v45  ;;  %v2028_v15 = vmul.f32 %v5731_v25, %v2027_v27  ;;  %v2073_v45 = vmul.f32 %v5743_v2, %v2072_v54  ;;  %v2087_v54 = vsub.f32 1.0, %v2086_v36  ;;  %v5033_v13 = vpop.eup %5032  ;;  %v4296_v48 = vld [vmem:[#allocation2 + $0x2b8] sm:$0xf0] }
 0x194   :  { %v5813_v32 = vpop.f32.mrf.mxu3  ;;  %v5831_v30 = vpop.f32.mrf.mxu0  ;;  %v2132_v27 = vsub.f32 1.0, %v2131_v59  ;;  %5036 = vpow2.f32 %v4484_v37  ;;  %vm2091_vm7 = vweird.f32 %v5779_v4  ;;  %v2147_v9 = vsub.f32 1.0, %v2146_v23 }
 0x195   :  { %8619 = vst [vmem:[#allocation75_spill] sm:$0xff] %v5831_v30  ;;  %v2018_v61 = vsel %vm5841_vm12, %v5717_v16, %v2014_v35  ;;  %v2094_v16 = vand.u32 2147483647, %v5722_v28  ;;  %v2096_v35 = vand.u32 2147483648, %v5722_v28  ;;  %v2074_v59 = vadd.f32 %v5743_v2, %v2073_v45 }
 0x196   :  { %v5833_v63 = vpop.f32.mrf.mxu1  ;;  %v2088_v43 = vmul.f32 %v5779_v4, %v2087_v54  ;;  %v2023_v30 = vsel %vm5803_vm10, %v2022_v21, %v2018_v61  ;;  %v2133_v45 = vmul.f32 %v5787_v29, %v2132_v27  ;;  %v2139_v54 = vand.u32 2147483647, %v5725_v38  ;;  %v4040_v61 = vld [vmem:[#allocation2 + $0xb8] sm:$0xf0]  ;;  %vm5940_vm10 = vmor %vm2090_vm4, %vm2091_vm7 }
 0x197   :  { %8620 = vst [vmem:[#allocation76_spill] sm:$0xff] %v5833_v63  ;;  %v2029_v63 = vadd.f32 %v5731_v25, %v2028_v15  ;;  %5038 = vpow2.f32 %v4485_v53  ;;  %vm5895_vm5 = vcmp.eq.f32.partialorder %v2094_v16, 8.507059e+37  ;;  %v2097_v6 = vor.u32 1.1754944e-38, %v2096_v35 }
 0x198   :  { %v5900_v21 = vadd.f32 1.0, %v5031_v52  ;;  %v2078_v16 = vsel %vm5890_vm3, %v5743_v2, %v2074_v59  ;;  %v5913_v35 = vadd.f32 1.0, %v5033_v13  ;;  %v4879_v52 = vld [vmem:[#allocation2 + $0x29c] sm:$0xf]  ;;  %v2089_v47 = vadd.f32 %v5779_v4, %v2088_v43  ;;  %v5918_v46 = vpop.eup %5034 }
 0x199   :  { %v2033_v53 = vsel %vm5882_vm2, %v5731_v25, %v2029_v63  ;;  %5040 = vrcp.f32 %v5874_v5  ;;  %v4488_v0 = vmul.f32 -1.442695, %v5538_v55  ;;  %v2134_v25 = vadd.f32 %v5787_v29, %v2133_v45 }
 0x19a   :  { %v5902_v27 = vpop.f32.mrf.mxu2  ;;  %vm2136_vm8 = vweird.f32 %v5787_v29  ;;  %v2141_v2 = vand.u32 2147483648, %v5725_v38  ;;  %v4043_v63 = vor.u32 %v4815_v33, %v4040_v61  ;;  %v5037_v15 = vpop.eup %5036  ;;  %v2038_v43 = vsel %vm5852_vm15, %v2037_v7, %v2033_v53  ;;  %v4038_v38 = vld [vmem:[#allocation2 + $0x98] sm:$0xf] }
 0x19b   :  { %vm5929_vm9 = vcmp.eq.f32.partialorder %v2139_v54, 8.507059e+37  ;;  %5042 = vrcp.f32 %v5900_v21  ;;  %v4299_v45 = vor.u32 %v4879_v52, %v4296_v48  ;;  %v2083_v55 = vsel %vm5861_vm0, %v2082_v3, %v2078_v16  ;;  %vm5954_vm11 = vmor %vm2135_vm6, %vm2136_vm8  ;;  %v4819_v53 = vld [vmem:[#allocation2 + $0xb4] sm:$0xf0] }
 0x19c   :  { %v5904_v39 = vpop.f32.mrf.mxu3  ;;  %v5923_v59 = vpop.f32.mrf.mxu0  ;;  %v2154_v7 = vand.u32 2147483647, %v5756_v34  ;;  %5044 = vrcp.f32 %v5913_v35  ;;  %1601 = vmatpush.bf16.msrb.mxu2 %v4043_v63  ;;  %v2093_v48 = vsel %vm5940_vm10, %v5779_v4, %v2089_v47  ;;  %v2148_v36 = vmul.f32 %v5835_v1, %v2147_v9  ;;  %v4883_v52 = vld [vmem:[#allocation2 + $0x2b4] sm:$0xf0]  ;;  %v4807_v63 = vld [vmem:[#allocation2 + $0x5c] sm:$0xf] }
 0x19d   :  { %v5039_v37 = vpop.eup %5038  ;;  %5046 = vpow2.f32 %v4488_v0  ;;  %1650 = vmatpush.bf16.msrb.mxu3 %v4299_v45  ;;  %v5961_v54 = vmul.f32 %v2023_v30, %v5502_v18  ;;  %v2138_v47 = vsel %vm5954_vm11, %v5787_v29, %v2134_v25  ;;  %v2142_v4 = vor.u32 1.1754944e-38, %v2141_v2  ;;  %v4294_v0 = vld [vmem:[#allocation2 + $0x298] sm:$0xf] }
 0x19e   :  { %v5925_v13 = vpop.f32.mrf.mxu1  ;;  %v5966_v61 = vadd.f32 1.0, %v5037_v15  ;;  %v5971_v9 = vmul.f32 %v2038_v43, %v5504_v22  ;;  %vm2150_vm12 = vweird.f32 %v5756_v34  ;;  %v2191_v18 = vmul.f32 %v5918_v46, %v5829_v14  ;;  %v4008_v15 = vld [vmem:[#allocation2 + $0x78] sm:$0xf0] }
 0x19f   :  { %1443 = vmatmul.bf16.gmra.mxu2 %v5486_v56  ;;  %v5968_v16 = vpop.eup %5040  ;;  %v5976_v30 = vadd.f32 1.0, %v5039_v37  ;;  %v5979_v29 = vmul.f32 %v2083_v55, %v5506_v24  ;;  %v2098_v25 = vsel %vm5895_vm5, %v2097_v6, %v2093_v48  ;;  %v5983_v2 = vor.u32 1.1754944e-38, %v2156_v12  ;;  %v4264_v6 = vld [vmem:[#allocation2 + $0x278] sm:$0xf0] }
 0x1a0   :  { %8640 = vst [vmem:[#allocation78_spill] sm:$0xff] %v5971_v9  ;;  %v2201_v22 = vand.u32 2147483648, %v5829_v14  ;;  %v2143_v45 = vsel %vm5929_vm9, %v2142_v4, %v2138_v47  ;;  %v5991_v37 = vadd.f32 %v5835_v1, %v2148_v36  ;;  %vm2151_vm13 = vweird.f32 %v5835_v1  ;;  %v4006_v36 = vld [vmem:[#allocation2 + $0x58] sm:$0xf] }
 0x1a1   :  { %1492 = vmatmul.bf16.gmra.mxu3 %v5488_v57  ;;  %8641 = vst [vmem:[#allocation79_spill] sm:$0xff] %v5979_v29  ;;  %v5986_v43 = vpop.eup %5042  ;;  %vm5994_vm14 = vcmp.eq.f32.partialorder %v2154_v7, 8.507059e+37  ;;  %v4039_v55 = vor.u32 %v4819_v53, %v4038_v38  ;;  %1345 = vmatmul.bf16.gmra.mxu0 %v5486_v56  ;;  %v2206_v48 = vmul.f32 %v5968_v16, %v5874_v5  ;;  %5048 = vrcp.f32 %v5966_v61  ;;  %v4811_v47 = vld [vmem:[#allocation2 + $0x74] sm:$0xf0]  ;;  %vm6036_vm0 = vmor %vm2150_vm12, %vm2151_vm13 }
 0x1a2   :  { %v5999_v33 = vpop.f32.mrf.mxu2  ;;  %v6003_v23 = vpop.eup %5044  ;;  %v4489_v7 = vmul.f32 -1.442695, %v5548_v17  ;;  %v4295_v28 = vor.u32 %v4883_v52, %v4294_v0  ;;  %1394 = vmatmul.bf16.gmra.mxu1 %v5488_v57  ;;  %v2192_v38 = vsub.f32 1.0, %v2191_v18  ;;  %5050 = vrcp.f32 %v5976_v30  ;;  %v4262_v52 = vld [vmem:[#allocation2 + $0x258] sm:$0xf] }
 0x1a3   :  { %v5047_v4 = vpop.eup %5046  ;;  %v4492_v53 = vmul.f32 -1.442695, %v5550_v20  ;;  %1503 = vmatpush.bf16.msrb.mxu0 %v4039_v55  ;;  %v4011_v3 = vor.u32 %v4807_v63, %v4008_v15  ;;  %v6013_v56 = vmul.f32 %v2098_v25, %v5512_v40  ;;  %v6016_v29 = vmul.f32 %v2143_v45, %v5514_v50  ;;  %v4875_v57 = vld [vmem:[#allocation2 + $0x274] sm:$0xf0] }
 0x1a4   :  { %v6001_v12 = vpop.f32.mrf.mxu3  ;;  %v6018_v17 = vor.u32 1.1754944e-38, %v2201_v22  ;;  %1552 = vmatpush.bf16.msrb.mxu1 %v4295_v28  ;;  %v4267_v0 = vor.u32 %v4871_v26, %v4264_v6  ;;  %v6020_v9 = vpop.f32.mrf.mxu0  ;;  %vm2195_vm15 = vweird.f32 %v5829_v14  ;;  %v2216_v63 = vand.u32 2147483648, %v5874_v5 }
 0x1a5   :  { %8644 = vst [vmem:[#allocation80_spill] sm:$0xff] %v6020_v9  ;;  %v2251_v40 = vmul.f32 %v5986_v43, %v5900_v21  ;;  %1602 = vmatpush.bf16.msrb.mxu2 %v4011_v3  ;;  %v6030_v50 = vadd.f32 %v5813_v32, %v5811_v42  ;;  %v4007_v25 = vor.u32 %v4811_v47, %v4006_v36  ;;  %v2207_v15 = vsub.f32 1.0, %v2206_v48  ;;  %v4799_v3 = vld [vmem:[#allocation2 + $0x1c] sm:$0xf] }
 0x1a6   :  { %v6022_v18 = vpop.f32.mrf.mxu1  ;;  %v2266_v45 = vmul.f32 %v6003_v23, %v5913_v35  ;;  %v6042_v55 = vadd.f32 1.0, %v5047_v4  ;;  %5052 = vpow2.f32 %v4489_v7  ;;  %1651 = vmatpush.bf16.msrb.mxu3 %v4267_v0  ;;  %v3976_v42 = vld [vmem:[#allocation2 + $0x38] sm:$0xf0]  ;;  %v2153_v32 = vsel %vm6036_vm0, %v5835_v1, %v5991_v37 }
 0x1a7   :  { %8645 = vst [vmem:[#allocation81_spill] sm:$0xff] %v6022_v18  ;;  %v2193_v34 = vmul.f32 %v5918_v46, %v2192_v38  ;;  %5054 = vpow2.f32 %v4492_v53  ;;  %1504 = vmatpush.bf16.msrb.mxu0 %v4007_v25  ;;  %v4263_v26 = vor.u32 %v4875_v57, %v4262_v52  ;;  %v6049_v6 = vpop.eup %5048  ;;  %vm2210_vm1 = vweird.f32 %v5874_v5 }
 0x1a8   :  { %8646 = vst [vmem:[#allocation82_spill] sm:$0xff] %v6030_v50  ;;  %v2214_v48 = vand.u32 2147483647, %v5874_v5  ;;  %v2261_v7 = vand.u32 2147483648, %v5900_v21  ;;  %v6056_v28 = vadd.f32 %v5904_v39, %v5902_v27  ;;  %v6060_v1 = vadd.f32 %v5925_v13, %v5923_v59  ;;  %v6062_v37 = vpop.eup %5050  ;;  %v4867_v50 = vld [vmem:[#allocation2 + $0x234] sm:$0xf0] }
 0x1a9   :  { %vm2196_vm2 = vweird.f32 %v5918_v46  ;;  %v8651_v57 = vand.u32 2147483647, %v5829_v14  ;;  %v2252_v47 = vsub.f32 1.0, %v2251_v40  ;;  %v6073_v4 = vadd.f32 %v5546_v11, %v5544_v8  ;;  %1553 = vmatpush.bf16.msrb.mxu1 %v4263_v26 }
 0x1aa   :  { %8649 = vst [vmem:[#allocation83_spill] sm:$0xff] %v6056_v28  ;;  %v3979_v27 = vor.u32 %v4799_v3, %v3976_v42  ;;  %v2158_v39 = vsel %vm5994_vm14, %v5983_v2, %v2153_v32  ;;  %v2208_v59 = vmul.f32 %v5968_v16, %v2207_v15  ;;  %v2267_v13 = vsub.f32 1.0, %v2266_v45  ;;  %v6086_v11 = vpop.f32.mrf.mxu2  ;;  %v4863_v42 = vld [vmem:[#allocation2 + $0x21c] sm:$0xf]  ;;  %vm6110_vm7 = vmor %vm2195_vm15, %vm2196_vm2  ;;  %v4230_v28 = vld [vmem:[#allocation2 + $0x218] sm:$0xf] }
 0x1ab   :  { %8650 = vst [vmem:[#allocation84_spill] sm:$0xff] %v6060_v1  ;;  %vm6067_vm3 = vcmp.eq.f32.partialorder %v8651_v57, 8.507059e+37  ;;  %5056 = vrcp.f32 %v6042_v55  ;;  %v2194_v38 = vadd.f32 %v5918_v46, %v2193_v34  ;;  %v6081_v53 = vor.u32 1.1754944e-38, %v2216_v63  ;;  %v4232_v32 = vld [vmem:[#allocation2 + $0x238] sm:$0xf0] }
 0x1ac   :  { %8654 = vst [vmem:[#allocation85_spill] sm:$0xff] %v6073_v4  ;;  %v2259_v0 = vand.u32 2147483647, %v5900_v21  ;;  %v2311_v8 = vmul.f32 %v6049_v6, %v5966_v61  ;;  %1603 = vmatpush.bf16.msrb.mxu2 %v3979_v27  ;;  %v6088_v52 = vpop.f32.mrf.mxu3  ;;  %v5053_v2 = vpop.eup %5052  ;;  %vm2255_vm4 = vweird.f32 %v5900_v21  ;;  %v6091_v24 = vor.u32 1.1754944e-38, %v2261_v7 }
 0x1ad   :  { %v2326_v40 = vmul.f32 %v6062_v37, %v5976_v30  ;;  %v4493_v63 = vmul.f32 -1.442695, %v5552_v41  ;;  %v5055_v25 = vpop.eup %5054  ;;  %v6097_v22 = vmul.f32 %v2158_v39, %v5516_v58  ;;  %vm2211_vm5 = vweird.f32 %v5968_v16  ;;  %v6118_v7 = vpop.f32.mrf.mxu0 }
 0x1ae   :  { %vm6100_vm6 = vcmp.eq.f32.partialorder %v2214_v48, 8.507059e+37  ;;  %v2253_v45 = vmul.f32 %v5986_v43, %v2252_v47  ;;  %v4496_v3 = vmul.f32 -1.442695, %v6073_v4  ;;  %v2209_v58 = vadd.f32 %v5968_v16, %v2208_v59  ;;  %v6120_v57 = vpop.f32.mrf.mxu1  ;;  %vm6141_vm10 = vmor %vm2210_vm1, %vm2211_vm5 }
 0x1af   :  { %v2268_v26 = vmul.f32 %v6003_v23, %v2267_v13  ;;  %vm2270_vm8 = vweird.f32 %v5913_v35  ;;  %v2274_v48 = vand.u32 2147483647, %v5913_v35  ;;  %1604 = vmatmul.bf16.vlgmr.msrb.gmra.mxu2 %v5346_v44  ;;  %v2198_v14 = vsel %vm6110_vm7, %v5918_v46, %v2194_v38 }
 0x1b0   :  { %vm6126_vm9 = vcmp.eq.f32.partialorder %v2259_v0, 8.507059e+37  ;;  %v2276_v27 = vand.u32 2147483648, %v5913_v35  ;;  %v2312_v39 = vsub.f32 1.0, %v2311_v8  ;;  %v6131_v59 = vadd.f32 1.0, %v5053_v2 }
 0x1b1   :  { %v6133_v13 = vpop.eup %5056  ;;  %v2327_v18 = vsub.f32 1.0, %v2326_v40  ;;  %v6135_v9 = vadd.f32 1.0, %v5055_v25  ;;  %5058 = vpow2.f32 %v4493_v63  ;;  %v4235_v1 = vor.u32 %v4863_v42, %v4232_v32 }
 0x1b2   :  { %v2254_v38 = vadd.f32 %v5986_v43, %v2253_v45  ;;  %vm2256_vm11 = vweird.f32 %v5986_v43  ;;  %vm2315_vm12 = vweird.f32 %v5966_v61  ;;  %5060 = vpow2.f32 %v4496_v3  ;;  %v6161_v36 = vpop.f32.mrf.mxu2 }
 0x1b3   :  { %v2203_v0 = vsel %vm6067_vm3, %v6018_v17, %v2198_v14  ;;  %v2213_v8 = vsel %vm6141_vm10, %v5968_v16, %v2209_v58  ;;  %v2269_v5 = vadd.f32 %v6003_v23, %v2268_v26  ;;  %vm2271_vm13 = vweird.f32 %v6003_v23  ;;  %1652 = vmatpush.bf16.msrb.mxu3 %v4235_v1  ;;  %vm6167_vm14 = vmor %vm2255_vm4, %vm2256_vm11 }
 0x1b4   :  { %v2313_v2 = vmul.f32 %v6049_v6, %v2312_v39  ;;  %v2371_v40 = vmul.f32 %v6133_v13, %v6042_v55  ;;  %5062 = vrcp.f32 %v6131_v59  ;;  %v4497_v63 = vmul.f32 -1.442695, %v5558_v51  ;;  %v6163_v17 = vpop.f32.mrf.mxu3  ;;  %vm6193_vm0 = vmor %vm2270_vm8, %vm2271_vm13 }
 0x1b5   :  { %v2319_v1 = vand.u32 2147483647, %v5966_v61  ;;  %v2321_v25 = vand.u32 2147483648, %v5966_v61  ;;  %v2328_v45 = vmul.f32 %v6062_v37, %v2327_v18  ;;  %5064 = vrcp.f32 %v6135_v9  ;;  %v6200_v26 = vpop.f32.mrf.mxu0  ;;  %v3974_v61 = vld [vmem:[#allocation2 + $0x18] sm:$0xf] }
 0x1b6   :  { %v6176_v3 = vmul.f32 %v2203_v0, %v5519_v60  ;;  %v2258_v42 = vsel %vm6167_vm14, %v5986_v43, %v2254_v38  ;;  %vm6181_vm15 = vcmp.eq.f32.partialorder %v2274_v48, 8.507059e+37  ;;  %v2277_v32 = vor.u32 1.1754944e-38, %v2276_v27  ;;  %1653 = vmatmul.bf16.vlgmr.msrb.gmra.mxu3 %v5348_v49  ;;  %v6202_v48 = vpop.f32.mrf.mxu1 }
 0x1b7   :  { %v5059_v34 = vpop.eup %5058  ;;  %v2218_v18 = vsel %vm6100_vm6, %v6081_v53, %v2213_v8  ;;  %vm2316_vm1 = vweird.f32 %v6049_v6  ;;  %v2334_v43 = vand.u32 2147483647, %v5976_v30  ;;  %v2336_v58 = vand.u32 2147483648, %v5976_v30 }
 0x1b8   :  { %v5061_v15 = vpop.eup %5060  ;;  %v2273_v53 = vsel %vm6193_vm0, %v6003_v23, %v2269_v5  ;;  %v2314_v35 = vadd.f32 %v6049_v6, %v2313_v2  ;;  %v2372_v14 = vsub.f32 1.0, %v2371_v40  ;;  %5066 = vpow2.f32 %v4497_v63  ;;  %vm6234_vm5 = vmor %vm2315_vm12, %vm2316_vm1 }
 0x1b9   :  { %v2263_v27 = vsel %vm6126_vm9, %v6091_v24, %v2258_v42  ;;  %v2329_v39 = vadd.f32 %v6062_v37, %v2328_v45  ;;  %vm2331_vm2 = vweird.f32 %v6062_v37  ;;  %v4500_v46 = vmul.f32 -1.442695, %v5562_v62 }
 0x1ba   :  { %v6214_v38 = vpop.eup %5062  ;;  %vm6216_vm3 = vcmp.eq.f32.partialorder %v2319_v1, 8.507059e+37  ;;  %v2322_v23 = vor.u32 1.1754944e-38, %v2321_v25  ;;  %vm2330_vm4 = vweird.f32 %v5976_v30  ;;  %v6221_v8 = vadd.f32 1.0, %v5059_v34  ;;  %v6257_v25 = vpop.f32.mrf.mxu2 }
 0x1bb   :  { %v6223_v5 = vpop.eup %5064  ;;  %v6226_v24 = vmul.f32 %v2218_v18, %v5524_v10  ;;  %v2278_v47 = vsel %vm6181_vm15, %v2277_v32, %v2273_v53  ;;  %vm6238_vm6 = vcmp.eq.f32.partialorder %v2334_v43, 8.507059e+37  ;;  %v6242_v40 = vadd.f32 1.0, %v5061_v15  ;;  %vm6252_vm7 = vmor %vm2330_vm4, %vm2331_vm2  ;;  %v8677_v32 = vld [vmem:[#allocation22_spill] sm:$0xff]  ;;  %v8678_v15 = vld [vmem:[#allocation8_spill] sm:$0xff] }
 0x1bc   :  { %v6245_v10 = vmul.f32 %v2263_v27, %v5526_v19  ;;  %v2318_v63 = vsel %vm6234_vm5, %v6049_v6, %v2314_v35  ;;  %v2337_v16 = vor.u32 1.1754944e-38, %v2336_v58  ;;  %v2373_v1 = vmul.f32 %v6133_v13, %v2372_v14  ;;  %v6259_v45 = vpop.f32.mrf.mxu3 }
 0x1bd   :  { %v2333_v19 = vsel %vm6252_vm7, %v6062_v37, %v2329_v39  ;;  %v2379_v42 = vand.u32 2147483647, %v6042_v55  ;;  %v2381_v6 = vand.u32 2147483648, %v6042_v55  ;;  %5068 = vpow2.f32 %v4500_v46 }
 0x1be   :  { %v5067_v21 = vpop.eup %5066  ;;  %v6267_v34 = vmul.f32 %v2278_v47, %v8677_v32  ;;  %v2386_v18 = vmul.f32 %v6214_v38, %v6131_v59  ;;  %v2431_v60 = vmul.f32 %v6223_v5, %v6135_v9  ;;  %5070 = vrcp.f32 %v6221_v8  ;;  %v6279_v43 = vpop.f32.mrf.mxu0 }
 0x1bf   :  { %v2323_v37 = vsel %vm6216_vm3, %v2322_v23, %v2318_v63  ;;  %vm2375_vm8 = vweird.f32 %v6042_v55  ;;  %vm2376_vm9 = vweird.f32 %v6133_v13  ;;  %5072 = vrcp.f32 %v6242_v40  ;;  %v6281_v58 = vpop.f32.mrf.mxu1  ;;  %1609 = vmatmul.bf16.gmra.mxu2 %v8678_v15 }
 0x1c0   :  { %v2338_v53 = vsel %vm6238_vm6, %v2337_v16, %v2333_v19  ;;  %v2374_v35 = vadd.f32 %v6133_v13, %v2373_v1  ;;  %v2396_v14 = vand.u32 2147483648, %v6131_v59  ;;  %v2441_v27 = vand.u32 2147483648, %v6135_v9  ;;  %vm6296_vm11 = vmor %vm2375_vm8, %vm2376_vm9  ;;  %v8683_v19 = vld [vmem:[#allocation23_spill] sm:$0xff] }
 0x1c1   :  { %vm6289_vm10 = vcmp.eq.f32.partialorder %v2379_v42, 8.507059e+37  ;;  %v2382_v39 = vor.u32 1.1754944e-38, %v2381_v6  ;;  %v2394_v46 = vand.u32 2147483647, %v6131_v59  ;;  %v6294_v0 = vadd.f32 1.0, %v5067_v21  ;;  %v8685_v6 = vld [vmem:[#allocation28_spill] sm:$0xff] }
 0x1c2   :  { %v2387_v47 = vsub.f32 1.0, %v2386_v18  ;;  %v2432_v2 = vsub.f32 1.0, %v2431_v60  ;;  %v2456_v30 = vand.u32 2147483648, %v6221_v8  ;;  %v2501_v63 = vand.u32 2147483648, %v6242_v40  ;;  %v8686_v21 = vld [vmem:[#allocation31_spill] sm:$0xff] }
 0x1c3   :  { %v5069_v16 = vpop.eup %5068  ;;  %v6303_v1 = vmul.f32 %v2323_v37, %v5534_v31  ;;  %v6306_v42 = vmul.f32 %v2338_v53, %v8683_v19  ;;  %v6310_v32 = vadd.f32 %v8686_v21, %v8685_v6  ;;  %v6314_v18 = vadd.f32 %v6001_v12, %v5999_v33  ;;  %v4803_v60 = vld [vmem:[#allocation2 + $0x34] sm:$0xf0]  ;;  %v6326_v6 = vpop.f32.mrf.mxu2 }
 0x1c4   :  { %v6316_v62 = vpop.eup %5070  ;;  %v2378_v31 = vsel %vm6296_vm11, %v6133_v13, %v2374_v35  ;;  %v6321_v37 = vor.u32 1.1754944e-38, %v2396_v14  ;;  %v2439_v53 = vand.u32 2147483647, %v6135_v9  ;;  %v6324_v19 = vor.u32 1.1754944e-38, %v2441_v27  ;;  %v6328_v21 = vpop.f32.mrf.mxu3  ;;  %v8689_v13 = vld [vmem:[#allocation30_spill] sm:$0xff] }
 0x1c5   :  { %8684 = vst [vmem:[#allocation22_spill] sm:$0xff] %v6306_v42  ;;  %v6330_v33 = vpop.eup %5072  ;;  %vm2390_vm12 = vweird.f32 %v6131_v59  ;;  %vm2391_vm13 = vweird.f32 %v6214_v38  ;;  %5074 = vrcp.f32 %v6294_v0  ;;  %v4501_v35 = vmul.f32 -1.442695, %v8689_v13  ;;  %v8690_v42 = vld [vmem:[#allocation9_spill] sm:$0xff]  ;;  %v4939_v12 = vld [vmem:[#allocation4 + $0x74] sm:$0xf0] }
 0x1c6   :  { %8687 = vst [vmem:[#allocation8_spill] sm:$0xff] %v6310_v32  ;;  %v2388_v14 = vmul.f32 %v6214_v38, %v2387_v47  ;;  %vm2435_vm14 = vweird.f32 %v6135_v9  ;;  %v6339_v27 = vor.u32 1.1754944e-38, %v2456_v30  ;;  %v3975_v23 = vor.u32 %v4803_v60, %v3974_v61  ;;  %1658 = vmatmul.bf16.gmra.mxu3 %v8690_v42  ;;  %v6348_v13 = vpop.f32.mrf.mxu0  ;;  %v4710_v61 = vld [vmem:[#allocation4 + $0x170] sm:$0xf]  ;;  %v8692_v60 = vld [vmem:[#allocation24_spill] sm:$0xff]  ;;  %vm6407_vm2 = vmor %vm2390_vm12, %vm2391_vm13 }
 0x1c7   :  { %8688 = vst [vmem:[#allocation23_spill] sm:$0xff] %v6314_v18  ;;  %v4231_v18 = vor.u32 %v4867_v50, %v4230_v28  ;;  %v2383_v51 = vsel %vm6289_vm10, %v2382_v39, %v2378_v31  ;;  %v2433_v4 = vmul.f32 %v6223_v5, %v2432_v2  ;;  %v6346_v41 = vor.u32 1.1754944e-38, %v2501_v63  ;;  %v6350_v47 = vpop.f32.mrf.mxu1  ;;  %v4953_v59 = vld [vmem:[#allocation4 + $0xe4] sm:$0xf0] }
 0x1c8   :  { %v2446_v30 = vmul.f32 %v6316_v62, %v6221_v8  ;;  %v6356_v50 = vmul.f32 %v6330_v33, %v6242_v40  ;;  %v6358_v28 = vadd.f32 1.0, %v5069_v16  ;;  %1505 = vmatpush.bf16.msrb.mxu0 %v3975_v23  ;;  %v6362_v55 = vadd.f32 %v6088_v52, %v6086_v11  ;;  %v4971_v52 = vld [vmem:[#allocation4 + $0x174] sm:$0xf0] }
 0x1c9   :  { %1554 = vmatpush.bf16.msrb.mxu1 %v4231_v18  ;;  %5076 = vpow2.f32 %v4501_v35  ;;  %v4504_v39 = vmul.f32 -1.442695, %v6310_v32  ;;  %v1361_v2 = vadd.f32 %v6120_v57, %v6118_v7  ;;  %v1459_v63 = vadd.f32 %v6163_v17, %v6161_v36  ;;  %v4774_v18 = vld [vmem:[#allocation4 + $0x1f0] sm:$0xf]  ;;  %v4987_v35 = vld [vmem:[#allocation4 + $0x1f4] sm:$0xf0] }
 0x1ca   :  { %8691 = vst [vmem:[#allocation28_spill] sm:$0xff] %v6362_v55  ;;  %v6370_v31 = vmul.f32 %v2383_v51, %v8692_v60  ;;  %v6373_v16 = vadd.f32 %v6214_v38, %v2388_v14  ;;  %vm2436_vm15 = vweird.f32 %v6223_v5  ;;  %v1363_v11 = vadd.f32 %v6202_v48, %v6200_v26  ;;  %v8697_v17 = vld [vmem:[#allocation74_spill] sm:$0xff]  ;;  %v8698_v48 = vld [vmem:[#allocation77_spill] sm:$0xff]  ;;  %v4638_v57 = vld [vmem:[#allocation4 + $0xe0] sm:$0xf] }
 0x1cb   :  { %v6378_v23 = vpop.eup %5074  ;;  %vm6380_vm0 = vcmp.eq.f32.partialorder %v2394_v46, 8.507059e+37  ;;  %v6385_v51 = vadd.f32 %v6223_v5, %v2433_v4  ;;  %vm6387_vm1 = vcmp.eq.f32.partialorder %v2439_v53, 8.507059e+37  ;;  %v2516_v36 = vand.u32 2147483648, %v6294_v0  ;;  %1506 = vmatmul.bf16.vlgmr.msrb.gmra.mxu0 %v5346_v44  ;;  %v4582_v60 = vld [vmem:[#allocation4 + $0x70] sm:$0xf]  ;;  %v1416_v55 = vpop.f32.mrf.mxu2  ;;  %vm6422_vm3 = vmor %vm2435_vm14, %vm2436_vm15 }
 0x1cc   :  { %v2974_v26 = vmul.f32 %v8697_v17, %v1361_v2  ;;  %1555 = vmatmul.bf16.vlgmr.msrb.gmra.mxu1 %v5348_v49  ;;  %v2975_v46 = vmul.f32 %v8698_v48, %v1459_v63  ;;  %v2447_v14 = vsub.f32 1.0, %v2446_v30  ;;  %5078 = vrcp.f32 %v6358_v28  ;;  %v1465_v32 = vpop.f32.mrf.mxu3  ;;  %v8702_v30 = vld [vmem:[#allocation78_spill] sm:$0xff]  ;;  %v4937_v7 = vld [vmem:[#allocation4 + $0x64] sm:$0xf0] }
 0x1cd   :  { %v2978_v4 = vmul.f32 %v5961_v54, %v1363_v11  ;;  %v1461_v53 = vadd.f32 %v6259_v45, %v6257_v25  ;;  %v2492_v2 = vsub.f32 1.0, %v6356_v50  ;;  %v1366_v44 = vadd.f32 %v6281_v58, %v6279_v43  ;;  %v4646_v43 = vld [vmem:[#allocation4 + $0xf0] sm:$0xf]  ;;  %v4955_v58 = vld [vmem:[#allocation4 + $0xf4] sm:$0xf0] }
 0x1ce   :  { %v4711_v49 = vor.u32 %v4971_v52, %v4710_v61  ;;  %v4775_v17 = vor.u32 %v4987_v35, %v4774_v18  ;;  %v6413_v25 = vmul.f32 %v6378_v23, %v6294_v0  ;;  %5080 = vpow2.f32 %v4504_v39  ;;  %v8705_v11 = vld [vmem:[#allocation79_spill] sm:$0xff]  ;;  %v1321_v35 = vpop.f32.mrf.mxu0 }
 0x1cf   :  { %v6415_v45 = vpack.c.bf16 %v2978_v4, %v2974_v26  ;;  %v2979_v50 = vmul.f32 %v8702_v30, %v1461_v53  ;;  %v5077_v63 = vpop.eup %5076  ;;  %v2514_v61 = vand.u32 2147483647, %v6294_v0  ;;  %v6428_v52 = vmul.f32 %v8705_v11, %v1366_v44  ;;  %v1370_v26 = vpop.f32.mrf.mxu1  ;;  %v8706_v53 = vld [vmem:[#allocation34_spill] sm:$0xff]  ;;  %v8709_v30 = vld [vmem:[#allocation35_spill] sm:$0xff]  ;;  %v8710_v11 = vld [vmem:[#allocation32_spill] sm:$0xff] }
 0x1d0   :  { %3552 = vmatpush.bf16.msra.mxu2 %v4711_v49  ;;  %3601 = vmatpush.bf16.msra.mxu3 %v4775_v17  ;;  %v1464_v39 = vadd.f32 %v6328_v21, %v6326_v6  ;;  %v4583_v18 = vor.u32 %v4939_v12, %v4582_v60  ;;  %v2393_v9 = vsel %vm6407_vm2, %v6214_v38, %v6373_v16  ;;  %v4505_v44 = vmul.f32 -1.442695, %v8706_v53  ;;  %v8707_v49 = vld [vmem:[#allocation10_spill] sm:$0xff]  ;;  %v4702_v6 = vld [vmem:[#allocation4 + $0x160] sm:$0xf] }
 0x1d1   :  { %8701 = vst [vmem:[#allocation31_spill] sm:$0xff] %v6415_v45  ;;  %v2438_v48 = vsel %vm6422_vm3, %v6223_v5, %v6385_v51  ;;  %v2448_v4 = vmul.f32 %v6316_v62, %v2447_v14  ;;  %1614 = vmatmul.bf16.gmra.mxu2 %v8707_v49  ;;  %v4969_v21 = vld [vmem:[#allocation4 + $0x164] sm:$0xf0]  ;;  %v6443_v12 = vpack.c.bf16 %v2979_v50, %v2975_v46  ;;  %v6451_v51 = vor.u32 1.1754944e-38, %v2516_v36 }
 0x1d2   :  { %v2983_v60 = vmul.f32 %v6013_v56, %v1464_v39  ;;  %3454 = vmatpush.bf16.msra.mxu0 %v4583_v18  ;;  %v4647_v17 = vor.u32 %v4955_v58, %v4646_v43  ;;  %v1368_v38 = vadd.f32 %v6350_v47, %v6348_v13  ;;  %v6448_v16 = vpop.eup %5078  ;;  %v2493_v5 = vmul.f32 %v6330_v33, %v2492_v2  ;;  %v8711_v39 = vld [vmem:[#allocation33_spill] sm:$0xff] }
 0x1d3   :  { %8708 = vst [vmem:[#allocation9_spill] sm:$0xff] %v6443_v12  ;;  %v6453_v14 = vadd.f32 1.0, %v5077_v63  ;;  %v1466_v54 = vadd.f32 %v1465_v32, %v1416_v55  ;;  %vm2450_vm4 = vweird.f32 %v6221_v8  ;;  %v2507_v46 = vsub.f32 1.0, %v6413_v25  ;;  %v4766_v32 = vld [vmem:[#allocation4 + $0x1e0] sm:$0xf]  ;;  %v1419_v36 = vpop.f32.mrf.mxu2 }
 0x1d4   :  { %v4508_v56 = vmul.f32 -1.442695, %v8709_v30  ;;  %3503 = vmatpush.bf16.msra.mxu1 %v4647_v17  ;;  %v1371_v50 = vadd.f32 %v1370_v26, %v1321_v35  ;;  %v4703_v43 = vor.u32 %v4969_v21, %v4702_v6  ;;  %v5081_v58 = vpop.eup %5080  ;;  %v2398_v13 = vsel %vm6380_vm0, %v6321_v37, %v2393_v9  ;;  %v4985_v55 = vld [vmem:[#allocation4 + $0x1e4] sm:$0xf0]  ;;  %v1468_v2 = vpop.f32.mrf.mxu3  ;;  %v4574_v25 = vld [vmem:[#allocation4 + $0x60] sm:$0xf] }
 0x1d5   :  { %v2443_v47 = vsel %vm6387_vm1, %v6324_v19, %v2438_v48  ;;  %vm2451_vm5 = vweird.f32 %v6316_v62  ;;  %vm2495_vm6 = vweird.f32 %v6242_v40  ;;  %vm2496_vm7 = vweird.f32 %v6330_v33  ;;  %v8712_v9 = vld [vmem:[#allocation11_spill] sm:$0xff] }
 0x1d6   :  { %v6468_v63 = vadd.f32 %v6316_v62, %v2448_v4  ;;  %v6472_v37 = vmul.f32 %v6448_v16, %v6358_v28  ;;  %5082 = vpow2.f32 %v4505_v44  ;;  %v2986_v19 = vmul.f32 %v6016_v29, %v1368_v38  ;;  %3553 = vmatpush.bf16.msra.mxu2 %v4703_v43  ;;  %1663 = vmatmul.bf16.gmra.mxu3 %v8712_v9  ;;  %v1323_v6 = vpop.f32.mrf.mxu0  ;;  %v8719_v43 = vld [vmem:[#allocation36_spill] sm:$0xff]  ;;  %vm6534_vm12 = vmor %vm2450_vm4, %vm2451_vm5 }
 0x1d7   :  { %vm2510_vm8 = vweird.f32 %v6294_v0  ;;  %5084 = vrcp.f32 %v6453_v14  ;;  %v6479_v18 = vadd.f32 %v8711_v39, %v8710_v11  ;;  %v2987_v35 = vmul.f32 %v6097_v22, %v1466_v54  ;;  %v1372_v21 = vpop.f32.mrf.mxu1  ;;  %vm6549_vm14 = vmor %vm2495_vm6, %vm2496_vm7 }
 0x1d8   :  { %v2990_v26 = vmul.f32 %v6176_v3, %v1371_v50  ;;  %v6485_v29 = vadd.f32 %v6330_v33, %v2493_v5  ;;  %v2508_v48 = vmul.f32 %v6378_v23, %v2507_v46  ;;  %v2559_v4 = vand.u32 2147483647, %v6358_v28 }
 0x1d9   :  { %v6489_v44 = vadd.f32 1.0, %v5081_v58  ;;  %v8713_v17 = vand.u32 2147483647, %v6221_v8  ;;  %v4767_v22 = vor.u32 %v4985_v55, %v4766_v32  ;;  %v1469_v3 = vadd.f32 %v1468_v2, %v1419_v36 }
 0x1da   :  { %v4575_v54 = vor.u32 %v4937_v7, %v4574_v25  ;;  %v4639_v50 = vor.u32 %v4953_v59, %v4638_v57  ;;  %v8716_v5 = vand.u32 2147483647, %v6242_v40  ;;  %v4509_v58 = vmul.f32 -1.442695, %v8719_v43  ;;  %v4758_v7 = vld [vmem:[#allocation4 + $0x1d0] sm:$0xf] }
 0x1db   :  { %vm6493_vm9 = vcmp.eq.f32.partialorder %v8713_v17, 8.507059e+37  ;;  %v1373_v11 = vadd.f32 %v1372_v21, %v1323_v6  ;;  %v6505_v39 = vpack.c.bf16 %v2986_v19, %v6428_v52  ;;  %v6507_v17 = vpack.c.bf16 %v2987_v35, %v2983_v60  ;;  %3602 = vmatpush.bf16.msra.mxu3 %v4767_v22  ;;  %v8722_v52 = vld [vmem:[#allocation25_spill] sm:$0xff]  ;;  %1511 = vmatmul.bf16.gmra.mxu0 %v8678_v15  ;;  %v8725_v15 = vld [vmem:[#allocation39_spill] sm:$0xff]  ;;  %v4566_v35 = vld [vmem:[#allocation4 + $0x50] sm:$0xf] }
 0x1dc   :  { %vm6499_vm10 = vcmp.eq.f32.partialorder %v8716_v5, 8.507059e+37  ;;  %vm6511_vm11 = vcmp.eq.f32.partialorder %v2514_v61, 8.507059e+37  ;;  %v2552_v55 = vsub.f32 1.0, %v6472_v37  ;;  %5086 = vpow2.f32 %v4508_v56  ;;  %3455 = vmatpush.bf16.msra.mxu0 %v4575_v54  ;;  %v5083_v25 = vpop.eup %5082  ;;  %1560 = vmatmul.bf16.gmra.mxu1 %v8690_v42  ;;  %v4694_v56 = vld [vmem:[#allocation4 + $0x150] sm:$0xf] }
 0x1dd   :  { %v4512_v36 = vmul.f32 -1.442695, %v6479_v18  ;;  %v2991_v2 = vmul.f32 %v6226_v24, %v1469_v3  ;;  %v6519_v19 = vmul.f32 %v2398_v13, %v8722_v52  ;;  %v6522_v60 = vmul.f32 %v2443_v47, %v5550_v20  ;;  %v4967_v37 = vld [vmem:[#allocation4 + $0x154] sm:$0xf0]  ;;  %v6528_v24 = vpop.eup %5084  ;;  %3504 = vmatpush.bf16.msra.mxu1 %v4639_v50  ;;  %v1470_v47 = vpop.f32.mrf.mxu3  ;;  %v4630_v3 = vld [vmem:[#allocation4 + $0xd0] sm:$0xf] }
 0x1de   :  { %5088 = vrcp.f32 %v6489_v44  ;;  %v2994_v61 = vmul.f32 %v6245_v10, %v1373_v11  ;;  %v2509_v13 = vadd.f32 %v6378_v23, %v2508_v48  ;;  %vm2511_vm13 = vweird.f32 %v6378_v23  ;;  %v1421_v10 = vpop.f32.mrf.mxu2  ;;  %v4983_v59 = vld [vmem:[#allocation4 + $0x1d4] sm:$0xf0] }
 0x1df   :  { %v4513_v42 = vmul.f32 -1.442695, %v8725_v15  ;;  %v4695_v57 = vor.u32 %v4967_v37, %v4694_v56  ;;  %v2453_v8 = vsel %vm6534_vm12, %v6316_v62, %v6468_v63  ;;  %5090 = vpow2.f32 %v4509_v58  ;;  %v4935_v22 = vld [vmem:[#allocation4 + $0x54] sm:$0xf0]  ;;  %vm6565_vm15 = vmor %vm2510_vm8, %vm2511_vm13  ;;  %v1375_v11 = vpop.f32.mrf.mxu1  ;;  %v8731_v56 = vld [vmem:[#allocation12_spill] sm:$0xff] }
 0x1e0   :  { %v1471_v6 = vadd.f32 %v1470_v47, %v1421_v10  ;;  %v4759_v21 = vor.u32 %v4983_v59, %v4758_v7  ;;  %v2498_v54 = vsel %vm6549_vm14, %v6330_v33, %v6485_v29  ;;  %v6557_v50 = vadd.f32 1.0, %v5083_v25  ;;  %v4951_v63 = vld [vmem:[#allocation4 + $0xd4] sm:$0xf0]  ;;  %v1326_v29 = vpop.f32.mrf.mxu0 }
 0x1e1   :  { %3554 = vmatpush.bf16.msra.mxu2 %v4695_v57  ;;  %v4567_v62 = vor.u32 %v4935_v22, %v4566_v35  ;;  %v6559_v40 = vpack.c.bf16 %v2994_v61, %v2990_v26  ;;  %v2566_v58 = vmul.f32 %v6528_v24, %v6453_v14  ;;  %5092 = vpow2.f32 %v4512_v36 }
 0x1e2   :  { %v2995_v33 = vmul.f32 %v6267_v34, %v1471_v6  ;;  %3603 = vmatpush.bf16.msra.mxu3 %v4759_v21  ;;  %v4631_v25 = vor.u32 %v4951_v63, %v4630_v3  ;;  %v5087_v26 = vpop.eup %5086  ;;  %v2513_v52 = vsel %vm6565_vm15, %v6378_v23, %v2509_v13  ;;  %v2553_v0 = vmul.f32 %v6448_v16, %v2552_v55  ;;  %v8733_v55 = vld [vmem:[#allocation40_spill] sm:$0xff]  ;;  %v8739_v21 = vld [vmem:[#allocation27_spill] sm:$0xff] }
 0x1e3   :  { %8728 = vst [vmem:[#allocation24_spill] sm:$0xff] %v6559_v40  ;;  %5094 = vpow2.f32 %v4513_v42  ;;  %v1376_v61 = vadd.f32 %v1375_v11, %v1326_v29  ;;  %1619 = vmatmul.bf16.gmra.mxu2 %v8731_v56  ;;  %3456 = vmatpush.bf16.msra.mxu0 %v4567_v62  ;;  %v2458_v34 = vsel %vm6493_vm9, %v6339_v27, %v2453_v8  ;;  %vm2555_vm0 = vweird.f32 %v6358_v28  ;;  %v8736_v42 = vld [vmem:[#allocation26_spill] sm:$0xff]  ;;  %v8740_v62 = vld [vmem:[#allocation13_spill] sm:$0xff] }
 0x1e4   :  { %v6577_v37 = vpop.eup %5088  ;;  %v2561_v36 = vand.u32 2147483648, %v6358_v28  ;;  %3505 = vmatpush.bf16.msra.mxu1 %v4631_v25  ;;  %v6584_v7 = vpack.c.bf16 %v2995_v33, %v2991_v2  ;;  %v2503_v23 = vsel %vm6499_vm10, %v6346_v41, %v2498_v54  ;;  %5096 = vrcp.f32 %v6557_v50 }
 0x1e5   :  { %v4516_v20 = vmul.f32 -1.442695, %v8733_v55  ;;  %v6592_v13 = vmul.f32 %v6303_v1, %v1376_v61  ;;  %v5091_v38 = vpop.eup %5090  ;;  %v2518_v27 = vsel %vm6511_vm11, %v6451_v51, %v2513_v52  ;;  %vm6599_vm1 = vcmp.eq.f32.partialorder %v2559_v4, 8.507059e+37  ;;  %v1473_v47 = vpop.f32.mrf.mxu3  ;;  %v8737_v4 = vld [vmem:[#allocation85_spill] sm:$0xff] }
 0x1e6   :  { %8732 = vst [vmem:[#allocation74_spill] sm:$0xff] %v6584_v7  ;;  %v2567_v46 = vsub.f32 1.0, %v2566_v58  ;;  %v6603_v41 = vadd.f32 1.0, %v5087_v26  ;;  %v6606_v10 = vmul.f32 %v2458_v34, %v8736_v42  ;;  %v2554_v1 = vadd.f32 %v6448_v16, %v2553_v0  ;;  %v1424_v51 = vpop.f32.mrf.mxu2  ;;  %1668 = vmatmul.bf16.gmra.mxu3 %v8740_v62  ;;  %v8743_v58 = vld [vmem:[#allocation22_spill] sm:$0xff] }
 0x1e7   :  { %vm2556_vm2 = vweird.f32 %v6448_v16  ;;  %v2611_v32 = vmul.f32 %v6577_v37, %v6489_v44  ;;  %v5093_v57 = vpop.eup %5092  ;;  %v6613_v59 = vmul.f32 %v2503_v23, %v8737_v4  ;;  %v2562_v35 = vor.u32 1.1754944e-38, %v2561_v36  ;;  %v1377_v11 = vpop.f32.mrf.mxu1 }
 0x1e8   :  { %v2576_v8 = vand.u32 2147483648, %v6453_v14  ;;  %v1474_v48 = vadd.f32 %v1473_v47, %v1424_v51  ;;  %v6617_v22 = vmul.f32 %v2518_v27, %v8739_v21  ;;  %v2574_v3 = vand.u32 2147483647, %v6453_v14  ;;  %vm6627_vm3 = vmor %vm2555_vm0, %vm2556_vm2  ;;  %v1328_v29 = vpop.f32.mrf.mxu0  ;;  %v4686_v51 = vld [vmem:[#allocation4 + $0x140] sm:$0xf] }
 0x1e9   :  { %8738 = vst [vmem:[#allocation77_spill] sm:$0xff] %v6613_v59  ;;  %v5095_v6 = vpop.eup %5094  ;;  %v6620_v54 = vadd.f32 1.0, %v5091_v38  ;;  %5098 = vpow2.f32 %v4516_v20  ;;  %v2568_v5 = vmul.f32 %v6528_v24, %v2567_v46  ;;  %vm2570_vm4 = vweird.f32 %v6453_v14  ;;  %v4965_v47 = vld [vmem:[#allocation4 + $0x144] sm:$0xf0] }
 0x1ea   :  { %5100 = vrcp.f32 %v6603_v41  ;;  %v6635_v33 = vmul.f32 %v8743_v58, %v1474_v48  ;;  %v6637_v25 = vpop.eup %5096  ;;  %v2558_v28 = vsel %vm6627_vm3, %v6448_v16, %v2554_v1  ;;  %v2612_v26 = vsub.f32 1.0, %v2611_v32  ;;  %v8746_v16 = vld [vmem:[#allocation41_spill] sm:$0xff]  ;;  %v4622_v58 = vld [vmem:[#allocation4 + $0xc0] sm:$0xf] }
 0x1eb   :  { %v6642_v52 = vadd.f32 1.0, %v5093_v57  ;;  %v1378_v0 = vadd.f32 %v1377_v11, %v1328_v29  ;;  %v6644_v61 = vor.u32 1.1754944e-38, %v2576_v8  ;;  %v2619_v34 = vand.u32 2147483647, %v6489_v44  ;;  %1516 = vmatmul.bf16.gmra.mxu0 %v8707_v49  ;;  %v4750_v57 = vld [vmem:[#allocation4 + $0x1c0] sm:$0xf] }
 0x1ec   :  { %v2621_v36 = vand.u32 2147483648, %v6489_v44  ;;  %v6648_v23 = vadd.f32 1.0, %v5095_v6  ;;  %vm6650_vm5 = vcmp.eq.f32.partialorder %v2574_v3, 8.507059e+37  ;;  %v2636_v38 = vand.u32 2147483648, %v6557_v50  ;;  %1565 = vmatmul.bf16.gmra.mxu1 %v8712_v9  ;;  %v4981_v48 = vld [vmem:[#allocation4 + $0x1c4] sm:$0xf0] }
 0x1ed   :  { %5102 = vrcp.f32 %v6620_v54  ;;  %v4517_v27 = vmul.f32 -1.442695, %v8746_v16  ;;  %v3002_v46 = vmul.f32 %v6370_v31, %v1378_v0  ;;  %v2563_v42 = vsel %vm6599_vm1, %v2562_v35, %v2558_v28  ;;  %v1475_v35 = vpop.f32.mrf.mxu3  ;;  %v4558_v6 = vld [vmem:[#allocation4 + $0x40] sm:$0xf]  ;;  %v4933_v21 = vld [vmem:[#allocation4 + $0x44] sm:$0xf0] }
 0x1ee   :  { %v2569_v1 = vadd.f32 %v6528_v24, %v2568_v5  ;;  %vm2571_vm6 = vweird.f32 %v6528_v24  ;;  %vm2615_vm7 = vweird.f32 %v6489_v44  ;;  %v2626_v32 = vmul.f32 %v6637_v25, %v6557_v50  ;;  %v1426_v4 = vpop.f32.mrf.mxu2  ;;  %v4949_v29 = vld [vmem:[#allocation4 + $0xc4] sm:$0xf0] }
 0x1ef   :  { %v5099_v31 = vpop.eup %5098  ;;  %v2613_v2 = vmul.f32 %v6577_v37, %v2612_v26  ;;  %5104 = vrcp.f32 %v6642_v52  ;;  %v4687_v8 = vor.u32 %v4965_v47, %v4686_v51  ;;  %v6670_v3 = vpack.c.bf16 %v3002_v46, %v6592_v13  ;;  %v8748_v11 = vld [vmem:[#allocation29_spill] sm:$0xff]  ;;  %vm6683_vm8 = vmor %vm2570_vm4, %vm2571_vm6 }
 0x1f0   :  { %v6672_v49 = vpop.eup %5100  ;;  %5106 = vrcp.f32 %v6648_v23  ;;  %v1476_v9 = vadd.f32 %v1475_v35, %v1426_v4  ;;  %v4751_v63 = vor.u32 %v4981_v48, %v4750_v57  ;;  %v4559_v5 = vor.u32 %v4933_v21, %v4558_v6  ;;  %v1331_v4 = vpop.f32.mrf.mxu0  ;;  %v8753_v48 = vld [vmem:[#allocation14_spill] sm:$0xff]  ;;  %v8758_v20 = vld [vmem:[#allocation37_spill] sm:$0xff] }
 0x1f1   :  { %8747 = vst [vmem:[#allocation78_spill] sm:$0xff] %v6670_v3  ;;  %v6676_v28 = vmul.f32 %v2563_v42, %v8748_v11  ;;  %v2622_v26 = vor.u32 1.1754944e-38, %v2621_v36  ;;  %v2634_v0 = vand.u32 2147483647, %v6557_v50  ;;  %3555 = vmatpush.bf16.msra.mxu2 %v4687_v8  ;;  %v4623_v51 = vor.u32 %v4949_v29, %v4622_v58  ;;  %v1380_v35 = vpop.f32.mrf.mxu1 }
 0x1f2   :  { %vm6687_vm9 = vcmp.eq.f32.partialorder %v2619_v34, 8.507059e+37  ;;  %v2627_v47 = vsub.f32 1.0, %v2626_v32  ;;  %v2681_v42 = vand.u32 2147483648, %v6603_v41  ;;  %v6692_v36 = vadd.f32 1.0, %v5099_v31  ;;  %3604 = vmatpush.bf16.msra.mxu3 %v4751_v63  ;;  %3457 = vmatpush.bf16.msra.mxu0 %v4559_v5 }
 0x1f3   :  { %v3003_v57 = vmul.f32 %v6519_v19, %v1476_v9  ;;  %v6695_v14 = vpop.eup %5102  ;;  %v2573_v34 = vsel %vm6683_vm8, %v6528_v24, %v2569_v1  ;;  %v2671_v8 = vmul.f32 %v6672_v49, %v6603_v41  ;;  %5108 = vpow2.f32 %v4517_v27  ;;  %1624 = vmatmul.bf16.gmra.mxu2 %v8753_v48  ;;  %3506 = vmatpush.bf16.msra.mxu1 %v4623_v51 }
 0x1f4   :  { %v1381_v32 = vadd.f32 %v1380_v35, %v1331_v4  ;;  %v2614_v19 = vadd.f32 %v6577_v37, %v2613_v2  ;;  %vm2616_vm10 = vweird.f32 %v6577_v37  ;;  %vm2630_vm11 = vweird.f32 %v6557_v50 }
 0x1f5   :  { %v6706_v31 = vor.u32 1.1754944e-38, %v2636_v38  ;;  %v6709_v6 = vpack.c.bf16 %v3003_v57, %v6635_v33  ;;  %v6711_v24 = vpop.eup %5104  ;;  %v2679_v1 = vand.u32 2147483647, %v6603_v41  ;;  %v2696_v21 = vand.u32 2147483648, %v6620_v54  ;;  %vm6730_vm12 = vmor %vm2615_vm7, %vm2616_vm10  ;;  %v1478_v51 = vpop.f32.mrf.mxu3  ;;  %v8763_v57 = vld [vmem:[#allocation44_spill] sm:$0xff] }
 0x1f6   :  { %v6717_v9 = vmul.f32 %v6522_v60, %v1381_v32  ;;  %v6719_v2 = vpop.eup %5106  ;;  %v2578_v38 = vsel %vm6650_vm5, %v6644_v61, %v2573_v34  ;;  %v2628_v33 = vmul.f32 %v6637_v25, %v2627_v47  ;;  %v2686_v63 = vmul.f32 %v6695_v14, %v6620_v54  ;;  %v8759_v61 = vld [vmem:[#allocation38_spill] sm:$0xff]  ;;  %v1429_v11 = vpop.f32.mrf.mxu2 }
 0x1f7   :  { %8754 = vst [vmem:[#allocation79_spill] sm:$0xff] %v6709_v6  ;;  %5110 = vrcp.f32 %v6692_v36  ;;  %vm2631_vm13 = vweird.f32 %v6637_v25  ;;  %v2672_v60 = vsub.f32 1.0, %v2671_v8  ;;  %v6735_v58 = vor.u32 1.1754944e-38, %v2681_v42  ;;  %v8764_v34 = vld [vmem:[#allocation30_spill] sm:$0xff]  ;;  %v4947_v6 = vld [vmem:[#allocation4 + $0xb4] sm:$0xf0] }
 0x1f8   :  { %8755 = vst [vmem:[#allocation34_spill] sm:$0xff] %v6717_v9  ;;  %v6739_v29 = vadd.f32 %v8759_v61, %v8758_v20  ;;  %v2618_v13 = vsel %vm6730_vm12, %v6577_v37, %v2614_v19  ;;  %vm6744_vm14 = vcmp.eq.f32.partialorder %v2634_v0, 8.507059e+37  ;;  %v2741_v47 = vand.u32 2147483648, %v6642_v52  ;;  %v8765_v19 = vld [vmem:[#allocation15_spill] sm:$0xff]  ;;  %vm6789_vm3 = vmor %vm2630_vm11, %vm2631_vm13 }
 0x1f9   :  { %v4521_v4 = vmul.f32 -1.442695, %v8763_v57  ;;  %v1479_v42 = vadd.f32 %v1478_v51, %v1429_v11  ;;  %v5109_v35 = vpop.eup %5108  ;;  %v6751_v8 = vmul.f32 %v2578_v38, %v8764_v34  ;;  %vm2675_vm15 = vweird.f32 %v6603_v41  ;;  %1673 = vmatmul.bf16.gmra.mxu3 %v8765_v19  ;;  %v6768_v11 = vpop.f32.mrf.mxu0  ;;  %v8781_v41 = vld [vmem:[#allocation42_spill] sm:$0xff] }
 0x1fa   :  { %8760 = vst [vmem:[#allocation10_spill] sm:$0xff] %v6739_v29  ;;  %v6754_v32 = vor.u32 1.1754944e-38, %v2696_v21  ;;  %v2731_v37 = vmul.f32 %v6711_v24, %v6642_v52  ;;  %v6760_v0 = vmul.f32 %v6719_v2, %v6648_v23  ;;  %v2629_v5 = vadd.f32 %v6637_v25, %v2628_v33  ;;  %v6770_v21 = vpop.f32.mrf.mxu1 }
 0x1fb   :  { %v2687_v20 = vsub.f32 1.0, %v2686_v63  ;;  %v6766_v38 = vmul.f32 %v6606_v10, %v1479_v42  ;;  %8766 = vst [vmem:[#allocation35_spill] sm:$0xff] %v6768_v11  ;;  %v2623_v51 = vsel %vm6687_vm9, %v2622_v26, %v2618_v13  ;;  %v2673_v34 = vmul.f32 %v6672_v49, %v2672_v60  ;;  %1521 = vmatmul.bf16.gmra.mxu0 %v8731_v56 }
 0x1fc   :  { %8767 = vst [vmem:[#allocation32_spill] sm:$0xff] %v6770_v21  ;;  %vm2676_vm0 = vweird.f32 %v6672_v49  ;;  %v4520_v27 = vmul.f32 -1.442695, %v6739_v29  ;;  %vm2690_vm1 = vweird.f32 %v6620_v54  ;;  %vm2691_vm2 = vweird.f32 %v6695_v14  ;;  %1570 = vmatmul.bf16.gmra.mxu1 %v8740_v62 }
 0x1fd   :  { %v6777_v33 = vpop.eup %5110  ;;  %v6781_v10 = vor.u32 1.1754944e-38, %v2741_v47  ;;  %v6783_v63 = vadd.f32 1.0, %v5109_v35  ;;  %5112 = vpow2.f32 %v4521_v4  ;;  %vm6793_vm4 = vcmp.eq.f32.partialorder %v2679_v1, 8.507059e+37  ;;  %v8772_v47 = vld [vmem:[#allocation45_spill] sm:$0xff]  ;;  %v8773_v35 = vld [vmem:[#allocation46_spill] sm:$0xff]  ;;  %v8774_v4 = vld [vmem:[#allocation8_spill] sm:$0xff]  ;;  %v1480_v26 = vpop.f32.mrf.mxu3 }
 0x1fe   :  { %v2732_v60 = vsub.f32 1.0, %v2731_v37  ;;  %v2747_v13 = vsub.f32 1.0, %v6760_v0  ;;  %v4462_v42 = vmul.f32 -1.442695, %v8772_v47  ;;  %v4463_v61 = vmul.f32 -1.442695, %v8773_v35  ;;  %vm6830_vm8 = vmor %vm2675_vm15, %vm2676_vm0 }
 0x1ff   :  { %v6801_v29 = vmul.f32 %v2623_v51, %v8774_v4  ;;  %v2633_v50 = vsel %vm6789_vm3, %v6637_v25, %v2629_v5  ;;  %v2688_v9 = vmul.f32 %v6695_v14, %v2687_v20  ;;  %vm2736_vm5 = vweird.f32 %v6711_v24  ;;  %v4678_v1 = vld [vmem:[#allocation4 + $0x130] sm:$0xf]  ;;  %v4963_v37 = vld [vmem:[#allocation4 + $0x134] sm:$0xf0]  ;;  %v1431_v4 = vpop.f32.mrf.mxu2  ;;  %vm6857_vm10 = vmor %vm2690_vm1, %vm2691_vm2 }
 0x200   :  { %v4742_v0 = vld [vmem:[#allocation4 + $0x1b0] sm:$0xf]  ;;  %v2674_v59 = vadd.f32 %v6672_v49, %v2673_v34  ;;  %v2791_v51 = vmul.f32 %v6777_v33, %v6692_v36  ;;  %5114 = vpow2.f32 %v4520_v27  ;;  %v4679_v25 = vor.u32 %v4963_v37, %v4678_v1  ;;  %v4979_v5 = vld [vmem:[#allocation4 + $0x1b4] sm:$0xf0] }
 0x201   :  { %8775 = vst [vmem:[#allocation33_spill] sm:$0xff] %v6801_v29  ;;  %v4550_v20 = vld [vmem:[#allocation4 + $0x30] sm:$0xf]  ;;  %v4931_v29 = vld [vmem:[#allocation4 + $0x34] sm:$0xf0]  ;;  %vm2735_vm7 = vweird.f32 %v6642_v52  ;;  %5116 = vrcp.f32 %v6783_v63  ;;  %v1481_v62 = vadd.f32 %v1480_v26, %v1431_v4  ;;  %v4743_v34 = vor.u32 %v4979_v5, %v4742_v0 }
 0x202   :  { %v8776_v21 = vand.u32 2147483647, %v6620_v54  ;;  %v4551_v11 = vor.u32 %v4931_v29, %v4550_v20  ;;  %v4614_v27 = vld [vmem:[#allocation4 + $0xb0] sm:$0xf]  ;;  %v2638_v1 = vsel %vm6744_vm14, %v6706_v31, %v2633_v50  ;;  %v2754_v37 = vand.u32 2147483647, %v6648_v23  ;;  %3556 = vmatpush.bf16.msra.mxu2 %v4679_v25  ;;  %v1336_v50 = vpop.f32.mrf.mxu0  ;;  %v1385_v5 = vpop.f32.mrf.mxu1  ;;  %vm6901_vm15 = vmor %vm2735_vm7, %vm2736_vm5 }
 0x203   :  { %v4615_v3 = vor.u32 %v4947_v6, %v4614_v27  ;;  %v5113_v7 = vpop.eup %5112  ;;  %v2689_v29 = vadd.f32 %v6695_v14, %v2688_v9  ;;  %v2733_v44 = vmul.f32 %v6711_v24, %v2732_v60  ;;  %5118 = vpow2.f32 %v4462_v42  ;;  %3605 = vmatpush.bf16.msra.mxu3 %v4743_v34  ;;  %v8782_v26 = vld [vmem:[#allocation43_spill] sm:$0xff]  ;;  %v8783_v9 = vld [vmem:[#allocation16_spill] sm:$0xff] }
 0x204   :  { %vm6815_vm6 = vcmp.eq.f32.partialorder %v8776_v21, 8.507059e+37  ;;  %v2756_v21 = vand.u32 2147483648, %v6648_v23  ;;  %v3011_v31 = vmul.f32 %v6617_v22, %v1481_v62  ;;  %3458 = vmatpush.bf16.msra.mxu0 %v4551_v11  ;;  %v2678_v6 = vsel %vm6830_vm8, %v6672_v49, %v2674_v59  ;;  %1629 = vmatmul.bf16.gmra.mxu2 %v8783_v9  ;;  %v4945_v62 = vld [vmem:[#allocation4 + $0xa4] sm:$0xf0] }
 0x205   :  { %v2792_v4 = vsub.f32 1.0, %v2791_v51  ;;  %5120 = vpow2.f32 %v4463_v61  ;;  %v6842_v25 = vadd.f32 %v8782_v26, %v8781_v41  ;;  %3507 = vmatpush.bf16.msra.mxu1 %v4615_v3  ;;  %v2748_v60 = vmul.f32 %v6719_v2, %v2747_v13  ;;  %v8797_v41 = vld [vmem:[#allocation17_spill] sm:$0xff] }
 0x206   :  { %vm2750_vm9 = vweird.f32 %v6648_v23  ;;  %v1386_v22 = vadd.f32 %v1385_v5, %v1336_v50  ;;  %v6848_v11 = vpack.c.bf16 %v3011_v31, %v6766_v38  ;;  %v5115_v42 = vpop.eup %5114  ;;  %v6851_v59 = vmul.f32 %v2638_v1, %v8706_v53 }
 0x207   :  { %v8787_v3 = vand.u32 2147483647, %v6642_v52  ;;  %v2757_v38 = vor.u32 1.1754944e-38, %v2756_v21  ;;  %vm2795_vm12 = vweird.f32 %v6692_v36  ;;  %v6868_v13 = vadd.f32 1.0, %v5113_v7  ;;  %v6870_v53 = vpop.eup %5116  ;;  %v1434_v1 = vpop.f32.mrf.mxu2  ;;  %v8798_v52 = vld [vmem:[#allocation48_spill] sm:$0xff] }
 0x208   :  { %8784 = vst [vmem:[#allocation11_spill] sm:$0xff] %v6848_v11  ;;  %v2683_v54 = vsel %vm6793_vm4, %v6735_v58, %v2678_v6  ;;  %v2693_v51 = vsel %vm6857_vm10, %v6695_v14, %v2689_v29  ;;  %v2734_v20 = vadd.f32 %v6711_v24, %v2733_v44  ;;  %vm6879_vm13 = vcmp.eq.f32.partialorder %v2754_v37, 8.507059e+37  ;;  %v1483_v21 = vpop.f32.mrf.mxu3  ;;  %v8796_v6 = vld [vmem:[#allocation47_spill] sm:$0xff]  ;;  %v4576_v11 = vld [vmem:[#allocation4 + $0x68] sm:$0xf0] }
 0x209   :  { %vm6863_vm11 = vcmp.eq.f32.partialorder %v8787_v3, 8.507059e+37  ;;  %v6884_v34 = vmul.f32 %v6676_v28, %v1386_v22  ;;  %v2793_v7 = vmul.f32 %v6777_v33, %v2792_v4  ;;  %v2799_v27 = vand.u32 2147483647, %v6692_v36  ;;  %v5119_v14 = vpop.eup %5118  ;;  %1678 = vmatmul.bf16.gmra.mxu3 %v8797_v41 }
 0x20a   :  { %v2801_v46 = vand.u32 2147483648, %v6692_v36  ;;  %v4466_v58 = vmul.f32 -1.442695, %v6842_v25  ;;  %v2749_v0 = vadd.f32 %v6719_v2, %v2748_v60  ;;  %vm2751_vm14 = vweird.f32 %v6719_v2  ;;  %v6920_v5 = vpop.f32.mrf.mxu0 }
 0x20b   :  { %8792 = vst [vmem:[#allocation36_spill] sm:$0xff] %v6884_v34  ;;  %v6892_v37 = vadd.f32 1.0, %v5115_v42  ;;  %v1484_v29 = vadd.f32 %v1483_v21, %v1434_v1  ;;  %v5121_v28 = vpop.eup %5120  ;;  %v2698_v44 = vsel %vm6815_vm6, %v6754_v32, %v2693_v51  ;;  %v6907_v50 = vmul.f32 %v6870_v53, %v6783_v63  ;;  %vm6926_vm1 = vmor %vm2750_vm9, %vm2751_vm14  ;;  %1526 = vmatmul.bf16.gmra.mxu0 %v8753_v48  ;;  %v4670_v1 = vld [vmem:[#allocation4 + $0x120] sm:$0xf]  ;;  %v4961_v21 = vld [vmem:[#allocation4 + $0x124] sm:$0xf0] }
 0x20c   :  { %5122 = vrcp.f32 %v6868_v13  ;;  %v4467_v4 = vmul.f32 -1.442695, %v8796_v6  ;;  %v2738_v32 = vsel %vm6901_vm15, %v6711_v24, %v2734_v20  ;;  %vm2796_vm0 = vweird.f32 %v6777_v33  ;;  %8799 = vst [vmem:[#allocation39_spill] sm:$0xff] %v6920_v5  ;;  %1575 = vmatmul.bf16.gmra.mxu1 %v8765_v19  ;;  %v4977_v48 = vld [vmem:[#allocation4 + $0x1a4] sm:$0xf0]  ;;  %v8812_v24 = vld [vmem:[#allocation18_spill] sm:$0xff] }
 0x20d   :  { %8793 = vst [vmem:[#allocation25_spill] sm:$0xff] %v6892_v37  ;;  %v4470_v56 = vmul.f32 -1.442695, %v8798_v52  ;;  %v6918_v26 = vmul.f32 %v6751_v8, %v1484_v29  ;;  %v2794_v22 = vadd.f32 %v6777_v33, %v2793_v7  ;;  %vm6931_vm2 = vcmp.eq.f32.partialorder %v2799_v27, 8.507059e+37  ;;  %v6937_v8 = vpop.f32.mrf.mxu1  ;;  %vm6947_vm3 = vmor %vm2795_vm12, %vm2796_vm0  ;;  %v8807_v27 = vld [vmem:[#allocation49_spill] sm:$0xff] }
 0x20e   :  { %v6935_v42 = vadd.f32 1.0, %v5119_v14  ;;  %5124 = vpow2.f32 %v4466_v58  ;;  %8804 = vst [vmem:[#allocation12_spill] sm:$0xff] %v6937_v8  ;;  %v2753_v49 = vsel %vm6926_vm1, %v6719_v2, %v2749_v0  ;;  %v2802_v23 = vor.u32 1.1754944e-38, %v2801_v46  ;;  %v4734_v14 = vld [vmem:[#allocation4 + $0x1a0] sm:$0xf] }
 0x20f   :  { %5126 = vrcp.f32 %v6892_v37  ;;  %v6943_v3 = vadd.f32 1.0, %v5121_v28  ;;  %v2807_v20 = vsub.f32 1.0, %v6907_v50  ;;  %v2816_v7 = vand.u32 2147483648, %v6783_v63  ;;  %v4542_v29 = vld [vmem:[#allocation4 + $0x20] sm:$0xf] }
 0x210   :  { %5128 = vpow2.f32 %v4467_v4  ;;  %v4471_v58 = vmul.f32 -1.442695, %v8807_v27  ;;  %v2958_v2 = vmul.f32 %v2683_v54, %v8709_v30  ;;  %v6956_v46 = vmul.f32 %v2698_v44, %v8719_v43  ;;  %v1485_v61 = vpop.f32.mrf.mxu3  ;;  %v4929_v19 = vld [vmem:[#allocation4 + $0x24] sm:$0xf0]  ;;  %v4606_v50 = vld [vmem:[#allocation4 + $0xa0] sm:$0xf] }
 0x211   :  { %v2743_v36 = vsel %vm6863_vm11, %v6781_v10, %v2738_v32  ;;  %5130 = vpow2.f32 %v4470_v56  ;;  %v2758_v30 = vsel %vm6879_vm13, %v2757_v38, %v2753_v49  ;;  %v2798_v43 = vsel %vm6947_vm3, %v6777_v33, %v2794_v22  ;;  %v1436_v10 = vpop.f32.mrf.mxu2  ;;  %v8808_v33 = vld [vmem:[#allocation50_spill] sm:$0xff]  ;;  %v8809_v32 = vld [vmem:[#allocation51_spill] sm:$0xff]  ;;  %v4936_v5 = vld [vmem:[#allocation4 + $0x64] sm:$0xf] }
 0x212   :  { %v6963_v0 = vpop.eup %5122  ;;  %5132 = vrcp.f32 %v6935_v42  ;;  %v4671_v54 = vor.u32 %v4961_v21, %v4670_v1  ;;  %v1486_v28 = vadd.f32 %v1485_v61, %v1436_v10  ;;  %v4735_v44 = vor.u32 %v4977_v48, %v4734_v14  ;;  %v1341_v21 = vpop.f32.mrf.mxu0  ;;  %v4943_v34 = vld [vmem:[#allocation4 + $0x94] sm:$0xf0] }
 0x213   :  { %5134 = vrcp.f32 %v6943_v3  ;;  %v4543_v31 = vor.u32 %v4929_v19, %v4542_v29  ;;  %v2814_v4 = vand.u32 2147483647, %v6783_v63  ;;  %v6975_v56 = vadd.f32 %v8809_v32, %v8808_v33 }
 0x214   :  { %v5125_v38 = vpop.eup %5124  ;;  %5136 = vpow2.f32 %v4471_v58  ;;  %3557 = vmatpush.bf16.msra.mxu2 %v4671_v54  ;;  %v4607_v60 = vor.u32 %v4945_v62, %v4606_v50  ;;  %v2803_v49 = vsel %vm6931_vm2, %v2802_v23, %v2798_v43  ;;  %v2866_v51 = vmul.f32 %v6963_v0, %v6868_v13  ;;  %3606 = vmatpush.bf16.msra.mxu3 %v4735_v44 }
 0x215   :  { %v6977_v22 = vpop.eup %5126  ;;  %v3019_v1 = vmul.f32 %v6851_v59, %v1486_v28  ;;  %3459 = vmatpush.bf16.msra.mxu0 %v4543_v31  ;;  %v6985_v14 = vmul.f32 %v2743_v36, %v6479_v18  ;;  %v6988_v10 = vmul.f32 %v2758_v30, %v8725_v15  ;;  %v2808_v61 = vmul.f32 %v6870_v53, %v2807_v20  ;;  %v1390_v54 = vpop.f32.mrf.mxu1 }
 0x216   :  { %8810 = vst [vmem:[#allocation40_spill] sm:$0xff] %v6977_v22  ;;  %v5129_v58 = vpop.eup %5128  ;;  %1634 = vmatmul.bf16.gmra.mxu2 %v8812_v24  ;;  %3508 = vmatpush.bf16.msra.mxu1 %v4607_v60  ;;  %vm2810_vm4 = vweird.f32 %v6783_v63  ;;  %v2817_v59 = vor.u32 1.1754944e-38, %v2816_v7  ;;  %v1391_v43 = vadd.f32 %v1390_v54, %v1341_v21  ;;  %v6999_v18 = vmul.f32 %v2803_v49, %v8733_v55  ;;  %v8817_v21 = vld [vmem:[#allocation19_spill] sm:$0xff] }
 0x217   :  { %8811 = vst [vmem:[#allocation26_spill] sm:$0xff] %v6985_v14  ;;  %v5131_v23 = vpop.eup %5130  ;;  %v6994_v48 = vpack.c.bf16 %v3019_v1, %v6918_v26  ;;  %vm7001_vm5 = vcmp.eq.f32.partialorder %v2814_v4, 8.507059e+37  ;;  %v2851_v20 = vmul.f32 %v6977_v22, %v6892_v37  ;;  %v7007_v36 = vadd.f32 1.0, %v5125_v38 }
 0x218   :  { %v6996_v29 = vpop.eup %5132  ;;  %v4474_v7 = vmul.f32 -1.442695, %v6975_v56  ;;  %v2861_v26 = vand.u32 2147483648, %v6892_v37  ;;  %v2867_v19 = vsub.f32 1.0, %v2866_v51  ;;  %v7013_v28 = vadd.f32 1.0, %v5129_v58  ;;  %v1488_v4 = vpop.f32.mrf.mxu3  ;;  %v8825_v58 = vld [vmem:[#allocation52_spill] sm:$0xff] }
 0x219   :  { %8813 = vst [vmem:[#allocation85_spill] sm:$0xff] %v6994_v48  ;;  %v7010_v30 = vpop.eup %5134  ;;  %v7015_v55 = vmul.f32 %v2958_v2, %v1391_v43  ;;  %v2809_v31 = vadd.f32 %v6870_v53, %v2808_v61  ;;  %vm2811_vm6 = vweird.f32 %v6870_v53  ;;  %v2876_v50 = vand.u32 2147483648, %v6868_v13  ;;  %v1439_v38 = vpop.f32.mrf.mxu2  ;;  %1683 = vmatmul.bf16.gmra.mxu3 %v8817_v21  ;;  %v4598_v48 = vld [vmem:[#allocation4 + $0x90] sm:$0xf] }
 0x21a   :  { %v5137_v44 = vpop.eup %5136  ;;  %v7020_v62 = vadd.f32 1.0, %v5131_v23  ;;  %v2874_v32 = vand.u32 2147483647, %v6868_v13  ;;  %v1991_v60 = vand.u32 2147483648, %v6935_v42  ;;  %v1489_v49 = vadd.f32 %v1488_v4, %v1439_v38  ;;  %vm7035_vm7 = vmor %vm2810_vm4, %vm2811_vm6  ;;  %v7046_v43 = vpop.f32.mrf.mxu0  ;;  %v4534_v4 = vld [vmem:[#allocation4 + $0x10] sm:$0xf] }
 0x21b   :  { %8816 = vst [vmem:[#allocation27_spill] sm:$0xff] %v7015_v55  ;;  %v2852_v2 = vsub.f32 1.0, %v2851_v20  ;;  %v1981_v51 = vmul.f32 %v6996_v29, %v6935_v42  ;;  %v7029_v1 = vmul.f32 %v7010_v30, %v6943_v3  ;;  %5138 = vrcp.f32 %v7007_v36  ;;  %1531 = vmatmul.bf16.gmra.mxu0 %v8783_v9  ;;  %v4927_v55 = vld [vmem:[#allocation4 + $0x14] sm:$0xf0]  ;;  %v8826_v9 = vld [vmem:[#allocation53_spill] sm:$0xff] }
 0x21c   :  { %v2868_v61 = vmul.f32 %v6963_v0, %v2867_v19  ;;  %5140 = vrcp.f32 %v7013_v28  ;;  %v7041_v54 = vadd.f32 1.0, %v5137_v44  ;;  %v7044_v23 = vmul.f32 %v6956_v46, %v1489_v49  ;;  %8820 = vst [vmem:[#allocation13_spill] sm:$0xff] %v7046_v43  ;;  %1580 = vmatmul.bf16.gmra.mxu1 %v8797_v41 }
 0x21d   :  { %v2813_v20 = vsel %vm7035_vm7, %v6870_v53, %v2809_v31  ;;  %vm2855_vm8 = vweird.f32 %v6892_v37  ;;  %v7052_v63 = vor.u32 1.1754944e-38, %v2861_v26  ;;  %v7054_v38 = vor.u32 1.1754944e-38, %v2876_v50  ;;  %v7057_v19 = vpop.f32.mrf.mxu1 }
 0x21e   :  { %5142 = vrcp.f32 %v7020_v62  ;;  %8822 = vst [vmem:[#allocation41_spill] sm:$0xff] %v7057_v19  ;;  %v7060_v46 = vor.u32 1.1754944e-38, %v1991_v60  ;;  %v2006_v49 = vand.u32 2147483648, %v6943_v3  ;;  %v2853_v53 = vmul.f32 %v6977_v22, %v2852_v2  ;;  %v4959_v2 = vld [vmem:[#allocation4 + $0x114] sm:$0xf0] }
 0x21f   :  { %8821 = vst [vmem:[#allocation22_spill] sm:$0xff] %v7052_v63  ;;  %vm7065_vm9 = vcmp.eq.f32.partialorder %v2874_v32, 8.507059e+37  ;;  %v1982_v26 = vsub.f32 1.0, %v1981_v51  ;;  %v1997_v50 = vsub.f32 1.0, %v7029_v1  ;;  %v4475_v33 = vmul.f32 -1.442695, %v8825_v58 }
 0x220   :  { %v2818_v44 = vsel %vm7001_vm5, %v2817_v59, %v2813_v20  ;;  %v7074_v60 = vadd.f32 %v6963_v0, %v2868_v61  ;;  %vm2871_vm10 = vweird.f32 %v6963_v0  ;;  %5144 = vrcp.f32 %v7041_v54  ;;  %v4662_v32 = vld [vmem:[#allocation4 + $0x110] sm:$0xf]  ;;  %v1490_v15 = vpop.f32.mrf.mxu3  ;;  %v4975_v20 = vld [vmem:[#allocation4 + $0x194] sm:$0xf0] }
 0x221   :  { %v4726_v51 = vld [vmem:[#allocation4 + $0x190] sm:$0xf]  ;;  %v7080_v1 = vpop.eup %5138  ;;  %vm2856_vm11 = vweird.f32 %v6977_v22  ;;  %vm2870_vm12 = vweird.f32 %v6868_v13  ;;  %5146 = vpow2.f32 %v4474_v7  ;;  %v1441_v59 = vpop.f32.mrf.mxu2  ;;  %v4663_v61 = vor.u32 %v4959_v2, %v4662_v32 }
 0x222   :  { %v7084_v63 = vpop.eup %5140  ;;  %vm1985_vm13 = vweird.f32 %v6935_v42  ;;  %v4478_v41 = vmul.f32 -1.442695, %v8826_v9  ;;  %v1491_v14 = vadd.f32 %v1490_v15, %v1441_v59  ;;  %v4727_v19 = vor.u32 %v4975_v20, %v4726_v51  ;;  %vm7098_vm14 = vmor %vm2870_vm12, %vm2871_vm10 }
 0x223   :  { %v4535_v43 = vor.u32 %v4927_v55, %v4534_v4  ;;  %v2967_v7 = vmul.f32 %v2818_v44, %v8746_v16  ;;  %v7092_v32 = vadd.f32 %v6977_v22, %v2853_v53  ;;  %vm2000_vm15 = vweird.f32 %v6943_v3  ;;  %3558 = vmatpush.bf16.msra.mxu2 %v4663_v61  ;;  %v1346_v53 = vpop.f32.mrf.mxu0  ;;  %vm7124_vm0 = vmor %vm2855_vm8, %vm2856_vm11 }
 0x224   :  { %v7088_v8 = vpop.eup %5142  ;;  %v7103_v55 = vor.u32 1.1754944e-38, %v2006_v49  ;;  %v4599_v4 = vor.u32 %v4943_v34, %v4598_v48  ;;  %v2873_v16 = vsel %vm7098_vm14, %v6963_v0, %v7074_v60  ;;  %v1983_v44 = vmul.f32 %v6996_v29, %v1982_v26  ;;  %3607 = vmatpush.bf16.msra.mxu3 %v4727_v19  ;;  %v8830_v0 = vld [vmem:[#allocation20_spill] sm:$0xff] }
 0x225   :  { %8827 = vst [vmem:[#allocation29_spill] sm:$0xff] %v7092_v32  ;;  %5148 = vpow2.f32 %v4475_v33  ;;  %v3027_v13 = vmul.f32 %v6988_v10, %v1491_v14  ;;  %3460 = vmatpush.bf16.msra.mxu0 %v4535_v43  ;;  %v1998_v51 = vmul.f32 %v7010_v30, %v1997_v50  ;;  %v2041_v49 = vmul.f32 %v7080_v1, %v7007_v36  ;;  %v1395_v59 = vpop.f32.mrf.mxu1 }
 0x226   :  { %v2051_v34 = vand.u32 2147483648, %v7007_v36  ;;  %v2056_v48 = vmul.f32 %v7084_v63, %v7013_v28  ;;  %1639 = vmatmul.bf16.gmra.mxu2 %v8830_v0  ;;  %3509 = vmatpush.bf16.msra.mxu1 %v4599_v4  ;;  %v7118_v33 = vpop.eup %5144  ;;  %v8831_v14 = vmov 0  ;;  %v2101_v10 = vmul.f32 %v7088_v8, %v7020_v62  ;;  %v8841_v4 = vld [vmem:[#allocation54_spill] sm:$0xff] }
 0x227   :  { %v8832_v14 = vsel %vm7124_vm0, 4294967295, %v8831_v14  ;;  %5150 = vpow2.f32 %v4478_v41  ;;  %v1396_v43 = vadd.f32 %v1395_v59, %v1346_v53  ;;  %v7131_v19 = vpack.c.bf16 %v3027_v13, %v7044_v23  ;;  %v5147_v26 = vpop.eup %5146  ;;  %v8842_v13 = vld [vmem:[#allocation55_spill] sm:$0xff] }
 0x228   :  { %8833 = vst [vmem:[#allocation14_spill] sm:$0xff] %v8832_v14  ;;  %vm1986_vm1 = vweird.f32 %v6996_v29  ;;  %v8835_v60 = vand.u32 2147483647, %v6935_v42  ;;  %vm2001_vm3 = vweird.f32 %v7010_v30  ;;  %v8838_v61 = vand.u32 2147483647, %v6943_v3  ;;  %v1493_v22 = vpop.f32.mrf.mxu3 }
 0x229   :  { %8834 = vst [vmem:[#allocation37_spill] sm:$0xff] %v7131_v19  ;;  %v2049_v20 = vand.u32 2147483647, %v7007_v36  ;;  %v2878_v41 = vsel %vm7065_vm9, %v7054_v38, %v2873_v16  ;;  %v1984_v2 = vadd.f32 %v6996_v29, %v1983_v44  ;;  %v7158_v53 = vadd.f32 %v8842_v13, %v8841_v4  ;;  %v1444_v32 = vpop.f32.mrf.mxu2  ;;  %v8844_v16 = vld [vmem:[#allocation58_spill] sm:$0xff]  ;;  %vm7173_vm5 = vmor %vm1985_vm13, %vm1986_vm1  ;;  %v8850_v13 = vld [vmem:[#allocation59_spill] sm:$0xff] }
 0x22a   :  { %vm7140_vm2 = vcmp.eq.f32.partialorder %v8835_v60, 8.507059e+37  ;;  %vm7147_vm4 = vcmp.eq.f32.partialorder %v8838_v61, 8.507059e+37  ;;  %v7161_v59 = vmul.f32 %v6999_v18, %v1396_v43  ;;  %v1999_v60 = vadd.f32 %v7010_v30, %v1998_v51  ;;  %vm7193_vm8 = vmor %vm2000_vm15, %vm2001_vm3 }
 0x22b   :  { %v2042_v61 = vsub.f32 1.0, %v2041_v49  ;;  %v7164_v50 = vor.u32 1.1754944e-38, %v2051_v34  ;;  %v2057_v19 = vsub.f32 1.0, %v2056_v48  ;;  %v5149_v14 = vpop.eup %5148  ;;  %v2064_v38 = vand.u32 2147483647, %v7013_v28  ;;  %1536 = vmatmul.bf16.gmra.mxu0 %v8812_v24 }
 0x22c   :  { %8843 = vst [vmem:[#allocation38_spill] sm:$0xff] %v7161_v59  ;;  %v2102_v31 = vsub.f32 1.0, %v2101_v10  ;;  %v4479_v44 = vmul.f32 -1.442695, %v8844_v16  ;;  %v1494_v37 = vadd.f32 %v1493_v22, %v1444_v32  ;;  %v2971_v4 = vmul.f32 %v2878_v41, %v8763_v57  ;;  %v8847_v22 = vld [vmem:[#allocation21_spill] sm:$0xff]  ;;  %1585 = vmatmul.bf16.gmra.mxu1 %v8817_v21 }
 0x22d   :  { %vm2045_vm6 = vweird.f32 %v7007_v36  ;;  %vm2046_vm7 = vweird.f32 %v7080_v1  ;;  %v7181_v51 = vmul.f32 %v7118_v33, %v7041_v54  ;;  %v7183_v49 = vadd.f32 1.0, %v5147_v26  ;;  %1688 = vmatmul.bf16.gmra.mxu3 %v8847_v22  ;;  %v5151_v57 = vpop.eup %5150  ;;  %v4957_v32 = vld [vmem:[#allocation4 + $0x104] sm:$0xf0]  ;;  %v4718_v21 = vld [vmem:[#allocation4 + $0x180] sm:$0xf] }
 0x22e   :  { %v1988_v42 = vsel %vm7173_vm5, %v6996_v29, %v1984_v2  ;;  %vm2060_vm9 = vweird.f32 %v7013_v28  ;;  %v4482_v48 = vmul.f32 -1.442695, %v7158_v53  ;;  %v7200_v10 = vmul.f32 %v2967_v7, %v1494_v37  ;;  %v4973_v34 = vld [vmem:[#allocation4 + $0x184] sm:$0xf0]  ;;  %vm7239_vm13 = vmor %vm2045_vm6, %vm2046_vm7 }
 0x22f   :  { %v2003_v29 = vsel %vm7193_vm8, %v7010_v30, %v1999_v60  ;;  %v2043_v43 = vmul.f32 %v7080_v1, %v2042_v61  ;;  %v2058_v3 = vmul.f32 %v7084_v63, %v2057_v19  ;;  %v7207_v26 = vadd.f32 1.0, %v5149_v14  ;;  %v8853_v19 = vld [vmem:[#allocation60_spill] sm:$0xff] }
 0x230   :  { %v2103_v41 = vmul.f32 %v7088_v8, %v2102_v31  ;;  %v2109_v2 = vand.u32 2147483647, %v7020_v62  ;;  %5152 = vpow2.f32 %v4479_v44  ;;  %v4483_v18 = vmul.f32 -1.442695, %v8850_v13  ;;  %v4925_v31 = vld [vmem:[#allocation4 + $0x4] sm:$0xf0]  ;;  %v1495_v15 = vpop.f32.mrf.mxu3 }
 0x231   :  { %vm7212_vm10 = vcmp.eq.f32.partialorder %v2049_v20, 8.507059e+37  ;;  %v2117_v7 = vsub.f32 1.0, %v7181_v51  ;;  %5154 = vrcp.f32 %v7183_v49  ;;  %v7218_v30 = vadd.f32 1.0, %v5151_v57  ;;  %v4526_v20 = vld [vmem:[#allocation4] sm:$0xf] }
 0x232   :  { %v4486_v14 = vmul.f32 -1.442695, %v8853_v19  ;;  %v1993_v60 = vsel %vm7140_vm2, %v7060_v46, %v1988_v42  ;;  %v2008_v61 = vsel %vm7147_vm4, %v7103_v55, %v2003_v29  ;;  %vm2061_vm11 = vweird.f32 %v7084_v63  ;;  %v4590_v44 = vld [vmem:[#allocation4 + $0x80] sm:$0xf]  ;;  %v1446_v46 = vpop.f32.mrf.mxu2  ;;  %v4941_v55 = vld [vmem:[#allocation4 + $0x84] sm:$0xf0] }
 0x233   :  { %5156 = vpow2.f32 %v4482_v48  ;;  %v2044_v51 = vadd.f32 %v7080_v1, %v2043_v43  ;;  %v2059_v57 = vadd.f32 %v7084_v63, %v2058_v3  ;;  %v4527_v23 = vor.u32 %v4925_v31, %v4526_v20  ;;  %v4654_v42 = vld [vmem:[#allocation4 + $0x100] sm:$0xf]  ;;  %vm7261_vm1 = vmor %vm2060_vm9, %vm2061_vm11 }
 0x234   :  { %5158 = vrcp.f32 %v7207_v26  ;;  %v1496_v48 = vadd.f32 %v1495_v15, %v1446_v46  ;;  %v4591_v24 = vor.u32 %v4941_v55, %v4590_v44  ;;  %v4655_v29 = vor.u32 %v4957_v32, %v4654_v42 }
 0x235   :  { %5160 = vpow2.f32 %v4483_v18  ;;  %v2104_v59 = vadd.f32 %v7088_v8, %v2103_v41  ;;  %vm2106_vm12 = vweird.f32 %v7088_v8  ;;  %3461 = vmatpush.bf16.msra.mxu0 %v4527_v23  ;;  %v4719_v43 = vor.u32 %v4973_v34, %v4718_v21 }
 0x236   :  { %5162 = vpow2.f32 %v4486_v14  ;;  %v5153_v3 = vpop.eup %5152  ;;  %vm7243_vm14 = vcmp.eq.f32.partialorder %v2064_v38, 8.507059e+37  ;;  %vm2105_vm15 = vweird.f32 %v7020_v62  ;;  %v2111_v41 = vand.u32 2147483648, %v7020_v62  ;;  %3510 = vmatpush.bf16.msra.mxu1 %v4591_v24  ;;  %3559 = vmatpush.bf16.msra.mxu2 %v4655_v29 }
 0x237   :  { %v3035_v14 = vmul.f32 %v2971_v4, %v1496_v48  ;;  %v7249_v34 = vpop.eup %5154  ;;  %v7252_v31 = vmul.f32 %v1993_v60, %v8772_v47  ;;  %v2048_v36 = vsel %vm7239_vm13, %v7080_v1, %v2044_v51  ;;  %v2118_v4 = vmul.f32 %v7118_v33, %v2117_v7  ;;  %3608 = vmatpush.bf16.msra.mxu3 %v4719_v43  ;;  %vm7279_vm2 = vmor %vm2105_vm15, %vm2106_vm12  ;;  %v4954_v43 = vld [vmem:[#allocation4 + $0xf4] sm:$0xf] }
 0x238   :  { %5164 = vrcp.f32 %v7218_v30  ;;  %v7268_v47 = vmul.f32 %v2008_v61, %v8773_v35  ;;  %v2063_v1 = vsel %vm7261_vm1, %v7084_v63, %v2059_v57  ;;  %v8860_v60 = vand.u32 2147483648, %v7013_v28 }
 0x239   :  { %v5157_v44 = vpop.eup %5156  ;;  %v7284_v46 = vpack.c.bf16 %v3035_v14, %v7200_v10  ;;  %v2108_v63 = vsel %vm7279_vm2, %v7088_v8, %v2104_v59  ;;  %vm2110_vm3 = vcmp.eq.f32.partialorder %v2109_v2, 8.507059e+37  ;;  %v2124_v28 = vand.u32 2147483647, %v7041_v54 }
 0x23a   :  { %v2067_v51 = vor.u32 1.1754944e-38, %v8860_v60  ;;  %v7286_v35 = vpop.eup %5158  ;;  %v7292_v61 = vadd.f32 1.0, %v5153_v3  ;;  %v2053_v62 = vsel %vm7212_vm10, %v7164_v50, %v2048_v36  ;;  %v2112_v15 = vor.u32 1.1754944e-38, %v2111_v41  ;;  %v7305_v2 = vpop.f32.mrf.mxu2  ;;  %v8868_v36 = vld [vmem:[#allocation61_spill] sm:$0xff] }
 0x23b   :  { %8863 = vst [vmem:[#allocation44_spill] sm:$0xff] %v7284_v46  ;;  %v5161_v57 = vpop.eup %5160  ;;  %v2126_v10 = vand.u32 2147483648, %v7041_v54  ;;  %v2161_v23 = vmul.f32 %v7249_v34, %v7183_v49  ;;  %v2119_v59 = vadd.f32 %v7118_v33, %v2118_v4  ;;  %vm2120_vm4 = vweird.f32 %v7041_v54  ;;  %1541 = vmatmul.bf16.gmra.mxu0 %v8830_v0 }
 0x23c   :  { %v5163_v55 = vpop.eup %5162  ;;  %v2068_v8 = vsel %vm7243_vm14, %v2067_v51, %v2063_v1  ;;  %vm2121_vm5 = vweird.f32 %v7118_v33  ;;  %v2113_v37 = vsel %vm2110_vm3, %v2112_v15, %v2108_v63  ;;  %v2171_v50 = vand.u32 2147483648, %v7183_v49  ;;  %v1654_v1 = vpop.f32.mrf.mxu3  ;;  %1590 = vmatmul.bf16.gmra.mxu1 %v8847_v22  ;;  %v4970_v63 = vld [vmem:[#allocation4 + $0x174] sm:$0xf]  ;;  %v8869_v15 = vld [vmem:[#allocation56_spill] sm:$0xff] }
 0x23d   :  { %v2176_v42 = vmul.f32 %v7286_v35, %v7207_v26  ;;  %v7310_v32 = vadd.f32 1.0, %v5157_v44  ;;  %v7315_v24 = vmul.f32 %v2053_v62, %v6842_v25  ;;  %vm7317_vm6 = vcmp.eq.f32.partialorder %v2124_v28, 8.507059e+37  ;;  %vm7327_vm7 = vmor %vm2120_vm4, %vm2121_vm5  ;;  %v4712_v28 = vld [vmem:[#allocation4 + $0x178] sm:$0xf0] }
 0x23e   :  { %v7312_v48 = vpop.eup %5164  ;;  %5166 = vrcp.f32 %v7292_v61  ;;  %v7322_v54 = vadd.f32 1.0, %v5161_v57  ;;  %v7325_v21 = vmul.f32 %v2068_v8, %v8796_v6  ;;  %v2127_v3 = vor.u32 1.1754944e-38, %v2126_v10  ;;  %v4986_v57 = vld [vmem:[#allocation4 + $0x1f4] sm:$0xf]  ;;  %v8870_v10 = vld [vmem:[#allocation57_spill] sm:$0xff] }
 0x23f   :  { %v2162_v20 = vsub.f32 1.0, %v2161_v23  ;;  %v7331_v18 = vadd.f32 1.0, %v5163_v55  ;;  %v7334_v25 = vmul.f32 %v2113_v37, %v8798_v52  ;;  %v2123_v41 = vsel %vm7327_vm7, %v7118_v33, %v2119_v59  ;;  %v4776_v59 = vld [vmem:[#allocation4 + $0x1f8] sm:$0xf0]  ;;  %v4938_v37 = vld [vmem:[#allocation4 + $0x74] sm:$0xf] }
 0x240   :  { %v2169_v14 = vand.u32 2147483647, %v7183_v49  ;;  %v4487_v6 = vmul.f32 -1.442695, %v8868_v36  ;;  %v7341_v38 = vor.u32 1.1754944e-38, %v2171_v50  ;;  %v2177_v4 = vsub.f32 1.0, %v2176_v42 }
 0x241   :  { %v2221_v44 = vmul.f32 %v7312_v48, %v7218_v30  ;;  %5168 = vrcp.f32 %v7310_v32  ;;  %v2184_v52 = vand.u32 2147483647, %v7207_v26  ;;  %v2186_v60 = vand.u32 2147483648, %v7207_v26  ;;  %v4584_v50 = vld [vmem:[#allocation4 + $0x78] sm:$0xf0] }
 0x242   :  { %v2231_v51 = vand.u32 2147483648, %v7218_v30  ;;  %5170 = vrcp.f32 %v7322_v54  ;;  %v2128_v33 = vsel %vm7317_vm6, %v2127_v3, %v2123_v41  ;;  %v2163_v7 = vmul.f32 %v7249_v34, %v2162_v20  ;;  %v1607_v55 = vpop.f32.mrf.mxu2  ;;  %v4648_v3 = vld [vmem:[#allocation4 + $0xf8] sm:$0xf0] }
 0x243   :  { %vm2165_vm8 = vweird.f32 %v7183_v49  ;;  %5172 = vrcp.f32 %v7331_v18  ;;  %vm2180_vm9 = vweird.f32 %v7207_v26  ;;  %v7362_v23 = vadd.f32 %v8870_v10, %v8869_v15  ;;  %v7376_v15 = vpop.f32.mrf.mxu1 }
 0x244   :  { %v7357_v62 = vpop.eup %5166  ;;  %5174 = vpow2.f32 %v4487_v6  ;;  %v4715_v8 = vor.u32 %v4970_v63, %v4712_v28  ;;  %v2178_v0 = vmul.f32 %v7286_v35, %v2177_v4  ;;  %v2222_v22 = vsub.f32 1.0, %v2221_v44  ;;  %v7374_v28 = vpop.f32.mrf.mxu0  ;;  %8874 = vst [vmem:[#allocation15_spill] sm:$0xff] %v7376_v15 }
 0x245   :  { %v4779_v42 = vor.u32 %v4986_v57, %v4776_v59  ;;  %v4587_v29 = vor.u32 %v4938_v37, %v4584_v50  ;;  %v7366_v20 = vmul.f32 %v2128_v33, %v8807_v27  ;;  %vm7368_vm10 = vcmp.eq.f32.partialorder %v2169_v14, 8.507059e+37  ;;  %8873 = vst [vmem:[#allocation30_spill] sm:$0xff] %v7374_v28  ;;  %v4768_v28 = vld [vmem:[#allocation4 + $0x1e8] sm:$0xf0] }
 0x246   :  { %v2229_v6 = vand.u32 2147483647, %v7218_v30  ;;  %v2246_v63 = vand.u32 2147483648, %v7292_v61  ;;  %3748 = vmatpush.bf16.msrb.mxu2 %v4715_v8  ;;  %v4651_v4 = vor.u32 %v4954_v43, %v4648_v3  ;;  %v2164_v57 = vadd.f32 %v7249_v34, %v2163_v7  ;;  %v1656_v43 = vpop.f32.mrf.mxu3 }
 0x247   :  { %v7378_v44 = vpop.eup %5168  ;;  %vm2166_vm11 = vweird.f32 %v7249_v34  ;;  %vm7382_vm12 = vcmp.eq.f32.partialorder %v2184_v52, 8.507059e+37  ;;  %v2187_v14 = vor.u32 1.1754944e-38, %v2186_v60  ;;  %vm2225_vm13 = vweird.f32 %v7218_v30  ;;  %3797 = vmatpush.bf16.msrb.mxu3 %v4779_v42  ;;  %3650 = vmatpush.bf16.msrb.mxu0 %v4587_v29  ;;  %v8877_v42 = vld [vmem:[#allocation64_spill] sm:$0xff]  ;;  %v8890_v30 = vld [vmem:[#allocation65_spill] sm:$0xff] }
 0x248   :  { %v2236_v33 = vmul.f32 %v7357_v62, %v7292_v61  ;;  %v7389_v10 = vpop.eup %5170  ;;  %v7391_v8 = vor.u32 1.1754944e-38, %v2231_v51  ;;  %v2244_v7 = vand.u32 2147483647, %v7292_v61  ;;  %v4490_v59 = vmul.f32 -1.442695, %v7362_v23  ;;  %3699 = vmatpush.bf16.msrb.mxu1 %v4651_v4  ;;  %vm7406_vm15 = vmor %vm2165_vm8, %vm2166_vm11 }
 0x249   :  { %v1655_v52 = vadd.f32 %v1654_v1, %v7305_v2  ;;  %v7396_v37 = vpop.eup %5172  ;;  %v2179_v60 = vadd.f32 %v7286_v35, %v2178_v0  ;;  %vm2181_vm14 = vweird.f32 %v7286_v35  ;;  %v2223_v50 = vmul.f32 %v7312_v48, %v2222_v22 }
 0x24a   :  { %v4491_v29 = vmul.f32 -1.442695, %v8877_v42  ;;  %v5175_v51 = vpop.eup %5174  ;;  %vm2226_vm1 = vweird.f32 %v7312_v48  ;;  %v7411_v2 = vor.u32 1.1754944e-38, %v2246_v63  ;;  %v2291_v1 = vand.u32 2147483648, %v7310_v32  ;;  %vm7429_vm3 = vmor %vm2180_vm9, %vm2181_vm14 }
 0x24b   :  { %v1657_v0 = vadd.f32 %v1656_v43, %v1607_v55  ;;  %v2168_v22 = vsel %vm7406_vm15, %v7249_v34, %v2164_v57  ;;  %vm7417_vm2 = vcmp.eq.f32.partialorder %v2229_v6, 8.507059e+37  ;;  %v2237_v49 = vsub.f32 1.0, %v2236_v33  ;;  %v7437_v57 = vpop.f32.mrf.mxu2  ;;  %vm7466_vm5 = vmor %vm2225_vm13, %vm2226_vm1  ;;  %3462 = vmatmul.bf16.vlgmr.msra.gmra.mxu0 %v6415_v45 }
 0x24c   :  { %v2281_v46 = vmul.f32 %v7378_v44, %v7310_v32  ;;  %v2296_v15 = vmul.f32 %v7389_v10, %v7322_v54  ;;  %v2341_v34 = vmul.f32 %v7396_v37, %v7331_v18  ;;  %5176 = vpow2.f32 %v4490_v59  ;;  %3511 = vmatmul.bf16.vlgmr.msra.gmra.mxu1 %v6443_v12 }
 0x24d   :  { %v2977_v6 = vmul.f32 %v7268_v47, %v1655_v52  ;;  %v2981_v63 = vmul.f32 %v7325_v21, %v1657_v0  ;;  %v2183_v33 = vsel %vm7429_vm3, %v7286_v35, %v2179_v60  ;;  %v2224_v26 = vadd.f32 %v7312_v48, %v2223_v50  ;;  %v8884_v47 = vld [vmem:[#allocation62_spill] sm:$0xff]  ;;  %v8885_v52 = vld [vmem:[#allocation63_spill] sm:$0xff] }
 0x24e   :  { %vm2240_vm4 = vweird.f32 %v7292_v61  ;;  %v7444_v43 = vadd.f32 1.0, %v5175_v51  ;;  %5178 = vpow2.f32 %v4491_v29  ;;  %v2289_v3 = vand.u32 2147483647, %v7310_v32 }
 0x24f   :  { %v2306_v59 = vand.u32 2147483648, %v7322_v54  ;;  %v7450_v21 = vadd.f32 %v8885_v52, %v8884_v47  ;;  %v7452_v0 = vpack.c.bf16 %v2981_v63, %v2977_v6  ;;  %v2173_v35 = vsel %vm7368_vm10, %v7341_v38, %v2168_v22  ;;  %v1507_v22 = vpop.f32.mrf.mxu0  ;;  %v8893_v63 = vld [vmem:[#allocation66_spill] sm:$0xff] }
 0x250   :  { %v2238_v60 = vmul.f32 %v7357_v62, %v2237_v49  ;;  %v2282_v50 = vsub.f32 1.0, %v2281_v46  ;;  %v7458_v51 = vor.u32 1.1754944e-38, %v2291_v1  ;;  %v2188_v29 = vsel %vm7382_vm12, %v2187_v14, %v2183_v33  ;;  %v1556_v49 = vpop.f32.mrf.mxu1 }
 0x251   :  { %8886 = vst [vmem:[#allocation45_spill] sm:$0xff] %v7450_v21  ;;  %v2297_v6 = vsub.f32 1.0, %v2296_v15  ;;  %v2304_v41 = vand.u32 2147483647, %v7322_v54  ;;  %v2342_v38 = vsub.f32 1.0, %v2341_v34  ;;  %3609 = vmatmul.bf16.vlgmr.msra.gmra.mxu3 %v7452_v0  ;;  %v2228_v46 = vsel %vm7466_vm5, %v7312_v48, %v2224_v26  ;;  %v1659_v15 = vpop.f32.mrf.mxu3 }
 0x252   :  { %8887 = vst [vmem:[#allocation46_spill] sm:$0xff] %v7452_v0  ;;  %vm2241_vm6 = vweird.f32 %v7357_v62  ;;  %vm2285_vm7 = vweird.f32 %v7310_v32  ;;  %5180 = vrcp.f32 %v7444_v43  ;;  %v4494_v27 = vmul.f32 -1.442695, %v8890_v30  ;;  %v5177_v14 = vpop.eup %5176  ;;  %v4640_v30 = vld [vmem:[#allocation4 + $0xe8] sm:$0xf0] }
 0x253   :  { %v7480_v1 = vmul.f32 %v2173_v35, %v6975_v56  ;;  %vm7482_vm8 = vcmp.eq.f32.partialorder %v2244_v7, 8.507059e+37  ;;  %vm2300_vm9 = vweird.f32 %v7322_v54  ;;  %v7487_v48 = vor.u32 1.1754944e-38, %v2306_v59  ;;  %v4968_v7 = vld [vmem:[#allocation4 + $0x164] sm:$0xf]  ;;  %v4704_v59 = vld [vmem:[#allocation4 + $0x168] sm:$0xf0]  ;;  %vm7512_vm11 = vmor %vm2240_vm4, %vm2241_vm6 }
 0x254   :  { %v4495_v33 = vmul.f32 -1.442695, %v8893_v63  ;;  %v4498_v26 = vmul.f32 -1.442695, %v7450_v21  ;;  %v5179_v47 = vpop.eup %5178  ;;  %v7492_v52 = vmul.f32 %v2188_v29, %v8825_v58  ;;  %v2239_v55 = vadd.f32 %v7357_v62, %v2238_v60  ;;  %v4984_v35 = vld [vmem:[#allocation4 + $0x1e4] sm:$0xf]  ;;  %v1612_v29 = vpop.f32.mrf.mxu2 }
 0x255   :  { %v2283_v56 = vmul.f32 %v7378_v44, %v2282_v50  ;;  %vm2286_vm10 = vweird.f32 %v7378_v44  ;;  %v7502_v0 = vsel %vm7417_vm2, %v7391_v8, %v2228_v46  ;;  %v2298_v58 = vmul.f32 %v7389_v10, %v2297_v6  ;;  %v4952_v63 = vld [vmem:[#allocation4 + $0xe4] sm:$0xf]  ;;  %v4982_v32 = vld [vmem:[#allocation4 + $0x1d4] sm:$0xf] }
 0x256   :  { %v2343_v60 = vmul.f32 %v7396_v37, %v2342_v38  ;;  %v4707_v50 = vor.u32 %v4968_v7, %v4704_v59  ;;  %v7506_v45 = vadd.f32 1.0, %v5177_v14  ;;  %5182 = vpow2.f32 %v4494_v27  ;;  %v8900_v14 = vld [vmem:[#allocation69_spill] sm:$0xff]  ;;  %vm7544_vm2 = vmor %vm2285_vm7, %vm2286_vm10 }
 0x257   :  { %v4771_v12 = vor.u32 %v4984_v35, %v4768_v28  ;;  %v4579_v21 = vor.u32 %v4936_v5, %v4576_v11  ;;  %vm2301_vm12 = vweird.f32 %v7389_v10  ;;  %v7517_v4 = vadd.f32 1.0, %v5179_v47 }
 0x258   :  { %5184 = vpow2.f32 %v4495_v33  ;;  %3749 = vmatpush.bf16.msrb.mxu2 %v4707_v50  ;;  %v4643_v6 = vor.u32 %v4952_v63, %v4640_v30  ;;  %v7519_v38 = vpop.eup %5180  ;;  %v2243_v11 = vsel %vm7512_vm11, %v7357_v62, %v2239_v55  ;;  %v2284_v5 = vadd.f32 %v7378_v44, %v2283_v56  ;;  %v1509_v62 = vpop.f32.mrf.mxu0  ;;  %vm7559_vm3 = vmor %vm2300_vm9, %vm2301_vm12  ;;  %v8908_v50 = vld [vmem:[#allocation68_spill] sm:$0xff] }
 0x259   :  { %vm7525_vm13 = vcmp.eq.f32.partialorder %v2289_v3, 8.507059e+37  ;;  %vm7529_vm14 = vcmp.eq.f32.partialorder %v2304_v41, 8.507059e+37  ;;  %vm2345_vm15 = vweird.f32 %v7331_v18  ;;  %v1557_v46 = vadd.f32 %v1556_v49, %v1507_v22  ;;  %3798 = vmatpush.bf16.msrb.mxu3 %v4771_v12  ;;  %3651 = vmatpush.bf16.msrb.mxu0 %v4579_v21  ;;  %v1558_v27 = vpop.f32.mrf.mxu1  ;;  %v1661_v22 = vpop.f32.mrf.mxu3 }
 0x25a   :  { %v2299_v30 = vadd.f32 %v7389_v10, %v2298_v58  ;;  %vm2346_vm1 = vweird.f32 %v7396_v37  ;;  %5186 = vpow2.f32 %v4498_v26  ;;  %v1660_v3 = vadd.f32 %v1659_v15, %v7437_v57  ;;  %3700 = vmatpush.bf16.msrb.mxu1 %v4643_v6 }
 0x25b   :  { %v2344_v41 = vadd.f32 %v7396_v37, %v2343_v60  ;;  %5188 = vrcp.f32 %v7506_v45  ;;  %v4499_v63 = vmul.f32 -1.442695, %v8900_v14  ;;  %v1559_v33 = vadd.f32 %v1558_v27, %v1509_v62  ;;  %vm7576_vm4 = vmor %vm2345_vm15, %vm2346_vm1  ;;  %3467 = vmatmul.bf16.gmra.mxu0 %v6505_v39 }
 0x25c   :  { %v2349_v21 = vand.u32 2147483647, %v7331_v18  ;;  %v2356_v57 = vmul.f32 %v7519_v38, %v7444_v43  ;;  %5190 = vrcp.f32 %v7517_v4  ;;  %v1662_v49 = vadd.f32 %v1661_v22, %v1612_v29  ;;  %v5183_v15 = vpop.eup %5182  ;;  %v7582_v59 = vpop.f32.mrf.mxu2  ;;  %v8907_v29 = vld [vmem:[#allocation67_spill] sm:$0xff]  ;;  %3516 = vmatmul.bf16.gmra.mxu1 %v6507_v17 }
 0x25d   :  { %v2248_v26 = vsel %vm7482_vm8, %v7411_v2, %v2243_v11  ;;  %v2351_v47 = vand.u32 2147483648, %v7331_v18  ;;  %v2976_v55 = vmul.f32 %v7252_v31, %v1557_v46  ;;  %v2980_v56 = vmul.f32 %v7315_v24, %v1559_v33  ;;  %v8910_v33 = vld [vmem:[#allocation71_spill] sm:$0xff] }
 0x25e   :  { %v5185_v7 = vpop.eup %5184  ;;  %v2288_v34 = vsel %vm7544_vm2, %v7378_v44, %v2284_v5  ;;  %v2303_v2 = vsel %vm7559_vm3, %v7389_v10, %v2299_v30  ;;  %v2985_v31 = vmul.f32 %v7366_v20, %v1660_v3  ;;  %v2989_v24 = vmul.f32 %v7492_v52, %v1662_v49 }
 0x25f   :  { %v2348_v44 = vsel %vm7576_vm4, %v7396_v37, %v2344_v41  ;;  %v2366_v10 = vand.u32 2147483648, %v7444_v43  ;;  %5192 = vpow2.f32 %v4499_v63  ;;  %v7588_v35 = vpack.c.bf16 %v2980_v56, %v2976_v55  ;;  %v8909_v63 = vld [vmem:[#allocation70_spill] sm:$0xff] }
 0x260   :  { %v5187_v18 = vpop.eup %5186  ;;  %v2357_v58 = vsub.f32 1.0, %v2356_v57  ;;  %v7590_v60 = vadd.f32 1.0, %v5183_v15  ;;  %v7594_v20 = vadd.f32 %v8908_v50, %v8907_v29  ;;  %v7596_v52 = vpack.c.bf16 %v2989_v24, %v2985_v31  ;;  %v1512_v62 = vpop.f32.mrf.mxu0  ;;  %v4966_v15 = vld [vmem:[#allocation4 + $0x154] sm:$0xf] }
 0x261   :  { %v7598_v8 = vpop.eup %5188  ;;  %v7602_v37 = vmul.f32 %v7502_v0, %v8826_v9  ;;  %vm2350_vm5 = vcmp.eq.f32.partialorder %v2349_v21, 8.507059e+37  ;;  %v2352_v6 = vor.u32 1.1754944e-38, %v2351_v47  ;;  %v7604_v11 = vadd.f32 1.0, %v5185_v7  ;;  %3560 = vmatmul.bf16.vlgmr.msra.gmra.mxu2 %v7588_v35  ;;  %v1561_v27 = vpop.f32.mrf.mxu1  ;;  %v4760_v7 = vld [vmem:[#allocation4 + $0x1d8] sm:$0xf0] }
 0x262   :  { %v7607_v5 = vpop.eup %5190  ;;  %v7610_v46 = vmul.f32 %v2248_v26, %v8844_v16  ;;  %v2293_v30 = vsel %vm7525_vm13, %v7458_v51, %v2288_v34  ;;  %v2308_v9 = vsel %vm7529_vm14, %v7487_v48, %v2303_v2  ;;  %v2364_v0 = vand.u32 2147483647, %v7444_v43  ;;  %3614 = vmatmul.bf16.gmra.mxu3 %v7596_v52  ;;  %v1664_v12 = vpop.f32.mrf.mxu3  ;;  %v4696_v26 = vld [vmem:[#allocation4 + $0x158] sm:$0xf0]  ;;  %v4934_v34 = vld [vmem:[#allocation4 + $0x54] sm:$0xf] }
 0x263   :  { %v2353_v3 = vsel %vm2350_vm5, %v2352_v6, %v2348_v44  ;;  %v7620_v41 = vor.u32 1.1754944e-38, %v2366_v10  ;;  %v4502_v16 = vmul.f32 -1.442695, %v8909_v63  ;;  %v4503_v22 = vmul.f32 -1.442695, %v8910_v33 }
 0x264   :  { %v2358_v51 = vmul.f32 %v7519_v38, %v2357_v58  ;;  %5194 = vrcp.f32 %v7590_v60  ;;  %v7626_v61 = vadd.f32 1.0, %v5187_v18  ;;  %v7629_v48 = vmul.f32 -1.442695, %v7594_v20  ;;  %v1617_v55 = vpop.f32.mrf.mxu2  ;;  %v4568_v2 = vld [vmem:[#allocation4 + $0x58] sm:$0xf0] }
 0x265   :  { %v5193_v28 = vpop.eup %5192  ;;  %v7632_v21 = vmul.f32 %v2293_v30, %v7158_v53  ;;  %v2401_v57 = vmul.f32 %v7598_v8, %v7506_v45  ;;  %v2416_v49 = vmul.f32 %v7607_v5, %v7517_v4  ;;  %5196 = vrcp.f32 %v7604_v11  ;;  %v4950_v44 = vld [vmem:[#allocation4 + $0xd4] sm:$0xf]  ;;  %v4632_v10 = vld [vmem:[#allocation4 + $0xd8] sm:$0xf0] }
 0x266   :  { %v2933_v47 = vmul.f32 %v2308_v9, %v8850_v13  ;;  %v7643_v53 = vmul.f32 %v2353_v3, %v8853_v19  ;;  %vm2360_vm6 = vweird.f32 %v7444_v43  ;;  %v4699_v56 = vor.u32 %v4966_v15, %v4696_v26  ;;  %v8915_v43 = vld [vmem:[#allocation72_spill] sm:$0xff] }
 0x267   :  { %v2411_v54 = vand.u32 2147483648, %v7506_v45  ;;  %5198 = vpow2.f32 %v4502_v16  ;;  %v4763_v31 = vor.u32 %v4982_v32, %v4760_v7  ;;  %v4571_v24 = vor.u32 %v4934_v34, %v4568_v2 }
 0x268   :  { %v2359_v18 = vadd.f32 %v7519_v38, %v2358_v51  ;;  %vm2361_vm7 = vweird.f32 %v7519_v38  ;;  %vm7649_vm8 = vcmp.eq.f32.partialorder %v2364_v0, 8.507059e+37  ;;  %v7653_v19 = vadd.f32 1.0, %v5193_v28  ;;  %3750 = vmatpush.bf16.msrb.mxu2 %v4699_v56  ;;  %v1514_v0 = vpop.f32.mrf.mxu0 }
 0x269   :  { %v4635_v58 = vor.u32 %v4950_v44, %v4632_v10  ;;  %v2402_v29 = vsub.f32 1.0, %v2401_v57  ;;  %v2417_v50 = vsub.f32 1.0, %v2416_v49  ;;  %5200 = vpow2.f32 %v4503_v22  ;;  %3799 = vmatpush.bf16.msrb.mxu3 %v4763_v31  ;;  %3652 = vmatpush.bf16.msrb.mxu0 %v4571_v24  ;;  %v1563_v3 = vpop.f32.mrf.mxu1  ;;  %vm7667_vm10 = vmor %vm2360_vm6, %vm2361_vm7  ;;  %v4624_v10 = vld [vmem:[#allocation4 + $0xc8] sm:$0xf0] }
 0x26a   :  { %v1562_v6 = vadd.f32 %v1561_v27, %v1512_v62  ;;  %v7655_v30 = vpop.eup %5194  ;;  %vm2405_vm9 = vweird.f32 %v7506_v45  ;;  %v2409_v9 = vand.u32 2147483647, %v7506_v45  ;;  %5202 = vrcp.f32 %v7626_v61 }
 0x26b   :  { %v1665_v16 = vadd.f32 %v1664_v12, %v7582_v59  ;;  %3701 = vmatpush.bf16.msrb.mxu1 %v4635_v58  ;;  %v7661_v51 = vpop.eup %5196  ;;  %v7671_v27 = vor.u32 1.1754944e-38, %v2411_v54  ;;  %vm2420_vm11 = vweird.f32 %v7517_v4  ;;  %v2424_v22 = vand.u32 2147483647, %v7517_v4  ;;  %v1666_v12 = vpop.f32.mrf.mxu3  ;;  %3472 = vmatmul.bf16.gmra.mxu0 %v6559_v40 }
 0x26c   :  { %v2426_v28 = vand.u32 2147483648, %v7517_v4  ;;  %v1564_v59 = vadd.f32 %v1563_v3, %v1514_v0  ;;  %v2363_v57 = vsel %vm7667_vm10, %v7519_v38, %v2359_v18  ;;  %5204 = vrcp.f32 %v7653_v19  ;;  %v7690_v24 = vpop.f32.mrf.mxu2 }
 0x26d   :  { %v4507_v49 = vmul.f32 -1.442695, %v8915_v43  ;;  %v1667_v15 = vadd.f32 %v1666_v12, %v1617_v55  ;;  %v5199_v26 = vpop.eup %5198  ;;  %v2403_v32 = vmul.f32 %v7598_v8, %v2402_v29  ;;  %v2418_v56 = vmul.f32 %v7607_v5, %v2417_v50 }
 0x26e   :  { %v2984_v7 = vmul.f32 %v7334_v25, %v1562_v6  ;;  %v2988_v34 = vmul.f32 %v7480_v1, %v1564_v59  ;;  %v2461_v2 = vmul.f32 %v7655_v30, %v7590_v60  ;;  %v2476_v38 = vmul.f32 %v7661_v51, %v7604_v11 }
 0x26f   :  { %v2993_v54 = vmul.f32 %v7610_v46, %v1665_v16  ;;  %v2997_v31 = vmul.f32 %v2933_v47, %v1667_v15  ;;  %v5201_v55 = vpop.eup %5200  ;;  %v7692_v44 = vor.u32 1.1754944e-38, %v2426_v28  ;;  %v2471_v25 = vand.u32 2147483648, %v7590_v60 }
 0x270   :  { %v7696_v18 = vpack.c.bf16 %v2988_v34, %v2984_v7  ;;  %v7698_v1 = vpop.eup %5202  ;;  %vm2406_vm12 = vweird.f32 %v7598_v8  ;;  %vm7701_vm13 = vcmp.eq.f32.partialorder %v2424_v22, 8.507059e+37  ;;  %v2486_v46 = vand.u32 2147483648, %v7604_v11  ;;  %v1517_v22 = vpop.f32.mrf.mxu0  ;;  %v8924_v34 = vld [vmem:[#allocation74_spill] sm:$0xff] }
 0x271   :  { %5206 = vpow2.f32 %v4507_v49  ;;  %v7706_v47 = vpack.c.bf16 %v2997_v31, %v2993_v54  ;;  %v2368_v29 = vsel %vm7649_vm8, %v7620_v41, %v2363_v57  ;;  %v7712_v50 = vadd.f32 %v7598_v8, %v2403_v32  ;;  %v1566_v28 = vpop.f32.mrf.mxu1  ;;  %vm7731_vm1 = vmor %vm2405_vm9, %vm2406_vm12  ;;  %3521 = vmatmul.bf16.gmra.mxu1 %v8924_v34  ;;  %v4980_v54 = vld [vmem:[#allocation4 + $0x1c4] sm:$0xf] }
 0x272   :  { %vm7714_vm14 = vcmp.eq.f32.partialorder %v2409_v9, 8.507059e+37  ;;  %v2419_v0 = vadd.f32 %v7607_v5, %v2418_v56  ;;  %vm2421_vm15 = vweird.f32 %v7607_v5  ;;  %3565 = vmatmul.bf16.gmra.mxu2 %v7696_v18  ;;  %v7721_v3 = vpop.eup %5204  ;;  %v2462_v16 = vsub.f32 1.0, %v2461_v2  ;;  %v4964_v2 = vld [vmem:[#allocation4 + $0x144] sm:$0xf] }
 0x273   :  { %v2477_v62 = vsub.f32 1.0, %v2476_v38  ;;  %v2484_v13 = vand.u32 2147483647, %v7604_v11  ;;  %v7724_v41 = vadd.f32 1.0, %v5201_v55  ;;  %3619 = vmatmul.bf16.gmra.mxu3 %v7706_v47  ;;  %vm2465_vm2 = vweird.f32 %v7590_v60  ;;  %v1669_v15 = vpop.f32.mrf.mxu3  ;;  %vm7750_vm3 = vmor %vm2420_vm11, %vm2421_vm15  ;;  %v4688_v38 = vld [vmem:[#allocation4 + $0x148] sm:$0xf0] }
 0x274   :  { %v7736_v59 = vor.u32 1.1754944e-38, %v2471_v25  ;;  %v2521_v12 = vmul.f32 %v7698_v1, %v7626_v61  ;;  %v7741_v49 = vadd.f32 1.0, %v5199_v26  ;;  %v7744_v32 = vmul.f32 %v2368_v29, %v8868_v36  ;;  %v4932_v29 = vld [vmem:[#allocation4 + $0x44] sm:$0xf] }
 0x275   :  { %vm2466_vm4 = vweird.f32 %v7655_v30  ;;  %vm2480_vm5 = vweird.f32 %v7604_v11  ;;  %v7756_v56 = vor.u32 1.1754944e-38, %v2486_v46  ;;  %v2531_v26 = vand.u32 2147483648, %v7626_v61  ;;  %v4752_v46 = vld [vmem:[#allocation4 + $0x1c8] sm:$0xf0]  ;;  %v4948_v57 = vld [vmem:[#allocation4 + $0xc4] sm:$0xf] }
 0x276   :  { %v2408_v36 = vsel %vm7731_vm1, %v7598_v8, %v7712_v50  ;;  %v2423_v4 = vsel %vm7750_vm3, %v7607_v5, %v2419_v0  ;;  %vm2481_vm6 = vweird.f32 %v7661_v51  ;;  %v2536_v7 = vmul.f32 %v7721_v3, %v7653_v19  ;;  %v1622_v5 = vpop.f32.mrf.mxu2  ;;  %v4560_v50 = vld [vmem:[#allocation4 + $0x48] sm:$0xf0]  ;;  %vm7812_vm11 = vmor %vm2465_vm2, %vm2466_vm4 }
 0x277   :  { %v5207_v31 = vpop.eup %5206  ;;  %v2463_v55 = vmul.f32 %v7655_v30, %v2462_v16  ;;  %v2478_v8 = vmul.f32 %v7661_v51, %v2477_v62  ;;  %5208 = vrcp.f32 %v7724_v41  ;;  %v4691_v25 = vor.u32 %v4964_v2, %v4688_v38 }
 0x278   :  { %v2522_v0 = vsub.f32 1.0, %v2521_v12  ;;  %5210 = vrcp.f32 %v7741_v49  ;;  %v4755_v9 = vor.u32 %v4980_v54, %v4752_v46  ;;  %v4563_v45 = vor.u32 %v4932_v29, %v4560_v50 }
 0x279   :  { %v7775_v34 = vor.u32 1.1754944e-38, %v2531_v26  ;;  %v2544_v16 = vand.u32 2147483647, %v7653_v19  ;;  %v2546_v62 = vand.u32 2147483648, %v7653_v19  ;;  %3751 = vmatpush.bf16.msrb.mxu2 %v4691_v25  ;;  %v4627_v40 = vor.u32 %v4948_v57, %v4624_v10 }
 0x27a   :  { %v2428_v2 = vsel %vm7701_vm13, %v7692_v44, %v2423_v4  ;;  %v8925_v12 = vand.u32 2147483647, %v7590_v60  ;;  %vm7788_vm8 = vcmp.eq.f32.partialorder %v2484_v13, 8.507059e+37  ;;  %vm2525_vm9 = vweird.f32 %v7626_v61  ;;  %3800 = vmatpush.bf16.msrb.mxu3 %v4755_v9  ;;  %3653 = vmatpush.bf16.msrb.mxu0 %v4563_v45  ;;  %v1519_v13 = vpop.f32.mrf.mxu0  ;;  %v1568_v4 = vpop.f32.mrf.mxu1  ;;  %vm7824_vm13 = vmor %vm2480_vm5, %vm2481_vm6 }
 0x27b   :  { %v2537_v26 = vsub.f32 1.0, %v2536_v7  ;;  %v7793_v46 = vadd.f32 1.0, %v5207_v31  ;;  %v1567_v10 = vadd.f32 %v1566_v28, %v1517_v22  ;;  %v2413_v44 = vsel %vm7714_vm14, %v7671_v27, %v2408_v36  ;;  %3702 = vmatpush.bf16.msrb.mxu1 %v4627_v40  ;;  %v8930_v22 = vld [vmem:[#allocation82_spill] sm:$0xff]  ;;  %v1671_v6 = vpop.f32.mrf.mxu3 }
 0x27c   :  { %vm7784_vm7 = vcmp.eq.f32.partialorder %v8925_v12, 8.507059e+37  ;;  %v2464_v58 = vadd.f32 %v7655_v30, %v2463_v55  ;;  %v2479_v57 = vadd.f32 %v7661_v51, %v2478_v8  ;;  %v1670_v25 = vadd.f32 %v1669_v15, %v7690_v24  ;;  %v8933_v24 = vld [vmem:[#allocation83_spill] sm:$0xff] }
 0x27d   :  { %v2523_v7 = vmul.f32 %v7698_v1, %v2522_v0  ;;  %vm2540_vm10 = vweird.f32 %v7653_v19  ;;  %5212 = vpow2.f32 %v7629_v48  ;;  %v4511_v28 = vmul.f32 -1.442695, %v8930_v22  ;;  %v7805_v27 = vpop.eup %5208 }
 0x27e   :  { %v1569_v31 = vadd.f32 %v1568_v4, %v1519_v13  ;;  %v2941_v36 = vmul.f32 %v2428_v2, %v8877_v42  ;;  %vm2526_vm12 = vweird.f32 %v7698_v1  ;;  %v4515_v48 = vmul.f32 -1.442695, %v8933_v24  ;;  %v7818_v55 = vpop.eup %5210  ;;  %v7845_v2 = vpop.f32.mrf.mxu2 }
 0x27f   :  { %v1672_v15 = vadd.f32 %v1671_v6, %v1622_v5  ;;  %v8936_v60 = vand.u32 2147483647, %v7626_v61  ;;  %v2538_v29 = vmul.f32 %v7721_v3, %v2537_v26  ;;  %5214 = vrcp.f32 %v7793_v46  ;;  %vm7877_vm2 = vmor %vm2525_vm9, %vm2526_vm12 }
 0x280   :  { %v2992_v5 = vmul.f32 %v7602_v37, %v1567_v10  ;;  %v2996_v50 = vmul.f32 %v7632_v21, %v1569_v31  ;;  %v2468_v11 = vsel %vm7812_vm11, %v7655_v30, %v2464_v58  ;;  %v2483_v0 = vsel %vm7824_vm13, %v7661_v51, %v2479_v57 }
 0x281   :  { %vm7830_vm14 = vcmp.eq.f32.partialorder %v8936_v60, 8.507059e+37  ;;  %v3001_v9 = vmul.f32 %v7744_v32, %v1670_v25  ;;  %v3005_v45 = vmul.f32 %v2941_v36, %v1672_v15  ;;  %v2524_v12 = vadd.f32 %v7698_v1, %v2523_v7  ;;  %v8946_v15 = vld [vmem:[#allocation65_spill] sm:$0xff]  ;;  %v8947_v60 = vld [vmem:[#allocation66_spill] sm:$0xff] }
 0x282   :  { %v2596_v37 = vmul.f32 %v7805_v27, %v7724_v41  ;;  %5216 = vpow2.f32 %v4511_v28  ;;  %v7850_v21 = vpack.c.bf16 %v2996_v50, %v2992_v5  ;;  %v2581_v30 = vmul.f32 %v7818_v55, %v7741_v49  ;;  %v1522_v25 = vpop.f32.mrf.mxu0  ;;  %v1571_v7 = vpop.f32.mrf.mxu1  ;;  %v8948_v5 = vld [vmem:[#allocation78_spill] sm:$0xff]  ;;  %v8949_v50 = vld [vmem:[#allocation79_spill] sm:$0xff] }
 0x283   :  { %v2606_v26 = vand.u32 2147483648, %v7724_v41  ;;  %5218 = vpow2.f32 %v4515_v48  ;;  %v7855_v51 = vpack.c.bf16 %v3005_v45, %v3001_v9  ;;  %v5213_v32 = vpop.eup %5212  ;;  %v7858_v10 = vmul.f32 %v2413_v44, %v7362_v23  ;;  %v1674_v28 = vpop.f32.mrf.mxu3  ;;  %3477 = vmatmul.bf16.gmra.mxu0 %v8948_v5  ;;  %3526 = vmatmul.bf16.gmra.mxu1 %v8949_v50  ;;  %v4978_v9 = vld [vmem:[#allocation4 + $0x1b4] sm:$0xf]  ;;  %v4552_v23 = vld [vmem:[#allocation4 + $0x38] sm:$0xf0] }
 0x284   :  { %v2539_v58 = vadd.f32 %v7721_v3, %v2538_v29  ;;  %vm2541_vm15 = vweird.f32 %v7721_v3  ;;  %vm7862_vm1 = vcmp.eq.f32.partialorder %v2544_v16, 8.507059e+37  ;;  %3570 = vmatmul.bf16.gmra.mxu2 %v7850_v21  ;;  %v2473_v13 = vsel %vm7784_vm7, %v7736_v59, %v2468_v11  ;;  %v4962_v11 = vld [vmem:[#allocation4 + $0x134] sm:$0xf] }
 0x285   :  { %v2488_v4 = vsel %vm7788_vm8, %v7756_v56, %v2483_v0  ;;  %v2547_v16 = vor.u32 1.1754944e-38, %v2546_v62  ;;  %v2589_v44 = vand.u32 2147483647, %v7741_v49  ;;  %3624 = vmatmul.bf16.gmra.mxu3 %v7855_v51  ;;  %v7883_v59 = vpop.eup %5214  ;;  %v2528_v56 = vsel %vm7877_vm2, %v7698_v1, %v2524_v12  ;;  %vm7894_vm3 = vmor %vm2540_vm10, %vm2541_vm15  ;;  %v8945_v1 = vld [vmem:[#allocation73_spill] sm:$0xff]  ;;  %v4680_v0 = vld [vmem:[#allocation4 + $0x138] sm:$0xf0] }
 0x286   :  { %v2591_v38 = vand.u32 2147483648, %v7741_v49  ;;  %v2597_v61 = vsub.f32 1.0, %v2596_v37  ;;  %v2604_v54 = vand.u32 2147483647, %v7724_v41  ;;  %v2582_v31 = vsub.f32 1.0, %v2581_v30  ;;  %v8950_v30 = vld [vmem:[#allocation75_spill] sm:$0xff] }
 0x287   :  { %v7898_v6 = vor.u32 1.1754944e-38, %v2606_v26  ;;  %v7900_v36 = vadd.f32 1.0, %v5213_v32  ;;  %v4510_v40 = vmul.f32 -1.442695, %v8945_v1  ;;  %v7904_v42 = vmul.f32 %v2473_v13, %v8946_v15  ;;  %v1627_v32 = vpop.f32.mrf.mxu2  ;;  %v4744_v13 = vld [vmem:[#allocation4 + $0x1b8] sm:$0xf0] }
 0x288   :  { %v5217_v48 = vpop.eup %5216  ;;  %v2945_v29 = vmul.f32 %v2488_v4, %v8947_v60  ;;  %v2543_v19 = vsel %vm7894_vm3, %v7721_v3, %v2539_v58  ;;  %vm2600_vm4 = vweird.f32 %v7724_v41  ;;  %v7916_v12 = vsel %vm7830_vm14, %v7775_v34, %v2528_v56  ;;  %v8951_v3 = vld [vmem:[#allocation76_spill] sm:$0xff]  ;;  %v4930_v4 = vld [vmem:[#allocation4 + $0x34] sm:$0xf]  ;;  %v4616_v56 = vld [vmem:[#allocation4 + $0xb8] sm:$0xf0] }
 0x289   :  { %v5219_v45 = vpop.eup %5218  ;;  %v2656_v37 = vmul.f32 %v7883_v59, %v7793_v46  ;;  %v7922_v26 = vadd.f32 %v8951_v3, %v8950_v30  ;;  %v4683_v58 = vor.u32 %v4962_v11, %v4680_v0  ;;  %vm2586_vm5 = vweird.f32 %v7818_v55  ;;  %v4946_v34 = vld [vmem:[#allocation4 + $0xb4] sm:$0xf] }
 0x28a   :  { %v2598_v62 = vmul.f32 %v7805_v27, %v2597_v61  ;;  %v4747_v15 = vor.u32 %v4978_v9, %v4744_v13  ;;  %v4555_v8 = vor.u32 %v4930_v4, %v4552_v23  ;;  %v2548_v60 = vsel %vm7862_vm1, %v2547_v16, %v2543_v19  ;;  %v1524_v19 = vpop.f32.mrf.mxu0  ;;  %v1573_v9 = vpop.f32.mrf.mxu1  ;;  %v8952_v13 = vld [vmem:[#allocation23_spill] sm:$0xff] }
 0x28b   :  { %vm2585_vm6 = vweird.f32 %v7741_v49  ;;  %vm2601_vm7 = vweird.f32 %v7805_v27  ;;  %v7930_v30 = vadd.f32 1.0, %v5217_v48  ;;  %3752 = vmatpush.bf16.msrb.mxu2 %v4683_v58  ;;  %v4619_v11 = vor.u32 %v4946_v34, %v4616_v56 }
 0x28c   :  { %v2583_v0 = vmul.f32 %v7818_v55, %v2582_v31  ;;  %5220 = vpow2.f32 %v4510_v40  ;;  %v7933_v3 = vadd.f32 1.0, %v5219_v45  ;;  %v1572_v61 = vadd.f32 %v1571_v7, %v1522_v25  ;;  %3801 = vmatpush.bf16.msrb.mxu3 %v4747_v15  ;;  %3654 = vmatpush.bf16.msrb.mxu0 %v4555_v8  ;;  %v8953_v40 = vld [vmem:[#allocation35_spill] sm:$0xff]  ;;  %v8954_v45 = vld [vmem:[#allocation32_spill] sm:$0xff]  ;;  %v1676_v7 = vpop.f32.mrf.mxu3  ;;  %vm7959_vm9 = vmor %vm2600_vm4, %vm2601_vm7 }
 0x28d   :  { %5222 = vrcp.f32 %v7900_v36  ;;  %v2657_v57 = vsub.f32 1.0, %v2656_v37  ;;  %v4514_v16 = vmul.f32 -1.442695, %v7922_v26  ;;  %v1675_v48 = vadd.f32 %v1674_v28, %v7845_v2  ;;  %3703 = vmatpush.bf16.msrb.mxu1 %v4619_v11  ;;  %v8957_v2 = vld [vmem:[#allocation28_spill] sm:$0xff]  ;;  %vm7986_vm10 = vmor %vm2585_vm6, %vm2586_vm5 }
 0x28e   :  { %v2599_v58 = vadd.f32 %v7805_v27, %v2598_v62  ;;  %v4519_v31 = vmul.f32 -1.442695, %v8952_v13  ;;  %v1383_v4 = vadd.f32 %v8954_v45, %v8953_v40  ;;  %v1574_v25 = vadd.f32 %v1573_v9, %v1524_v19 }
 0x28f   :  { %v2949_v23 = vmul.f32 %v2548_v60, %v8900_v14  ;;  %vm7945_vm8 = vcmp.eq.f32.partialorder %v2589_v44, 8.507059e+37  ;;  %5224 = vrcp.f32 %v7930_v30  ;;  %v4523_v28 = vmul.f32 -1.442695, %v8957_v2  ;;  %v7964_v60 = vpop.f32.mrf.mxu2 }
 0x290   :  { %v1677_v62 = vadd.f32 %v1676_v7, %v1627_v32  ;;  %v2584_v15 = vadd.f32 %v7818_v55, %v2583_v0  ;;  %5226 = vrcp.f32 %v7933_v3  ;;  %v3000_v8 = vmul.f32 %v7643_v53, %v1572_v61 }
 0x291   :  { %v3004_v34 = vmul.f32 %v7858_v10, %v1574_v25  ;;  %v2658_v44 = vmul.f32 %v7883_v59, %v2657_v57  ;;  %5228 = vpow2.f32 %v4514_v16  ;;  %v3009_v32 = vmul.f32 %v2945_v29, %v1675_v48  ;;  %v8960_v10 = vld [vmem:[#allocation77_spill] sm:$0xff]  ;;  %v8966_v25 = vld [vmem:[#allocation84_spill] sm:$0xff] }
 0x292   :  { %v3013_v56 = vmul.f32 %v2949_v23, %v1677_v62  ;;  %v5221_v11 = vpop.eup %5220  ;;  %v2603_v53 = vsel %vm7959_vm9, %v7805_v27, %v2599_v58  ;;  %5230 = vpow2.f32 %v4519_v31  ;;  %v3010_v0 = vmul.f32 %v8960_v10, %v1383_v4  ;;  %v8963_v16 = vld [vmem:[#allocation45_spill] sm:$0xff]  ;;  %v1527_v49 = vpop.f32.mrf.mxu0  ;;  %v8967_v23 = vld [vmem:[#allocation34_spill] sm:$0xff]  ;;  %v4960_v10 = vld [vmem:[#allocation4 + $0x124] sm:$0xf] }
 0x293   :  { %v7970_v61 = vpack.c.bf16 %v3004_v34, %v3000_v8  ;;  %v7972_v19 = vpop.eup %5222  ;;  %v2651_v9 = vand.u32 2147483648, %v7900_v36  ;;  %v2666_v57 = vand.u32 2147483648, %v7793_v46  ;;  %5232 = vpow2.f32 %v4523_v28  ;;  %v4736_v27 = vld [vmem:[#allocation4 + $0x1a8] sm:$0xf0]  ;;  %v4944_v8 = vld [vmem:[#allocation4 + $0xa4] sm:$0xf] }
 0x294   :  { %v7976_v29 = vpack.c.bf16 %v3013_v56, %v3009_v32  ;;  %v7980_v48 = vmul.f32 %v7916_v12, %v8963_v16  ;;  %v2592_v58 = vor.u32 1.1754944e-38, %v2591_v38  ;;  %vm2605_vm11 = vcmp.eq.f32.partialorder %v2604_v54, 8.507059e+37  ;;  %v1576_v38 = vpop.f32.mrf.mxu1  ;;  %v8973_v54 = vld [vmem:[#allocation81_spill] sm:$0xff] }
 0x295   :  { %8961 = vst [vmem:[#allocation8_spill] sm:$0xff] %v7970_v61  ;;  %vm2661_vm12 = vweird.f32 %v7883_v59  ;;  %3575 = vmatmul.bf16.gmra.mxu2 %v7970_v61  ;;  %v7996_v12 = vpop.eup %5224  ;;  %v2588_v31 = vsel %vm7986_vm10, %v7818_v55, %v2584_v15  ;;  %v2608_v40 = vsel %vm2605_vm11, %v7898_v6, %v2603_v53  ;;  %v2659_v45 = vadd.f32 %v7883_v59, %v2658_v44  ;;  %v1679_v6 = vpop.f32.mrf.mxu3  ;;  %v8971_v53 = vld [vmem:[#allocation11_spill] sm:$0xff] }
 0x296   :  { %8962 = vst [vmem:[#allocation42_spill] sm:$0xff] %v7976_v29  ;;  %v8003_v4 = vadd.f32 1.0, %v5221_v11  ;;  %3629 = vmatmul.bf16.gmra.mxu3 %v7976_v29  ;;  %v8006_v41 = vpop.eup %5226  ;;  %vm2660_vm13 = vweird.f32 %v7793_v46  ;;  %v4518_v7 = vmul.f32 -1.442695, %v8966_v25  ;;  %v8012_v55 = vpack.c.bf16 %v3010_v0, %v8967_v23  ;;  %3531 = vmatmul.bf16.gmra.mxu1 %v8971_v53  ;;  %v4672_v0 = vld [vmem:[#allocation4 + $0x128] sm:$0xf0] }
 0x297   :  { %v5229_v28 = vpop.eup %5228  ;;  %v2641_v62 = vmul.f32 %v7972_v19, %v7900_v36  ;;  %v8016_v15 = vor.u32 1.1754944e-38, %v2651_v9  ;;  %vm8020_vm14 = vmor %vm2660_vm13, %vm2661_vm12  ;;  %v2664_v34 = vand.u32 2147483647, %v7793_v46  ;;  %v2667_v14 = vor.u32 1.1754944e-38, %v2666_v57  ;;  %v4976_v9 = vld [vmem:[#allocation4 + $0x1a4] sm:$0xf]  ;;  %v1632_v37 = vpop.f32.mrf.mxu2 }
 0x298   :  { %8968 = vst [vmem:[#allocation43_spill] sm:$0xff] %v8012_v55  ;;  %v5231_v44 = vpop.eup %5230  ;;  %v8027_v32 = vsel %vm7945_vm8, %v2592_v58, %v2588_v31  ;;  %v2953_v56 = vmul.f32 %v2608_v40, %v8910_v33  ;;  %v2716_v11 = vmul.f32 %v7996_v12, %v7930_v30  ;;  %3482 = vmatmul.bf16.gmra.mxu0 %v8012_v55  ;;  %5234 = vrcp.f32 %v8003_v4  ;;  %v4928_v58 = vld [vmem:[#allocation4 + $0x24] sm:$0xf]  ;;  %v4544_v31 = vld [vmem:[#allocation4 + $0x28] sm:$0xf0] }
 0x299   :  { %v5233_v16 = vpop.eup %5232  ;;  %v2663_v46 = vsel %vm8020_vm14, %v7883_v59, %v2659_v45  ;;  %v2776_v33 = vmul.f32 %v8006_v41, %v7933_v3  ;;  %v4675_v57 = vor.u32 %v4960_v10, %v4672_v0  ;;  %v8040_v40 = vadd.f32 1.0, %v5229_v28  ;;  %v8972_v23 = vld [vmem:[#allocation80_spill] sm:$0xff]  ;;  %v4608_v59 = vld [vmem:[#allocation4 + $0xa8] sm:$0xf0] }
 0x29a   :  { %v8044_v53 = vadd.f32 %v8973_v54, %v8972_v23  ;;  %v4739_v55 = vor.u32 %v4976_v9, %v4736_v27  ;;  %v4547_v29 = vor.u32 %v4928_v58, %v4544_v31  ;;  %v2642_v45 = vsub.f32 1.0, %v2641_v62  ;;  %v1529_v27 = vpop.f32.mrf.mxu0 }
 0x29b   :  { %vm2665_vm15 = vcmp.eq.f32.partialorder %v2664_v34, 8.507059e+37  ;;  %v8046_v61 = vadd.f32 1.0, %v5231_v44  ;;  %3753 = vmatpush.bf16.msrb.mxu2 %v4675_v57  ;;  %v4611_v50 = vor.u32 %v4944_v8, %v4608_v59  ;;  %vm2645_vm1 = vweird.f32 %v7900_v36 }
 0x29c   :  { %v2668_v10 = vsel %vm2665_vm15, %v2667_v14, %v2663_v46  ;;  %v2717_v0 = vsub.f32 1.0, %v2716_v11  ;;  %v8049_v28 = vadd.f32 1.0, %v5233_v16  ;;  %v1577_v5 = vadd.f32 %v1576_v38, %v1527_v49  ;;  %3802 = vmatpush.bf16.msrb.mxu3 %v4739_v55  ;;  %3655 = vmatpush.bf16.msrb.mxu0 %v4547_v29  ;;  %v1578_v62 = vpop.f32.mrf.mxu1  ;;  %v8974_v14 = vld [vmem:[#allocation39_spill] sm:$0xff]  ;;  %v8975_v11 = vld [vmem:[#allocation12_spill] sm:$0xff] }
 0x29d   :  { %v2724_v54 = vand.u32 2147483647, %v7930_v30  ;;  %v2777_v9 = vsub.f32 1.0, %v2776_v33  ;;  %5236 = vpow2.f32 %v4518_v7  ;;  %v1680_v34 = vadd.f32 %v1679_v6, %v7964_v60  ;;  %3704 = vmatpush.bf16.msrb.mxu1 %v4611_v50  ;;  %v1681_v49 = vpop.f32.mrf.mxu3 }
 0x29e   :  { %5238 = vrcp.f32 %v8040_v40  ;;  %v4522_v44 = vmul.f32 -1.442695, %v8044_v53  ;;  %v1388_v16 = vadd.f32 %v8975_v11, %v8974_v14  ;;  %v1579_v46 = vadd.f32 %v1578_v62, %v1529_v27  ;;  %v8057_v38 = vpop.eup %5234 }
 0x29f   :  { %v2643_v29 = vmul.f32 %v7972_v19, %v2642_v45  ;;  %v2957_v7 = vmul.f32 %v2668_v10, %v8915_v43  ;;  %5240 = vrcp.f32 %v8046_v61  ;;  %v1682_v55 = vadd.f32 %v1681_v49, %v1632_v37  ;;  %v8074_v23 = vpop.f32.mrf.mxu2 }
 0x2a0   :  { %v2718_v50 = vmul.f32 %v7996_v12, %v2717_v0  ;;  %5242 = vrcp.f32 %v8049_v28  ;;  %v3008_v60 = vmul.f32 %v7904_v42, %v1577_v5  ;;  %v3012_v6 = vmul.f32 %v7980_v48, %v1579_v46  ;;  %v8979_v42 = vld [vmem:[#allocation33_spill] sm:$0xff] }
 0x2a1   :  { %v8976_v33 = vand.u32 2147483647, %v7900_v36  ;;  %v2726_v58 = vand.u32 2147483648, %v7930_v30  ;;  %v2778_v43 = vmul.f32 %v8006_v41, %v2777_v9  ;;  %v3017_v31 = vmul.f32 %v2953_v56, %v1680_v34  ;;  %v4926_v34 = vld [vmem:[#allocation4 + $0x14] sm:$0xf] }
 0x2a2   :  { %v3021_v37 = vmul.f32 %v2957_v7, %v1682_v55  ;;  %vm2646_vm3 = vweird.f32 %v7972_v19  ;;  %5244 = vpow2.f32 %v4522_v44  ;;  %v3018_v5 = vmul.f32 %v8979_v42, %v1388_v16  ;;  %v1532_v16 = vpop.f32.mrf.mxu0  ;;  %v8989_v42 = vld [vmem:[#allocation85_spill] sm:$0xff]  ;;  %v4536_v36 = vld [vmem:[#allocation4 + $0x18] sm:$0xf0] }
 0x2a3   :  { %vm8068_vm2 = vcmp.eq.f32.partialorder %v8976_v33, 8.507059e+37  ;;  %v8078_v48 = vpack.c.bf16 %v3012_v6, %v3008_v60  ;;  %v5237_v8 = vpop.eup %5236  ;;  %v2644_v59 = vadd.f32 %v7972_v19, %v2643_v29  ;;  %v8083_v45 = vmul.f32 %v8057_v38, %v8003_v4  ;;  %vm8101_vm6 = vmor %vm2645_vm1, %vm2646_vm3  ;;  %v8986_v29 = vld [vmem:[#allocation36_spill] sm:$0xff]  ;;  %v4600_v9 = vld [vmem:[#allocation4 + $0x98] sm:$0xf0] }
 0x2a4   :  { %vm2721_vm4 = vweird.f32 %v7996_v12  ;;  %v8086_v56 = vpack.c.bf16 %v3021_v37, %v3017_v31  ;;  %v8088_v10 = vpop.eup %5238  ;;  %v2719_v27 = vadd.f32 %v7996_v12, %v2718_v50  ;;  %vm2781_vm5 = vweird.f32 %v8006_v41  ;;  %v1581_v46 = vpop.f32.mrf.mxu1 }
 0x2a5   :  { %3580 = vmatmul.bf16.gmra.mxu2 %v8078_v48  ;;  %v8095_v62 = vpop.eup %5240  ;;  %vm2720_vm7 = vweird.f32 %v7930_v30  ;;  %vm8106_vm8 = vcmp.eq.f32.partialorder %v2724_v54, 8.507059e+37  ;;  %v2727_v14 = vor.u32 1.1754944e-38, %v2726_v58  ;;  %v2779_v11 = vadd.f32 %v8006_v41, %v2778_v43  ;;  %v1684_v55 = vpop.f32.mrf.mxu3 }
 0x2a6   :  { %3634 = vmatmul.bf16.gmra.mxu3 %v8086_v56  ;;  %v8112_v49 = vpop.eup %5242  ;;  %vm8116_vm9 = vmor %vm2720_vm7, %vm2721_vm4  ;;  %vm2780_vm10 = vweird.f32 %v7933_v3  ;;  %v2786_v54 = vand.u32 2147483648, %v7933_v3  ;;  %v8124_v7 = vpack.c.bf16 %v3018_v5, %v8986_v29  ;;  %v2648_v50 = vsel %vm8101_vm6, %v7972_v19, %v2644_v59  ;;  %3536 = vmatmul.bf16.gmra.mxu1 %v8989_v42  ;;  %v4958_v5 = vld [vmem:[#allocation4 + $0x114] sm:$0xf]  ;;  %v4664_v59 = vld [vmem:[#allocation4 + $0x118] sm:$0xf0] }
 0x2a7   :  { %v2702_v60 = vsub.f32 1.0, %v8083_v45  ;;  %vm8132_vm11 = vmor %vm2780_vm10, %vm2781_vm5  ;;  %v2784_v33 = vand.u32 2147483647, %v7933_v3  ;;  %v8137_v58 = vadd.f32 1.0, %v5237_v8  ;;  %v2952_v31 = vmul.f32 %v8027_v32, %v8909_v63  ;;  %v4974_v3 = vld [vmem:[#allocation4 + $0x194] sm:$0xf]  ;;  %v1637_v32 = vpop.f32.mrf.mxu2 }
 0x2a8   :  { %v5245_v43 = vpop.eup %5244  ;;  %v2723_v19 = vsel %vm8116_vm9, %v7996_v12, %v2719_v27  ;;  %v2761_v37 = vmul.f32 %v8088_v10, %v8040_v40  ;;  %3487 = vmatmul.bf16.gmra.mxu0 %v8124_v7  ;;  %v2783_v8 = vsel %vm8132_vm11, %v8006_v41, %v2779_v11  ;;  %v2836_v63 = vmul.f32 %v8095_v62, %v8046_v61  ;;  %v4728_v27 = vld [vmem:[#allocation4 + $0x198] sm:$0xf0]  ;;  %v4942_v11 = vld [vmem:[#allocation4 + $0x94] sm:$0xf] }
 0x2a9   :  { %v2896_v12 = vmul.f32 %v8112_v49, %v8049_v28  ;;  %v4667_v45 = vor.u32 %v4958_v5, %v4664_v59  ;;  %v2653_v29 = vsel %vm8068_vm2, %v8016_v15, %v2648_v50  ;;  %vm2705_vm12 = vweird.f32 %v8003_v4 }
 0x2aa   :  { %v2787_v30 = vor.u32 1.1754944e-38, %v2786_v54  ;;  %v4731_v6 = vor.u32 %v4974_v3, %v4728_v27  ;;  %v4539_v41 = vor.u32 %v4926_v34, %v4536_v36  ;;  %vm2706_vm13 = vweird.f32 %v8057_v38  ;;  %v8990_v54 = vld [vmem:[#allocation25_spill] sm:$0xff] }
 0x2ab   :  { %vm2785_vm14 = vcmp.eq.f32.partialorder %v2784_v33, 8.507059e+37  ;;  %v8160_v0 = vadd.f32 1.0, %v5245_v43  ;;  %3754 = vmatpush.bf16.msrb.mxu2 %v4667_v45  ;;  %v4603_v5 = vor.u32 %v4942_v11, %v4600_v9  ;;  %v2728_v59 = vsel %vm8106_vm8, %v2727_v14, %v2723_v19  ;;  %v1534_v45 = vpop.f32.mrf.mxu0  ;;  %vm8200_vm4 = vmor %vm2705_vm12, %vm2706_vm13 }
 0x2ac   :  { %v2762_v42 = vsub.f32 1.0, %v2761_v37  ;;  %v2788_v57 = vsel %vm2785_vm14, %v2787_v30, %v2783_v8  ;;  %v1582_v15 = vadd.f32 %v1581_v46, %v1532_v16  ;;  %3803 = vmatpush.bf16.msrb.mxu3 %v4731_v6  ;;  %3656 = vmatpush.bf16.msrb.mxu0 %v4539_v41  ;;  %v8991_v50 = vand.u32 2147483647, %v8990_v54  ;;  %v1583_v9 = vpop.f32.mrf.mxu1  ;;  %v8994_v16 = vld [vmem:[#allocation13_spill] sm:$0xff] }
 0x2ad   :  { %v2956_v33 = vmul.f32 %v2653_v29, %v7594_v20  ;;  %v2837_v43 = vsub.f32 1.0, %v2836_v63  ;;  %v2897_v27 = vsub.f32 1.0, %v2896_v12  ;;  %v1685_v44 = vadd.f32 %v1684_v55, %v8074_v23  ;;  %3705 = vmatpush.bf16.msrb.mxu1 %v4603_v5  ;;  %v8995_v46 = vld [vmem:[#allocation41_spill] sm:$0xff]  ;;  %v1686_v37 = vpop.f32.mrf.mxu3 }
 0x2ae   :  { %vm8166_vm15 = vcmp.eq.f32.partialorder %v8991_v50, 8.507059e+37  ;;  %v2703_v14 = vmul.f32 %v8057_v38, %v2702_v60  ;;  %5246 = vrcp.f32 %v8137_v58  ;;  %v1393_v30 = vadd.f32 %v8995_v46, %v8994_v16 }
 0x2af   :  { %v1584_v19 = vadd.f32 %v1583_v9, %v1534_v45  ;;  %v2961_v8 = vmul.f32 %v2728_v59, %v8930_v22  ;;  %v2965_v20 = vmul.f32 %v2788_v57, %v8933_v24  ;;  %5248 = vrcp.f32 %v8160_v0  ;;  %v8194_v41 = vpop.f32.mrf.mxu2 }
 0x2b0   :  { %v1687_v63 = vadd.f32 %v1686_v37, %v1637_v32  ;;  %v2763_v12 = vmul.f32 %v8088_v10, %v2762_v42  ;;  %vm2766_vm1 = vweird.f32 %v8088_v10  ;;  %v3016_v23 = vmul.f32 %v2952_v31, %v1582_v15  ;;  %v8999_v42 = vld [vmem:[#allocation26_spill] sm:$0xff]  ;;  %v9012_v37 = vld [vmem:[#allocation29_spill] sm:$0xff] }
 0x2b1   :  { %v3020_v55 = vmul.f32 %v2956_v33, %v1584_v19  ;;  %v8996_v60 = vand.u32 2147483647, %v8003_v4  ;;  %v2838_v36 = vmul.f32 %v8095_v62, %v2837_v43  ;;  %v2898_v22 = vmul.f32 %v8112_v49, %v2897_v27  ;;  %v9011_v19 = vld [vmem:[#allocation40_spill] sm:$0xff]  ;;  %v4720_v33 = vld [vmem:[#allocation4 + $0x188] sm:$0xf0] }
 0x2b2   :  { %v3025_v24 = vmul.f32 %v2961_v8, %v1685_v44  ;;  %v3029_v29 = vmul.f32 %v2965_v20, %v1687_v63  ;;  %v2704_v32 = vadd.f32 %v8057_v38, %v2703_v14  ;;  %vm2841_vm3 = vweird.f32 %v8095_v62  ;;  %v9014_v20 = vld [vmem:[#allocation22_spill] sm:$0xff] }
 0x2b3   :  { %vm8183_vm2 = vcmp.eq.f32.partialorder %v8996_v60, 8.507059e+37  ;;  %v3026_v6 = vmul.f32 %v8999_v42, %v1393_v30  ;;  %v8192_v31 = vpack.c.bf16 %v3020_v55, %v3016_v23  ;;  %v9002_v5 = vand.u32 2147483648, %v8003_v4  ;;  %v1537_v16 = vpop.f32.mrf.mxu0  ;;  %v9015_v23 = vld [vmem:[#allocation27_spill] sm:$0xff]  ;;  %v4956_v30 = vld [vmem:[#allocation4 + $0x104] sm:$0xf]  ;;  %v9019_v4 = vld [vmem:[#allocation30_spill] sm:$0xff] }
 0x2b4   :  { %vm2765_vm5 = vweird.f32 %v8040_v40  ;;  %v2771_v57 = vand.u32 2147483648, %v8040_v40  ;;  %v8208_v15 = vpack.c.bf16 %v3029_v29, %v3025_v24  ;;  %v8210_v54 = vpop.eup %5246  ;;  %v2764_v50 = vadd.f32 %v8088_v10, %v2763_v12  ;;  %v1586_v46 = vpop.f32.mrf.mxu1  ;;  %v4940_v24 = vld [vmem:[#allocation4 + $0x84] sm:$0xf] }
 0x2b5   :  { %v2712_v59 = vor.u32 1.1754944e-38, %v9002_v5  ;;  %vm8215_vm6 = vmor %vm2765_vm5, %vm2766_vm1  ;;  %v9005_v43 = vand.u32 2147483647, %v8040_v40  ;;  %vm2840_vm8 = vweird.f32 %v8046_v61  ;;  %vm2901_vm9 = vweird.f32 %v8112_v49  ;;  %3585 = vmatmul.bf16.gmra.mxu2 %v8192_v31  ;;  %v8228_v27 = vpop.eup %5248  ;;  %v1689_v60 = vpop.f32.mrf.mxu3 }
 0x2b6   :  { %v2839_v45 = vadd.f32 %v8095_v62, %v2838_v36  ;;  %vm8233_vm10 = vmor %vm2840_vm8, %vm2841_vm3  ;;  %v2846_v40 = vand.u32 2147483648, %v8046_v61  ;;  %v2899_v44 = vadd.f32 %v8112_v49, %v2898_v22  ;;  %v2906_v14 = vand.u32 2147483648, %v8049_v28  ;;  %3639 = vmatmul.bf16.gmra.mxu3 %v8208_v15  ;;  %v4924_v36 = vld [vmem:[#allocation4 + $0x4] sm:$0xf]  ;;  %v4528_v22 = vld [vmem:[#allocation4 + $0x8] sm:$0xf0] }
 0x2b7   :  { %vm8221_vm7 = vcmp.eq.f32.partialorder %v9005_v43, 8.507059e+37  ;;  %v9013_v8 = vsel %vm7124_vm0, %v9011_v19, %v9012_v37  ;;  %v2708_v12 = vsel %vm8200_vm4, %v8057_v38, %v2704_v32  ;;  %vm2900_vm11 = vweird.f32 %v8049_v28  ;;  %v4656_v19 = vld [vmem:[#allocation4 + $0x108] sm:$0xf0]  ;;  %v4972_v37 = vld [vmem:[#allocation4 + $0x184] sm:$0xf] }
 0x2b8   :  { %v2863_v63 = vsel %vm8166_vm15, %v9014_v20, %v9013_v8  ;;  %v8254_v55 = vpack.c.bf16 %v3026_v6, %v9015_v23  ;;  %v2821_v29 = vmul.f32 %v8210_v54, %v8137_v58  ;;  %v2844_v42 = vand.u32 2147483647, %v8046_v61  ;;  %vm8261_vm0 = vmor %vm2900_vm11, %vm2901_vm9  ;;  %v4592_v6 = vld [vmem:[#allocation4 + $0x88] sm:$0xf0] }
 0x2b9   :  { %v2904_v38 = vand.u32 2147483647, %v8049_v28  ;;  %v4531_v32 = vor.u32 %v4924_v36, %v4528_v22  ;;  %v2768_v11 = vsel %vm8215_vm6, %v8088_v10, %v2764_v50  ;;  %v2881_v5 = vmul.f32 %v8228_v27, %v8160_v0  ;;  %v9018_v61 = vld [vmem:[#allocation37_spill] sm:$0xff] }
 0x2ba   :  { %3492 = vmatmul.bf16.gmra.mxu0 %v8254_v55  ;;  %3541 = vmatmul.bf16.gmra.mxu1 %v9018_v61  ;;  %v4595_v43 = vor.u32 %v4940_v24, %v4592_v6  ;;  %v2772_v8 = vor.u32 1.1754944e-38, %v2771_v57  ;;  %v2843_v28 = vsel %vm8233_vm10, %v8095_v62, %v2839_v45  ;;  %v2903_v10 = vsel %vm8261_vm0, %v8112_v49, %v2899_v44  ;;  %v1642_v44 = vpop.f32.mrf.mxu2 }
 0x2bb   :  { %3657 = vmatpush.bf16.msrb.mxu0 %v4531_v32  ;;  %v4659_v50 = vor.u32 %v4956_v30, %v4656_v19  ;;  %v2713_v20 = vsel %vm8183_vm2, %v2712_v59, %v2708_v12  ;;  %v2847_v23 = vor.u32 1.1754944e-38, %v2846_v40  ;;  %v2907_v36 = vor.u32 1.1754944e-38, %v2906_v14  ;;  %v1539_v3 = vpop.f32.mrf.mxu0  ;;  %v9020_v12 = vld [vmem:[#allocation15_spill] sm:$0xff]  ;;  %v9021_v32 = vld [vmem:[#allocation10_spill] sm:$0xff] }
 0x2bc   :  { %3706 = vmatpush.bf16.msrb.mxu1 %v4595_v43  ;;  %v4723_v22 = vor.u32 %v4972_v37, %v4720_v33  ;;  %v2773_v57 = vsel %vm8221_vm7, %v2772_v8, %v2768_v11  ;;  %v2822_v24 = vsub.f32 1.0, %v2821_v29  ;;  %vm2845_vm12 = vcmp.eq.f32.partialorder %v2844_v42, 8.507059e+37  ;;  %v1588_v34 = vpop.f32.mrf.mxu1 }
 0x2bd   :  { %vm2905_vm13 = vcmp.eq.f32.partialorder %v2904_v38, 8.507059e+37  ;;  %3755 = vmatpush.bf16.msrb.mxu2 %v4659_v50  ;;  %v2848_v62 = vsel %vm2845_vm12, %v2847_v23, %v2843_v28  ;;  %v2882_v45 = vsub.f32 1.0, %v2881_v5  ;;  %v1587_v9 = vadd.f32 %v1586_v46, %v1537_v16  ;;  %v1691_v38 = vpop.f32.mrf.mxu3 }
 0x2be   :  { %v2908_v49 = vsel %vm2905_vm13, %v2907_v36, %v2903_v10  ;;  %3804 = vmatpush.bf16.msrb.mxu3 %v4723_v22  ;;  %v1690_v59 = vadd.f32 %v1689_v60, %v8194_v41  ;;  %v2960_v40 = vmul.f32 %v2713_v20, %v8945_v1  ;;  %v2964_v14 = vmul.f32 %v2773_v57, %v7922_v26  ;;  %v9022_v20 = vld [vmem:[#allocation38_spill] sm:$0xff]  ;;  %v9023_v57 = vld [vmem:[#allocation44_spill] sm:$0xff] }
 0x2bf   :  { %v1398_v29 = vadd.f32 %v9020_v12, %v9019_v4  ;;  %v1589_v42 = vadd.f32 %v1588_v34, %v1539_v3  ;;  %v2970_v6 = vmul.f32 %v2863_v63, %v9021_v32  ;;  %v2969_v11 = vmul.f32 %v2848_v62, %v8952_v13  ;;  %v9024_v4 = vld [vmem:[#allocation46_spill] sm:$0xff] }
 0x2c0   :  { %v2973_v16 = vmul.f32 %v2908_v49, %v8957_v2  ;;  %v1692_v46 = vadd.f32 %v1691_v38, %v1642_v44  ;;  %v2823_v5 = vmul.f32 %v8210_v54, %v2822_v24  ;;  %v2883_v41 = vmul.f32 %v8228_v27, %v2882_v45 }
 0x2c1   :  { %v3024_v60 = vmul.f32 %v2960_v40, %v1587_v9  ;;  %v3028_v1 = vmul.f32 %v2964_v14, %v1589_v42  ;;  %v3033_v43 = vmul.f32 %v2969_v11, %v1690_v59  ;;  %v3034_v30 = vmul.f32 %v2970_v6, %v1398_v29  ;;  %v9025_v29 = vld [vmem:[#allocation31_spill] sm:$0xff]  ;;  %v9026_v42 = vld [vmem:[#allocation9_spill] sm:$0xff] }
 0x2c2   :  { %v3037_v26 = vmul.f32 %v2973_v16, %v1692_v46  ;;  %vm2826_vm14 = vweird.f32 %v8210_v54  ;;  %v2824_v13 = vadd.f32 %v8210_v54, %v2823_v5  ;;  %v2884_v2 = vadd.f32 %v8228_v27, %v2883_v41 }
 0x2c3   :  { %v8293_v19 = vpack.c.bf16 %v3028_v1, %v3024_v60  ;;  %vm2886_vm15 = vweird.f32 %v8228_v27  ;;  %vm2825_vm1 = vweird.f32 %v8137_v58  ;;  %v2831_v63 = vand.u32 2147483648, %v8137_v58  ;;  %v1542_v28 = vpop.f32.mrf.mxu0 }
 0x2c4   :  { %v8296_v37 = vpack.c.bf16 %v3037_v26, %v3033_v43  ;;  %v2891_v8 = vand.u32 2147483648, %v8160_v0  ;;  %v1591_v10 = vpop.f32.mrf.mxu1  ;;  %vm2827_vm2 = vmor %vm2825_vm1, %vm2826_vm14  ;;  %v2829_v50 = vand.u32 2147483647, %v8137_v58  ;;  %vm2885_vm3 = vweird.f32 %v8160_v0 }
 0x2c5   :  { %3590 = vmatmul.bf16.gmra.mxu2 %v8293_v19  ;;  %v2889_v33 = vand.u32 2147483647, %v8160_v0  ;;  %v8310_v23 = vpack.c.bf16 %v3034_v30, %v9022_v20  ;;  %vm2887_vm4 = vmor %vm2885_vm3, %vm2886_vm15  ;;  %v2828_v36 = vsel %vm2827_vm2, %v8210_v54, %v2824_v13  ;;  %v2832_v24 = vor.u32 1.1754944e-38, %v2831_v63 }
 0x2c6   :  { %3644 = vmatmul.bf16.gmra.mxu3 %v8296_v37  ;;  %v2888_v22 = vsel %vm2887_vm4, %v8228_v27, %v2884_v2  ;;  %v2892_v62 = vor.u32 1.1754944e-38, %v2891_v8  ;;  %vm2830_vm5 = vcmp.eq.f32.partialorder %v2829_v50, 8.507059e+37  ;;  %v1592_v49 = vadd.f32 %v1591_v10, %v1542_v28  ;;  %v9027_v10 = vld [vmem:[#allocation24_spill] sm:$0xff]  ;;  %v9028_v50 = vld [vmem:[#allocation74_spill] sm:$0xff] }
 0x2c7   :  { %vm2890_vm6 = vcmp.eq.f32.partialorder %v2889_v33, 8.507059e+37  ;;  %v2833_v58 = vsel %vm2830_vm5, %v2832_v24, %v2828_v36 }
 0x2c8   :  { %v2893_v45 = vsel %vm2890_vm6, %v2892_v62, %v2888_v22  ;;  %v2968_v44 = vmul.f32 %v2833_v58, %v8966_v25 }
 0x2c9   :  { %v2972_v3 = vmul.f32 %v2893_v45, %v8044_v53 }
 0x2ca   :  { %3497 = vmatmul.bf16.gmra.mxu0 %v8310_v23  ;;  %3546 = vmatmul.bf16.gmra.mxu1 %v9023_v57  ;;  %v3032_v34 = vmul.f32 %v2968_v44, %v1592_v49 }
 0x2cb   :  { %v1544_v0 = vpop.f32.mrf.mxu0 }
 0x2cc   :  { %v1593_v9 = vpop.f32.mrf.mxu1 }
 0x2cd   :  { %v1594_v54 = vadd.f32 %v1593_v9, %v1544_v0 }
 0x2cf   :  { %v3036_v27 = vmul.f32 %v2972_v3, %v1594_v54  ;;  %v9029_v3 = vld [vmem:[#allocation78_spill] sm:$0xff]  ;;  %v9030_v54 = vld [vmem:[#allocation79_spill] sm:$0xff] }
 0x2d1   :  { %v8318_v59 = vpack.c.bf16 %v3036_v27, %v3032_v34 }
 0x2d3   :  { %v3463_v40 = vpop.f32.mrf.mxu0 }
 0x2d4   :  { %v3512_v14 = vpop.f32.mrf.mxu1  ;;  %v3610_v38 = vpop.f32.mrf.mxu3 }
 0x2d5   :  { %3595 = vmatmul.bf16.gmra.mxu2 %v8318_v59  ;;  %v3513_v12 = vadd.f32 %v3512_v14, %v3463_v40 }
 0x2d6   :  { %3805 = vmatmul.bf16.vlgmr.msrb.gmra.mxu3 %v9024_v4 }
 0x2da   :  { %3658 = vmatmul.bf16.vlgmr.msrb.gmra.mxu0 %v9025_v29  ;;  %3707 = vmatmul.bf16.vlgmr.msrb.gmra.mxu1 %v9026_v42 }
 0x2db   :  { %v3465_v25 = vpop.f32.mrf.mxu0 }
 0x2dc   :  { %v3514_v32 = vpop.f32.mrf.mxu1  ;;  %v3612_v6 = vpop.f32.mrf.mxu3 }
 0x2dd   :  { %v3515_v53 = vadd.f32 %v3514_v32, %v3465_v25  ;;  %v9032_v32 = vld [vmem:[#allocation42_spill] sm:$0xff] }
 0x2e3   :  { %v3468_v11 = vpop.f32.mrf.mxu0 }
 0x2e4   :  { %v3517_v16 = vpop.f32.mrf.mxu1  ;;  %v3561_v5 = vpop.f32.mrf.mxu2 }
 0x2e5   :  { %3756 = vmatmul.bf16.vlgmr.msrb.gmra.mxu2 %v7588_v35  ;;  %v3518_v46 = vadd.f32 %v3517_v16, %v3468_v11  ;;  %v3562_v41 = vadd.f32 %v3561_v5, %v3513_v12  ;;  %v3615_v60 = vpop.f32.mrf.mxu3  ;;  %v9033_v16 = vld [vmem:[#allocation43_spill] sm:$0xff] }
 0x2e6   :  { %3810 = vmatmul.bf16.gmra.mxu3 %v7596_v52 }
 0x2e7   :  { %v8328_v1 = vadd.f32 %v3610_v38, %v3562_v41  ;;  %v9031_v38 = vld [vmem:[#allocation8_spill] sm:$0xff] }
 0x2ea   :  { %3663 = vmatmul.bf16.gmra.mxu0 %v6505_v39  ;;  %3712 = vmatmul.bf16.gmra.mxu1 %v6507_v17 }
 0x2eb   :  { %v3470_v43 = vpop.f32.mrf.mxu0 }
 0x2ec   :  { %v3519_v26 = vpop.f32.mrf.mxu1  ;;  %v3563_v13 = vpop.f32.mrf.mxu2 }
 0x2ed   :  { %v3520_v30 = vadd.f32 %v3519_v26, %v3470_v43  ;;  %v3564_v2 = vadd.f32 %v3563_v13, %v3515_v53  ;;  %v3617_v35 = vpop.f32.mrf.mxu3 }
 0x2ef   :  { %v8330_v63 = vadd.f32 %v3612_v6, %v3564_v2 }
 0x2f3   :  { %v3473_v52 = vpop.f32.mrf.mxu0 }
 0x2f4   :  { %v3522_v8 = vpop.f32.mrf.mxu1 }
 0x2f5   :  { %3761 = vmatmul.bf16.gmra.mxu2 %v7696_v18  ;;  %v3523_v39 = vadd.f32 %v3522_v8, %v3473_v52  ;;  %v3566_v28 = vpop.f32.mrf.mxu2 }
 0x2f6   :  { %3815 = vmatmul.bf16.gmra.mxu3 %v7706_v47  ;;  %v3567_v17 = vadd.f32 %v3566_v28, %v3518_v46  ;;  %v3620_v33 = vpop.f32.mrf.mxu3  ;;  %v9034_v46 = vld [vmem:[#allocation11_spill] sm:$0xff] }
 0x2f8   :  { %v8336_v20 = vadd.f32 %v3615_v60, %v3567_v17 }
 0x2fa   :  { %3668 = vmatmul.bf16.gmra.mxu0 %v9027_v10  ;;  %3717 = vmatmul.bf16.gmra.mxu1 %v9028_v50  ;;  %v9035_v10 = vld [vmem:[#allocation85_spill] sm:$0xff] }
 0x2fb   :  { %v3475_v36 = vpop.f32.mrf.mxu0 }
 0x2fc   :  { %v3524_v22 = vpop.f32.mrf.mxu1 }
 0x2fd   :  { %v3525_v24 = vadd.f32 %v3524_v22, %v3475_v36  ;;  %v3568_v62 = vpop.f32.mrf.mxu2 }
 0x2fe   :  { %v3569_v58 = vadd.f32 %v3568_v62, %v3520_v30  ;;  %v3622_v18 = vpop.f32.mrf.mxu3 }
 0x300   :  { %v8338_v45 = vadd.f32 %v3617_v35, %v3569_v58 }
 0x303   :  { %v3478_v47 = vpop.f32.mrf.mxu0 }
 0x304   :  { %v3527_v49 = vpop.f32.mrf.mxu1 }
 0x305   :  { %3766 = vmatmul.bf16.gmra.mxu2 %v7850_v21  ;;  %v3528_v0 = vadd.f32 %v3527_v49, %v3478_v47 }
 0x306   :  { %3820 = vmatmul.bf16.gmra.mxu3 %v7855_v51 }
 0x307   :  { %v3571_v9 = vpop.f32.mrf.mxu2 }
 0x308   :  { %v3572_v44 = vadd.f32 %v3571_v9, %v3523_v39  ;;  %v3625_v34 = vpop.f32.mrf.mxu3 }
 0x30a   :  { %3673 = vmatmul.bf16.gmra.mxu0 %v9029_v3  ;;  %3722 = vmatmul.bf16.gmra.mxu1 %v9030_v54  ;;  %v8344_v27 = vadd.f32 %v3620_v33, %v3572_v44 }
 0x30b   :  { %v3480_v40 = vpop.f32.mrf.mxu0 }
 0x30c   :  { %v3529_v14 = vpop.f32.mrf.mxu1 }
 0x30d   :  { %v3530_v4 = vadd.f32 %v3529_v14, %v3480_v40 }
 0x30f   :  { %v3573_v12 = vpop.f32.mrf.mxu2 }
 0x310   :  { %v3574_v29 = vadd.f32 %v3573_v12, %v3525_v24  ;;  %v3627_v21 = vpop.f32.mrf.mxu3 }
 0x312   :  { %v8346_v42 = vadd.f32 %v3622_v18, %v3574_v29 }
 0x314   :  { %v3532_v25 = vpop.f32.mrf.mxu1 }
 0x315   :  { %3771 = vmatmul.bf16.gmra.mxu2 %v9031_v38  ;;  %v3483_v51 = vpop.f32.mrf.mxu0 }
 0x316   :  { %3825 = vmatmul.bf16.gmra.mxu3 %v9032_v32  ;;  %v3533_v53 = vadd.f32 %v3532_v25, %v3483_v51 }
 0x318   :  { %v3576_v6 = vpop.f32.mrf.mxu2 }
 0x319   :  { %v3577_v11 = vadd.f32 %v3576_v6, %v3528_v0  ;;  %v3630_v5 = vpop.f32.mrf.mxu3 }
 0x31a   :  { %3678 = vmatmul.bf16.gmra.mxu0 %v9033_v16  ;;  %3727 = vmatmul.bf16.gmra.mxu1 %v9034_v46 }
 0x31b   :  { %v8352_v41 = vadd.f32 %v3625_v34, %v3577_v11 }
 0x31c   :  { %v3534_v43 = vpop.f32.mrf.mxu1 }
 0x31d   :  { %v3485_v60 = vpop.f32.mrf.mxu0 }
 0x31e   :  { %v3535_v26 = vadd.f32 %v3534_v43, %v3485_v60 }
 0x320   :  { %v3578_v30 = vpop.f32.mrf.mxu2 }
 0x321   :  { %v3579_v13 = vadd.f32 %v3578_v30, %v3530_v4  ;;  %v3632_v2 = vpop.f32.mrf.mxu3 }
 0x323   :  { %v8354_v35 = vadd.f32 %v3627_v21, %v3579_v13 }
 0x324   :  { %v3537_v8 = vpop.f32.mrf.mxu1 }
 0x325   :  { %3776 = vmatmul.bf16.gmra.mxu2 %v8078_v48  ;;  %v3488_v52 = vpop.f32.mrf.mxu0 }
 0x326   :  { %3830 = vmatmul.bf16.gmra.mxu3 %v8086_v56  ;;  %v3538_v39 = vadd.f32 %v3537_v8, %v3488_v52 }
 0x328   :  { %v3581_v28 = vpop.f32.mrf.mxu2 }
 0x329   :  { %v3582_v17 = vadd.f32 %v3581_v28, %v3533_v53  ;;  %v3635_v50 = vpop.f32.mrf.mxu3 }
 0x32a   :  { %3683 = vmatmul.bf16.gmra.mxu0 %v8124_v7  ;;  %3732 = vmatmul.bf16.gmra.mxu1 %v9035_v10 }
 0x32b   :  { %v8360_v33 = vadd.f32 %v3630_v5, %v3582_v17 }
 0x32c   :  { %v3539_v22 = vpop.f32.mrf.mxu1 }
 0x32d   :  { %v3490_v36 = vpop.f32.mrf.mxu0 }
 0x32e   :  { %v3540_v24 = vadd.f32 %v3539_v22, %v3490_v36 }
 0x330   :  { %v3583_v62 = vpop.f32.mrf.mxu2 }
 0x331   :  { %v3584_v58 = vadd.f32 %v3583_v62, %v3535_v26  ;;  %v3637_v48 = vpop.f32.mrf.mxu3 }
 0x333   :  { %v8362_v18 = vadd.f32 %v3632_v2, %v3584_v58 }
 0x335   :  { %3781 = vmatmul.bf16.gmra.mxu2 %v8192_v31 }
 0x336   :  { %3835 = vmatmul.bf16.gmra.mxu3 %v8208_v15 }
 0x337   :  { %v3493_v56 = vpop.f32.mrf.mxu0  ;;  %v3542_v47 = vpop.f32.mrf.mxu1 }
 0x338   :  { %v3543_v7 = vadd.f32 %v3542_v47, %v3493_v56  ;;  %v3586_v49 = vpop.f32.mrf.mxu2 }
 0x339   :  { %v3587_v0 = vadd.f32 %v3586_v49, %v3538_v39  ;;  %v3640_v9 = vpop.f32.mrf.mxu3 }
 0x33a   :  { %3688 = vmatmul.bf16.gmra.mxu0 %v8254_v55  ;;  %3737 = vmatmul.bf16.gmra.mxu1 %v9018_v61 }
 0x33b   :  { %v8368_v44 = vadd.f32 %v3635_v50, %v3587_v0 }
 0x33f   :  { %v3495_v3 = vpop.f32.mrf.mxu0  ;;  %v3544_v54 = vpop.f32.mrf.mxu1 }
 0x340   :  { %v3545_v34 = vadd.f32 %v3544_v54, %v3495_v3  ;;  %v3588_v40 = vpop.f32.mrf.mxu2 }
 0x341   :  { %v3589_v14 = vadd.f32 %v3588_v40, %v3540_v24  ;;  %v3642_v31 = vpop.f32.mrf.mxu3 }
 0x343   :  { %v8370_v4 = vadd.f32 %v3637_v48, %v3589_v14 }
 0x345   :  { %3786 = vmatmul.bf16.gmra.mxu2 %v8293_v19 }
 0x346   :  { %3840 = vmatmul.bf16.gmra.mxu3 %v8296_v37 }
 0x347   :  { %v3498_v15 = vpop.f32.mrf.mxu0  ;;  %v3547_v12 = vpop.f32.mrf.mxu1 }
 0x348   :  { %v3548_v55 = vadd.f32 %v3547_v12, %v3498_v15  ;;  %v3591_v29 = vpop.f32.mrf.mxu2 }
 0x349   :  { %v3592_v61 = vadd.f32 %v3591_v29, %v3543_v7  ;;  %v3645_v21 = vpop.f32.mrf.mxu3 }
 0x34a   :  { %3693 = vmatmul.bf16.gmra.mxu0 %v8310_v23  ;;  %3742 = vmatmul.bf16.gmra.mxu1 %v9023_v57 }
 0x34b   :  { %v8376_v38 = vadd.f32 %v3640_v9, %v3592_v61 }
 0x34f   :  { %v3500_v51 = vpop.f32.mrf.mxu0  ;;  %v3549_v25 = vpop.f32.mrf.mxu1 }
 0x350   :  { %v3550_v32 = vadd.f32 %v3549_v25, %v3500_v51  ;;  %v3593_v53 = vpop.f32.mrf.mxu2 }
 0x351   :  { %v3594_v6 = vadd.f32 %v3593_v53, %v3545_v34  ;;  %v3647_v19 = vpop.f32.mrf.mxu3 }
 0x353   :  { %v8378_v11 = vadd.f32 %v3642_v31, %v3594_v6 }
 0x355   :  { %3791 = vmatmul.bf16.gmra.mxu2 %v8318_v59 }
 0x357   :  { %v3659_v37 = vpop.f32.mrf.mxu0  ;;  %v3708_v16 = vpop.f32.mrf.mxu1 }
 0x358   :  { %v3596_v46 = vpop.f32.mrf.mxu2  ;;  %v3709_v39 = vadd.f32 %v3708_v16, %v3659_v37 }
 0x359   :  { %v3597_v5 = vadd.f32 %v3596_v46, %v3548_v55  ;;  %v3806_v23 = vpop.f32.mrf.mxu3 }
 0x35b   :  { %v8381_v60 = vadd.f32 %v3645_v21, %v3597_v5 }
 0x35f   :  { %v3661_v57 = vpop.f32.mrf.mxu0  ;;  %v3710_v43 = vpop.f32.mrf.mxu1 }
 0x360   :  { %v3598_v26 = vpop.f32.mrf.mxu2  ;;  %v3711_v24 = vadd.f32 %v3710_v43, %v3661_v57 }
 0x361   :  { %v3599_v30 = vadd.f32 %v3598_v26, %v3550_v32  ;;  %v3808_v13 = vpop.f32.mrf.mxu3 }
 0x363   :  { %v8383_v2 = vadd.f32 %v3647_v19, %v3599_v30 }
 0x367   :  { %v3664_v52 = vpop.f32.mrf.mxu0  ;;  %v3713_v8 = vpop.f32.mrf.mxu1 }
 0x368   :  { %v3757_v28 = vpop.f32.mrf.mxu2  ;;  %v3714_v0 = vadd.f32 %v3713_v8, %v3664_v52 }
 0x369   :  { %v3758_v17 = vadd.f32 %v3757_v28, %v3709_v39  ;;  %v3811_v59 = vpop.f32.mrf.mxu3 }
 0x36b   :  { %v3807_v10 = vadd.f32 %v3806_v23, %v3758_v17 }
 0x36d   :  { %v3846_v50 = vpack.c.bf16 %v3807_v10, %v8328_v1 }
 0x36f   :  { %v3666_v36 = vpop.f32.mrf.mxu0  ;;  %v3715_v22 = vpop.f32.mrf.mxu1  ;;  %3862 = vst [vmem:[%s8452_s3] sm:$0xff] %v3846_v50 }
 0x370   :  { %v3759_v62 = vpop.f32.mrf.mxu2  ;;  %v3716_v31 = vadd.f32 %v3715_v22, %v3666_v36 }
 0x371   :  { %v3760_v58 = vadd.f32 %v3759_v62, %v3711_v24  ;;  %v3813_v48 = vpop.f32.mrf.mxu3 }
 0x373   :  { %v3809_v56 = vadd.f32 %v3808_v13, %v3760_v58 }
 0x375   :  { %v3847_v47 = vpack.c.bf16 %v3809_v56, %v8330_v63 }
 0x377   :  { %v3669_v7 = vpop.f32.mrf.mxu0  ;;  %v3718_v49 = vpop.f32.mrf.mxu1  ;;  %3863 = vst [vmem:[%s8452_s3 + $0x8] sm:$0xff] %v3847_v47 }
 0x378   :  { %v3762_v1 = vpop.f32.mrf.mxu2  ;;  %v3719_v51 = vadd.f32 %v3718_v49, %v3669_v7 }
 0x379   :  { %v3763_v9 = vadd.f32 %v3762_v1, %v3714_v0  ;;  %v3816_v3 = vpop.f32.mrf.mxu3 }
 0x37b   :  { %v3812_v54 = vadd.f32 %v3811_v59, %v3763_v9 }
 0x37d   :  { %v3848_v34 = vpack.c.bf16 %v3812_v54, %v8336_v20 }
 0x37f   :  { %v3671_v40 = vpop.f32.mrf.mxu0  ;;  %v3720_v14 = vpop.f32.mrf.mxu1  ;;  %3864 = vst [vmem:[%s8452_s3 + $0x10] sm:$0xff] %v3848_v34 }
 0x380   :  { %v3764_v63 = vpop.f32.mrf.mxu2  ;;  %v3721_v16 = vadd.f32 %v3720_v14, %v3671_v40 }
 0x381   :  { %v3765_v15 = vadd.f32 %v3764_v63, %v3716_v31  ;;  %v3818_v12 = vpop.f32.mrf.mxu3 }
 0x383   :  { %v3814_v55 = vadd.f32 %v3813_v48, %v3765_v15 }
 0x385   :  { %v3849_v29 = vpack.c.bf16 %v3814_v55, %v8338_v45 }
 0x387   :  { %v3674_v61 = vpop.f32.mrf.mxu0  ;;  %v3723_v21 = vpop.f32.mrf.mxu1  ;;  %3865 = vst [vmem:[%s8452_s3 + $0x18] sm:$0xff] %v3849_v29 }
 0x388   :  { %v3767_v20 = vpop.f32.mrf.mxu2  ;;  %v3724_v30 = vadd.f32 %v3723_v21, %v3674_v61 }
 0x389   :  { %v3768_v25 = vadd.f32 %v3767_v20, %v3719_v51  ;;  %v3821_v32 = vpop.f32.mrf.mxu3 }
 0x38b   :  { %v3817_v53 = vadd.f32 %v3816_v3, %v3768_v25 }
 0x38d   :  { %v3850_v6 = vpack.c.bf16 %v3817_v53, %v8344_v27 }
 0x38f   :  { %v3676_v19 = vpop.f32.mrf.mxu0  ;;  %v3725_v37 = vpop.f32.mrf.mxu1  ;;  %3866 = vst [vmem:[%s8452_s3 + $0x20] sm:$0xff] %v3850_v6 }
 0x390   :  { %v3769_v45 = vpop.f32.mrf.mxu2  ;;  %v3726_v28 = vadd.f32 %v3725_v37, %v3676_v19 }
 0x391   :  { %v3770_v46 = vadd.f32 %v3769_v45, %v3721_v16  ;;  %v3823_v5 = vpop.f32.mrf.mxu3 }
 0x393   :  { %v3819_v23 = vadd.f32 %v3818_v12, %v3770_v46 }
 0x395   :  { %v3851_v57 = vpack.c.bf16 %v3819_v23, %v8346_v42 }
 0x397   :  { %v3679_v43 = vpop.f32.mrf.mxu0  ;;  %v3728_v26 = vpop.f32.mrf.mxu1  ;;  %3867 = vst [vmem:[%s8452_s3 + $0x28] sm:$0xff] %v3851_v57 }
 0x398   :  { %v3772_v27 = vpop.f32.mrf.mxu2  ;;  %v3729_v24 = vadd.f32 %v3728_v26, %v3679_v43 }
 0x399   :  { %v3773_v13 = vadd.f32 %v3772_v27, %v3724_v30  ;;  %v3826_v52 = vpop.f32.mrf.mxu3 }
 0x39b   :  { %v3822_v8 = vadd.f32 %v3821_v32, %v3773_v13 }
 0x39d   :  { %v3852_v39 = vpack.c.bf16 %v3822_v8, %v8352_v41 }
 0x39f   :  { %v3681_v17 = vpop.f32.mrf.mxu0  ;;  %3868 = vst [vmem:[%s8452_s3 + $0x30] sm:$0xff] %v3852_v39  ;;  %v3730_v42 = vpop.f32.mrf.mxu1 }
 0x3a0   :  { %v3774_v59 = vpop.f32.mrf.mxu2  ;;  %v3731_v49 = vadd.f32 %v3730_v42, %v3681_v17 }
 0x3a1   :  { %v3775_v10 = vadd.f32 %v3774_v59, %v3726_v28  ;;  %v3828_v36 = vpop.f32.mrf.mxu3 }
 0x3a3   :  { %v3824_v50 = vadd.f32 %v3823_v5, %v3775_v10 }
 0x3a5   :  { %v3853_v22 = vpack.c.bf16 %v3824_v50, %v8354_v35 }
 0x3a7   :  { %3869 = vst [vmem:[%s8452_s3 + $0x38] sm:$0xff] %v3853_v22  ;;  %v3684_v41 = vpop.f32.mrf.mxu0  ;;  %v3733_v48 = vpop.f32.mrf.mxu1 }
 0x3a8   :  { %v3777_v62 = vpop.f32.mrf.mxu2  ;;  %v3734_v34 = vadd.f32 %v3733_v48, %v3684_v41 }
 0x3a9   :  { %v3778_v58 = vadd.f32 %v3777_v62, %v3729_v24  ;;  %v3831_v7 = vpop.f32.mrf.mxu3 }
 0x3ab   :  { %v3827_v56 = vadd.f32 %v3826_v52, %v3778_v58 }
 0x3ad   :  { %v3854_v47 = vpack.c.bf16 %v3827_v56, %v8360_v33 }
 0x3af   :  { %3870 = vst [vmem:[%s8452_s3 + $0x40] sm:$0xff] %v3854_v47  ;;  %v3686_v1 = vpop.f32.mrf.mxu0  ;;  %v3735_v3 = vpop.f32.mrf.mxu1 }
 0x3b0   :  { %v3779_v0 = vpop.f32.mrf.mxu2  ;;  %v3736_v55 = vadd.f32 %v3735_v3, %v3686_v1 }
 0x3b1   :  { %v3780_v35 = vadd.f32 %v3779_v0, %v3731_v49  ;;  %v3833_v33 = vpop.f32.mrf.mxu3 }
 0x3b3   :  { %v3829_v9 = vadd.f32 %v3828_v36, %v3780_v35 }
 0x3b5   :  { %v3855_v54 = vpack.c.bf16 %v3829_v9, %v8362_v18 }
 0x3b7   :  { %3871 = vst [vmem:[%s8452_s3 + $0x48] sm:$0xff] %v3855_v54  ;;  %v3689_v63 = vpop.f32.mrf.mxu0  ;;  %v3738_v12 = vpop.f32.mrf.mxu1 }
 0x3b8   :  { %v3782_v40 = vpop.f32.mrf.mxu2  ;;  %v3739_v20 = vadd.f32 %v3738_v12, %v3689_v63 }
 0x3b9   :  { %v3783_v14 = vadd.f32 %v3782_v40, %v3734_v34  ;;  %v3836_v61 = vpop.f32.mrf.mxu3 }
 0x3bb   :  { %v3832_v31 = vadd.f32 %v3831_v7, %v3783_v14 }
 0x3bd   :  { %v3856_v15 = vpack.c.bf16 %v3832_v31, %v8368_v44 }
 0x3bf   :  { %3872 = vst [vmem:[%s8452_s3 + $0x50] sm:$0xff] %v3856_v15  ;;  %v3691_v25 = vpop.f32.mrf.mxu0  ;;  %v3740_v32 = vpop.f32.mrf.mxu1 }
 0x3c0   :  { %v3784_v29 = vpop.f32.mrf.mxu2  ;;  %v3741_v16 = vadd.f32 %v3740_v32, %v3691_v25 }
 0x3c1   :  { %v3785_v18 = vadd.f32 %v3784_v29, %v3736_v55  ;;  %v3838_v19 = vpop.f32.mrf.mxu3 }
 0x3c3   :  { %v3834_v21 = vadd.f32 %v3833_v33, %v3785_v18 }
 0x3c5   :  { %v3857_v51 = vpack.c.bf16 %v3834_v21, %v8370_v4 }
 0x3c7   :  { %3873 = vst [vmem:[%s8452_s3 + $0x58] sm:$0xff] %v3857_v51  ;;  %v3694_v46 = vpop.f32.mrf.mxu0  ;;  %v3743_v5 = vpop.f32.mrf.mxu1 }
 0x3c8   :  { %v3787_v44 = vpop.f32.mrf.mxu2  ;;  %v3744_v26 = vadd.f32 %v3743_v5, %v3694_v46 }
 0x3c9   :  { %v3788_v53 = vadd.f32 %v3787_v44, %v3739_v20  ;;  %v3841_v43 = vpop.f32.mrf.mxu3 }
 0x3cb   :  { %v3837_v6 = vadd.f32 %v3836_v61, %v3788_v53 }
 0x3cd   :  { %v3858_v37 = vpack.c.bf16 %v3837_v6, %v8376_v38 }
 0x3cf   :  { %3874 = vst [vmem:[%s8452_s3 + $0x60] sm:$0xff] %v3858_v37  ;;  %v3696_v13 = vpop.f32.mrf.mxu0  ;;  %v3745_v52 = vpop.f32.mrf.mxu1 }
 0x3d0   :  { %v3789_v45 = vpop.f32.mrf.mxu2  ;;  %v3746_v39 = vadd.f32 %v3745_v52, %v3696_v13 }
 0x3d1   :  { %v3790_v4 = vadd.f32 %v3789_v45, %v3741_v16 }
 0x3d3   :  { %v3839_v23 = vadd.f32 %v3838_v19, %v3790_v4 }
 0x3d5   :  { %v3859_v57 = vpack.c.bf16 %v3839_v23, %v8378_v11  ;;  %v3843_v11 = vpop.f32.mrf.mxu3 }
 0x3d7   :  { %3875 = vst [vmem:[%s8452_s3 + $0x68] sm:$0xff] %v3859_v57 }
 0x3d8   :  { %v3792_v30 = vpop.f32.mrf.mxu2 }
 0x3d9   :  { %v3793_v38 = vadd.f32 %v3792_v30, %v3744_v26 }
 0x3db   :  { %v3842_v27 = vadd.f32 %v3841_v43, %v3793_v38 }
 0x3dd   :  { %v3860_v8 = vpack.c.bf16 %v3842_v27, %v8381_v60 }
 0x3df   :  { %3876 = vst [vmem:[%s8452_s3 + $0x70] sm:$0xff] %v3860_v8 }
 0x3e0   :  { %v3794_v28 = vpop.f32.mrf.mxu2 }
 0x3e1   :  { %v3795_v17 = vadd.f32 %v3794_v28, %v3746_v39 }
 0x3e3   :  { %v3844_v42 = vadd.f32 %v3843_v11, %v3795_v17 }
 0x3e5   :  { %v3861_v59 = vpack.c.bf16 %v3844_v42, %v8383_v2 }
 0x3e7   :  { %3877 = vst [vmem:[%s8452_s3 + $0x78] sm:$0xff] %v3861_v59 }
 0x3e8   :  { %3882 = vsyncpa [#allocation3], 1 }
 0x3e9   :  { %3883 = vsyncpa [#allocation5], 1 }

</bundles_post_ra>
